<compile_context>
chip_gen: v7x
topology: tpu7x:2x2x1
jax: 0.10.0
libtpu: 0.0.40
codegen_flags: <defaults>
</compile_context>

<pallas_src>
import numpy as np
import jax
import jax.numpy as jnp
from jax.experimental import pallas as pl
from jax.experimental.pallas import tpu as pltpu

KSIZE = 4          # conv kernel size (kw in the PyTorch module)
PAD = 1            # padw
LRELU_SLOPE = 0.2
BN_EPS = 1e-5
LANE = 128


def _round_up(x, m):
    return (x + m - 1) // m * m


# ---------------------------------------------------------------------------
# Layer plan (mirrors the PyTorch constructor)
# ---------------------------------------------------------------------------
def _layer_configs(input_nc, ndf, n_layers):
    cfgs = [dict(cin=input_nc, cout=ndf, stride=2, bias=True, bn=False, act=True)]
    nf_mult = 1
    for n in range(1, n_layers):
        nf_prev, nf_mult = nf_mult, min(2 ** n, 8)
        cfgs.append(dict(cin=ndf * nf_prev, cout=ndf * nf_mult, stride=2,
                         bias=False, bn=True, act=True))
    nf_prev, nf_mult = nf_mult, min(2 ** n_layers, 8)
    cfgs.append(dict(cin=ndf * nf_prev, cout=ndf * nf_mult, stride=1,
                     bias=False, bn=True, act=True))
    cfgs.append(dict(cin=ndf * nf_mult, cout=1, stride=1,
                     bias=True, bn=False, act=False))
    return cfgs


# ---------------------------------------------------------------------------
# Fused whole-network Pallas kernel (single call, no grid)
# ---------------------------------------------------------------------------
def make_fused_kernel(plan, n_batch, matmul_dtype):
    """All refs are whole arrays resident in VMEM; the activation is carried
    as a single batch-stacked (N*h, w*c) f32 value between layers."""

    def kernel(*refs):
        x_ref = refs[0]
        out_ref = refs[-1]
        idx = 1

        x = x_ref[...].astype(jnp.float32)                  # (N*H, in_pad)

        for lp in plan:
            a_ref, g_ref = refs[idx], refs[idx + 1]
            idx += 2
            if lp["bias"]:
                b_ref = refs[idx]
                idx += 1
            if lp["bn"]:
                gamma_ref, beta_ref, fold_ref, rep_ref = refs[idx:idx + 4]
                idx += 4

            # ---- conv: Y = concat_ki(A_ki @ X) @ G_all (+ bias) ----------
            xm = x.astype(matmul_dtype)
            # A_ki is 0/1 block-diagonal -> selection is exact in matmul_dtype
            rows = [jnp.dot(a_ref[ki], xm, preferred_element_type=matmul_dtype)
                    for ki in range(KSIZE)]
            rows_cat = jnp.concatenate(rows, axis=1)        # (N*ho, 4*in_pad)
            y = jnp.dot(rows_cat, g_ref[...],
                        preferred_element_type=jnp.float32)  # (N*ho, out_pad) f32
            if lp["bias"]:
                y = y + b_ref[...]

            # ---- training-mode BatchNorm2d (batch statistics) ------------
            if lp["bn"]:
                m_rows = n_batch * lp["ho"]
                cnt = float(n_batch * lp["ho"] * lp["wo"])
                ones_row = jnp.ones((1, m_rows), jnp.float32)
                col_sum = jnp.dot(ones_row, y, preferred_element_type=jnp.float32)
                col_sq = jnp.dot(ones_row, y * y,
                                 preferred_element_type=jnp.float32)
                ch_sum = jnp.dot(col_sum, fold_ref[...],
                                 preferred_element_type=jnp.float32)  # (1, cout)
                ch_sq = jnp.dot(col_sq, fold_ref[...],
                                preferred_element_type=jnp.float32)
                mean = ch_sum / cnt
                var = ch_sq / cnt - mean * mean              # biased (PyTorch norm)
                scale = gamma_ref[...] * jax.lax.rsqrt(var + BN_EPS)
                shift = beta_ref[...] - mean * scale
                scale_flat = jnp.dot(scale, rep_ref[...],
                                     preferred_element_type=jnp.float32)
                shift_flat = jnp.dot(shift, rep_ref[...],
                                     preferred_element_type=jnp.float32)
                y = y * scale_flat + shift_flat

            # ---- LeakyReLU(0.2) ------------------------------------------
            if lp["act"]:
                y = jnp.maximum(y, LRELU_SLOPE * y)

            x = y

        out_ref[...] = x.astype(out_ref.dtype)

    return kernel


# ---------------------------------------------------------------------------
# Host-side folding: conv weights + padding + stride -> GEMM operands
# ---------------------------------------------------------------------------
def _selection_matrices(h_in, w_in, ho, wo, stride):
    """0/1 matrices baking zero-padding and stride into the conv GEMMs."""
    a = np.zeros((KSIZE, ho, h_in), np.float32)      # row (H) selection per ki
    sel = np.zeros((KSIZE, w_in, wo), np.float32)    # column (W) selection per kj
    for k in range(KSIZE):
        for o in range(ho):
            h = stride * o + k - PAD
            if 0 <= h < h_in:
                a[k, o, h] = 1.0
        for o in range(wo):
            w = stride * o + k - PAD
            if 0 <= w < w_in:
                sel[k, w, o] = 1.0
    return a, sel


def prepare_network(params, input_nc, ndf, n_layers, N, H, W, matmul_dtype):
    cfgs = _layer_configs(input_nc, ndf, n_layers)
    conv_names = (["conv0"] + [f"conv{n}" for n in range(1, n_layers + 1)]
                  + ["conv_final"])
    bn_names = [None] + [f"bn{n}" for n in range(1, n_layers + 1)] + [None]

    plan, consts = [], []
    h_in, w_in = H, W
    in_pad = _round_up(W * input_nc, LANE)            # padded lane width of input
    for cfg, cname, bname in zip(cfgs, conv_names, bn_names):
        cin, cout, s = cfg["cin"], cfg["cout"], cfg["stride"]
        ho = (h_in + 2 * PAD - KSIZE) // s + 1
        wo = (w_in + 2 * PAD - KSIZE) // s + 1
        wc_out = wo * cout
        out_pad = _round_up(wc_out, LANE)

        w_conv, b_conv = params[cname]                # HWIO (4,4,cin,cout), (cout,)
        a_np, sel_np = _selection_matrices(h_in, w_in, ho, wo, s)

        # batch-stacked block-diagonal row-selection: (KSIZE, N*ho, N*h_in)
        a_bd = np.zeros((KSIZE, N * ho, N * h_in), np.float32)
        for n in range(N):
            a_bd[:, n * ho:(n + 1) * ho, n * h_in:(n + 1) * h_in] = a_np
        a = jnp.asarray(a_bd).astype(matmul_dtype)

        # G_all[ki*in_pad + w*cin+ci, ow*cout+co] = sum_kj sel[kj,w,ow]*W[ki,kj,ci,co]
        g = jnp.einsum("jwo,kjcd->kwcod", jnp.asarray(sel_np), w_conv)
        g = g.reshape(KSIZE, w_in * cin, wc_out)
        g = jnp.pad(g, ((0, 0), (0, in_pad - w_in * cin), (0, out_pad - wc_out)))
        g = g.reshape(KSIZE * in_pad, out_pad).astype(matmul_dtype)

        layer_consts = [a, g]
        if cfg["bias"]:
            bias_flat = jnp.pad(jnp.tile(b_conv, wo), (0, out_pad - wc_out))
            layer_consts.append(bias_flat.reshape(1, out_pad).astype(jnp.float32))
        if cfg["bn"]:
            gamma, beta = params[bname]
            fold = np.zeros((out_pad, cout), np.float32)     # sum over ow
            for ow in range(wo):
                fold[ow * cout:(ow + 1) * cout, :] = np.eye(cout, dtype=np.float32)
            rep = np.ascontiguousarray(fold.T)               # replicate over ow
            layer_consts += [gamma.reshape(1, cout).astype(jnp.float32),
                             beta.reshape(1, cout).astype(jnp.float32),
                             jnp.asarray(fold), jnp.asarray(rep)]
        consts += layer_consts
        plan.append(dict(ho=ho, wo=wo, cout=cout, out_pad=out_pad,
                         bias=cfg["bias"], bn=cfg["bn"], act=cfg["act"]))
        h_in, w_in, in_pad = ho, wo, out_pad
    return plan, consts


def build_forward(params, input_nc, ndf, n_layers, N, H, W,
                  matmul_dtype=jnp.bfloat16):
    plan, consts = prepare_network(params, input_nc, ndf, n_layers, N, H, W,
                                   matmul_dtype)
    kernel = make_fused_kernel(plan, N, matmul_dtype)
    last = plan[-1]
    ho_f, wo_f, cout_f, out_pad_f = (last["ho"], last["wo"], last["cout"],
                                     last["out_pad"])
    in_pad0 = _round_up(W * input_nc, LANE)

    vmem_spec = pl.BlockSpec(memory_space=pltpu.MemorySpace.VMEM)
    fused_call = pl.pallas_call(
        kernel,
        out_shape=jax.ShapeDtypeStruct((N * ho_f, out_pad_f), jnp.float32),
        in_specs=[vmem_spec] * (1 + len(consts)),
        out_specs=vmem_spec,
        # total operand + activation footprint is ~1.2 MiB; 32 MiB is safe on
        # v5e/v6e (128 MiB VMEM) and v7x (64 MiB).
        compiler_params=pltpu.CompilerParams(vmem_limit_bytes=32 * 1024 * 1024),
    )

    def forward(x_nchw):
        # NCHW -> batch-stacked lane-dense (N*H, W*C) layout, lanes padded to 128
        x = jnp.transpose(x_nchw, (0, 2, 3, 1)).reshape(N * H, W * input_nc)
        x = jnp.pad(x, ((0, 0), (0, in_pad0 - W * input_nc)))
        y = fused_call(x, *consts)                       # (N*ho_f, out_pad_f)
        y = y[:, :wo_f * cout_f].reshape(N, ho_f, wo_f, cout_f)
        return jnp.transpose(y, (0, 3, 1, 2))            # NHWC -> NCHW

    return forward


# ---------------------------------------------------------------------------
# Parameter init (deterministic synthetic, PyTorch-like fan-in uniform)
# ---------------------------------------------------------------------------
def init_params(key, input_nc, ndf, n_layers):
    def conv_p(k, cin, cout, with_bias):
        k1, k2 = jax.random.split(k)
        bound = 1.0 / np.sqrt(cin * KSIZE * KSIZE)
        w = jax.random.uniform(k1, (KSIZE, KSIZE, cin, cout), jnp.float32,
                               -bound, bound)                 # HWIO
        if with_bias:
            b = jax.random.uniform(k2, (cout,), jnp.float32, -bound, bound)
        else:
            b = jnp.zeros((cout,), jnp.float32)
        return w, b

    keys = jax.random.split(key, n_layers + 2)
    params = {}
    params["conv0"] = conv_p(keys[0], input_nc, ndf, True)     # bias=True
    nf_mult = 1
    for n in range(1, n_layers):
        nf_prev, nf_mult = nf_mult, min(2 ** n, 8)
        params[f"conv{n}"] = conv_p(keys[n], ndf * nf_prev, ndf * nf_mult, False)
        params[f"bn{n}"] = (jnp.ones((ndf * nf_mult,), jnp.float32),
                            jnp.zeros((ndf * nf_mult,), jnp.float32))
    nf_prev, nf_mult = nf_mult, min(2 ** n_layers, 8)
    params[f"conv{n_layers}"] = conv_p(keys[n_layers], ndf * nf_prev,
                                       ndf * nf_mult, False)
    params[f"bn{n_layers}"] = (jnp.ones((ndf * nf_mult,), jnp.float32),
                               jnp.zeros((ndf * nf_mult,), jnp.float32))
    params["conv_final"] = conv_p(keys[n_layers + 1], ndf * nf_mult, 1, True)
    return params


# ---------------------------------------------------------------------------
# Pure-JAX reference (for correctness check)
# ---------------------------------------------------------------------------
def reference_forward(x_nchw, params, n_layers):
    x = jnp.transpose(x_nchw, (0, 2, 3, 1))

    def conv(x, w, b, s):
        y = jax.lax.conv_general_dilated(
            x, w, (s, s), ((PAD, PAD), (PAD, PAD)),
            dimension_numbers=("NHWC", "HWIO", "NHWC"),
            precision=jax.lax.Precision.HIGHEST)
        return y + b

    def lrelu(v):
        return jnp.where(v >= 0, v, LRELU_SLOPE * v)

    def bn(v, g, bt):
        m = jnp.mean(v, axis=(0, 1, 2))
        var = jnp.var(v, axis=(0, 1, 2))
        return (v - m) * jax.lax.rsqrt(var + BN_EPS) * g + bt

    w, b = params["conv0"]
    x = lrelu(conv(x, w, b, 2))
    for n in range(1, n_layers):
        w, b = params[f"conv{n}"]
        x = conv(x, w, b, 2)
        g, bt = params[f"bn{n}"]
        x = lrelu(bn(x, g, bt))
    w, b = params[f"conv{n_layers}"]
    x = conv(x, w, b, 1)
    g, bt = params[f"bn{n_layers}"]
    x = lrelu(bn(x, g, bt))
    w, b = params["conv_final"]
    x = conv(x, w, b, 1)
    return jnp.transpose(x, (0, 3, 1, 2))


# ---------------------------------------------------------------------------
if __name__ == "__main__":
    input_nc, ndf, n_layers = 3, 8, 3
    N, H, W = 2, 32, 32

    key = jax.random.PRNGKey(0)
    kx, kp = jax.random.split(key)
    x = jax.random.normal(kx, (N, input_nc, H, W), jnp.float32)   # NCHW like PyTorch
    params = init_params(kp, input_nc, ndf, n_layers)

    ref = jax.block_until_ready(reference_forward(x, params, n_layers))

    # f32 MXU operands -- tight correctness check.
    fwd_f32 = jax.jit(build_forward(params, input_nc, ndf, n_layers, N, H, W,
                                    matmul_dtype=jnp.float32))
    out_f32 = jax.block_until_ready(fwd_f32(x))
    assert out_f32.shape == (N, 1, 2, 2), out_f32.shape
    np.testing.assert_allclose(np.asarray(out_f32), np.asarray(ref),
                               rtol=5e-3, atol=5e-3)

    # bf16 MXU operands (full MXU rate on v5e/v6e/v7x), f32 accumulate + f32 BN/LReLU.
    fwd_bf16 = jax.jit(build_forward(params, input_nc, ndf, n_layers, N, H, W,
                                     matmul_dtype=jnp.bfloat16))
    out_bf16 = jax.block_until_ready(fwd_bf16(x))
    assert out_bf16.shape == (N, 1, 2, 2), out_bf16.shape
    np.testing.assert_allclose(np.asarray(out_bf16), np.asarray(ref),
                               rtol=5e-2, atol=5e-2)

    print("KERNEL_OK")
</pallas_src>

<mosaic_0001>
module attributes {stable_mosaic.version = 11 : i64} {
  func.func @kernel(%arg0: memref<64x128xf32, #tpu.memory_space<vmem>>, %arg1: memref<4x32x64xf32, #tpu.memory_space<vmem>>, %arg2: memref<512x128xf32, #tpu.memory_space<vmem>>, %arg3: memref<1x128xf32, #tpu.memory_space<vmem>>, %arg4: memref<4x16x32xf32, #tpu.memory_space<vmem>>, %arg5: memref<512x128xf32, #tpu.memory_space<vmem>>, %arg6: memref<1x16xf32, #tpu.memory_space<vmem>>, %arg7: memref<1x16xf32, #tpu.memory_space<vmem>>, %arg8: memref<128x16xf32, #tpu.memory_space<vmem>>, %arg9: memref<16x128xf32, #tpu.memory_space<vmem>>, %arg10: memref<4x8x16xf32, #tpu.memory_space<vmem>>, %arg11: memref<512x128xf32, #tpu.memory_space<vmem>>, %arg12: memref<1x32xf32, #tpu.memory_space<vmem>>, %arg13: memref<1x32xf32, #tpu.memory_space<vmem>>, %arg14: memref<128x32xf32, #tpu.memory_space<vmem>>, %arg15: memref<32x128xf32, #tpu.memory_space<vmem>>, %arg16: memref<4x6x8xf32, #tpu.memory_space<vmem>>, %arg17: memref<512x256xf32, #tpu.memory_space<vmem>>, %arg18: memref<1x64xf32, #tpu.memory_space<vmem>>, %arg19: memref<1x64xf32, #tpu.memory_space<vmem>>, %arg20: memref<256x64xf32, #tpu.memory_space<vmem>>, %arg21: memref<64x256xf32, #tpu.memory_space<vmem>>, %arg22: memref<4x4x6xf32, #tpu.memory_space<vmem>>, %arg23: memref<1024x128xf32, #tpu.memory_space<vmem>>, %arg24: memref<1x128xf32, #tpu.memory_space<vmem>>, %arg25: memref<4x128xf32, #tpu.memory_space<vmem>>) attributes {dimension_semantics = [], scalar_prefetch = 0 : i64, scratch_operands = 0 : i64, tpu.core_type = #tpu.core_type<tc>} {
    %c0 = arith.constant 0 : index
    %c0_0 = arith.constant 0 : index
    %0 = vector.load %arg0[%c0, %c0_0] : memref<64x128xf32, #tpu.memory_space<vmem>>, vector<64x128xf32>
    %c0_1 = arith.constant 0 : index
    %c0_2 = arith.constant 0 : index
    %c0_3 = arith.constant 0 : index
    %1 = vector.load %arg1[%c0_1, %c0_2, %c0_3] : memref<4x32x64xf32, #tpu.memory_space<vmem>>, vector<1x32x64xf32>
    %2 = vector.shape_cast %1 : vector<1x32x64xf32> to vector<32x64xf32>
    %cst = arith.constant dense<0.000000e+00> : vector<32x128xf32>
    %3 = tpu.matmul %2, %0, %cst {dimension_numbers = #tpu.dot_dimension_numbers<[1], [0], [0], [1], [0, 0, 1, 1], [], []>} : vector<32x64xf32>, vector<64x128xf32>, vector<32x128xf32> -> vector<32x128xf32>
    %c1 = arith.constant 1 : index
    %c0_4 = arith.constant 0 : index
    %c0_5 = arith.constant 0 : index
    %4 = vector.load %arg1[%c1, %c0_4, %c0_5] : memref<4x32x64xf32, #tpu.memory_space<vmem>>, vector<1x32x64xf32>
    %5 = vector.shape_cast %4 : vector<1x32x64xf32> to vector<32x64xf32>
    %cst_6 = arith.constant dense<0.000000e+00> : vector<32x128xf32>
    %6 = tpu.matmul %5, %0, %cst_6 {dimension_numbers = #tpu.dot_dimension_numbers<[1], [0], [0], [1], [0, 0, 1, 1], [], []>} : vector<32x64xf32>, vector<64x128xf32>, vector<32x128xf32> -> vector<32x128xf32>
    %c2 = arith.constant 2 : index
    %c0_7 = arith.constant 0 : index
    %c0_8 = arith.constant 0 : index
    %7 = vector.load %arg1[%c2, %c0_7, %c0_8] : memref<4x32x64xf32, #tpu.memory_space<vmem>>, vector<1x32x64xf32>
    %8 = vector.shape_cast %7 : vector<1x32x64xf32> to vector<32x64xf32>
    %cst_9 = arith.constant dense<0.000000e+00> : vector<32x128xf32>
    %9 = tpu.matmul %8, %0, %cst_9 {dimension_numbers = #tpu.dot_dimension_numbers<[1], [0], [0], [1], [0, 0, 1, 1], [], []>} : vector<32x64xf32>, vector<64x128xf32>, vector<32x128xf32> -> vector<32x128xf32>
    %c3 = arith.constant 3 : index
    %c0_10 = arith.constant 0 : index
    %c0_11 = arith.constant 0 : index
    %10 = vector.load %arg1[%c3, %c0_10, %c0_11] : memref<4x32x64xf32, #tpu.memory_space<vmem>>, vector<1x32x64xf32>
    %11 = vector.shape_cast %10 : vector<1x32x64xf32> to vector<32x64xf32>
    %cst_12 = arith.constant dense<0.000000e+00> : vector<32x128xf32>
    %12 = tpu.matmul %11, %0, %cst_12 {dimension_numbers = #tpu.dot_dimension_numbers<[1], [0], [0], [1], [0, 0, 1, 1], [], []>} : vector<32x64xf32>, vector<64x128xf32>, vector<32x128xf32> -> vector<32x128xf32>
    %13 = tpu.concatenate %3, %6, %9, %12 in 1 : vector<32x128xf32>, vector<32x128xf32>, vector<32x128xf32>, vector<32x128xf32> -> vector<32x512xf32>
    %c0_13 = arith.constant 0 : index
    %c0_14 = arith.constant 0 : index
    %14 = vector.load %arg2[%c0_13, %c0_14] : memref<512x128xf32, #tpu.memory_space<vmem>>, vector<512x128xf32>
    %cst_15 = arith.constant dense<0.000000e+00> : vector<32x128xf32>
    %15 = tpu.matmul %13, %14, %cst_15 {dimension_numbers = #tpu.dot_dimension_numbers<[1], [0], [0], [1], [0, 0, 1, 1], [], []>} : vector<32x512xf32>, vector<512x128xf32>, vector<32x128xf32> -> vector<32x128xf32>
    %c0_16 = arith.constant 0 : index
    %c0_17 = arith.constant 0 : index
    %16 = vector.load %arg3[%c0_16, %c0_17] : memref<1x128xf32, #tpu.memory_space<vmem>>, vector<1x128xf32>
    %17 = vector.broadcast %16 : vector<1x128xf32> to vector<32x128xf32>
    %18 = arith.addf %15, %17 : vector<32x128xf32>
    %cst_18 = arith.constant 2.000000e-01 : f32
    %19 = vector.broadcast %cst_18 : f32 to vector<32x128xf32>
    %20 = arith.mulf %19, %18 : vector<32x128xf32>
    %21 = arith.maximumf %18, %20 : vector<32x128xf32>
    %c0_19 = arith.constant 0 : index
    %c0_20 = arith.constant 0 : index
    %c0_21 = arith.constant 0 : index
    %22 = vector.load %arg4[%c0_19, %c0_20, %c0_21] : memref<4x16x32xf32, #tpu.memory_space<vmem>>, vector<1x16x32xf32>
    %23 = vector.shape_cast %22 : vector<1x16x32xf32> to vector<16x32xf32>
    %cst_22 = arith.constant dense<0.000000e+00> : vector<16x128xf32>
    %24 = tpu.matmul %23, %21, %cst_22 {dimension_numbers = #tpu.dot_dimension_numbers<[1], [0], [0], [1], [0, 0, 1, 1], [], []>} : vector<16x32xf32>, vector<32x128xf32>, vector<16x128xf32> -> vector<16x128xf32>
    %c1_23 = arith.constant 1 : index
    %c0_24 = arith.constant 0 : index
    %c0_25 = arith.constant 0 : index
    %25 = vector.load %arg4[%c1_23, %c0_24, %c0_25] : memref<4x16x32xf32, #tpu.memory_space<vmem>>, vector<1x16x32xf32>
    %26 = vector.shape_cast %25 : vector<1x16x32xf32> to vector<16x32xf32>
    %cst_26 = arith.constant dense<0.000000e+00> : vector<16x128xf32>
    %27 = tpu.matmul %26, %21, %cst_26 {dimension_numbers = #tpu.dot_dimension_numbers<[1], [0], [0], [1], [0, 0, 1, 1], [], []>} : vector<16x32xf32>, vector<32x128xf32>, vector<16x128xf32> -> vector<16x128xf32>
    %c2_27 = arith.constant 2 : index
    %c0_28 = arith.constant 0 : index
    %c0_29 = arith.constant 0 : index
    %28 = vector.load %arg4[%c2_27, %c0_28, %c0_29] : memref<4x16x32xf32, #tpu.memory_space<vmem>>, vector<1x16x32xf32>
    %29 = vector.shape_cast %28 : vector<1x16x32xf32> to vector<16x32xf32>
    %cst_30 = arith.constant dense<0.000000e+00> : vector<16x128xf32>
    %30 = tpu.matmul %29, %21, %cst_30 {dimension_numbers = #tpu.dot_dimension_numbers<[1], [0], [0], [1], [0, 0, 1, 1], [], []>} : vector<16x32xf32>, vector<32x128xf32>, vector<16x128xf32> -> vector<16x128xf32>
    %c3_31 = arith.constant 3 : index
    %c0_32 = arith.constant 0 : index
    %c0_33 = arith.constant 0 : index
    %31 = vector.load %arg4[%c3_31, %c0_32, %c0_33] : memref<4x16x32xf32, #tpu.memory_space<vmem>>, vector<1x16x32xf32>
    %32 = vector.shape_cast %31 : vector<1x16x32xf32> to vector<16x32xf32>
    %cst_34 = arith.constant dense<0.000000e+00> : vector<16x128xf32>
    %33 = tpu.matmul %32, %21, %cst_34 {dimension_numbers = #tpu.dot_dimension_numbers<[1], [0], [0], [1], [0, 0, 1, 1], [], []>} : vector<16x32xf32>, vector<32x128xf32>, vector<16x128xf32> -> vector<16x128xf32>
    %34 = tpu.concatenate %24, %27, %30, %33 in 1 : vector<16x128xf32>, vector<16x128xf32>, vector<16x128xf32>, vector<16x128xf32> -> vector<16x512xf32>
    %c0_35 = arith.constant 0 : index
    %c0_36 = arith.constant 0 : index
    %35 = vector.load %arg5[%c0_35, %c0_36] : memref<512x128xf32, #tpu.memory_space<vmem>>, vector<512x128xf32>
    %cst_37 = arith.constant dense<0.000000e+00> : vector<16x128xf32>
    %36 = tpu.matmul %34, %35, %cst_37 {dimension_numbers = #tpu.dot_dimension_numbers<[1], [0], [0], [1], [0, 0, 1, 1], [], []>} : vector<16x512xf32>, vector<512x128xf32>, vector<16x128xf32> -> vector<16x128xf32>
    %cst_38 = arith.constant 1.000000e+00 : f32
    %37 = vector.broadcast %cst_38 : f32 to vector<1x16xf32>
    %cst_39 = arith.constant dense<0.000000e+00> : vector<1x128xf32>
    %38 = tpu.matmul %37, %36, %cst_39 {dimension_numbers = #tpu.dot_dimension_numbers<[1], [0], [0], [1], [0, 0, 1, 1], [], []>} : vector<1x16xf32>, vector<16x128xf32>, vector<1x128xf32> -> vector<1x128xf32>
    %39 = arith.mulf %36, %36 : vector<16x128xf32>
    %cst_40 = arith.constant dense<0.000000e+00> : vector<1x128xf32>
    %40 = tpu.matmul %37, %39, %cst_40 {dimension_numbers = #tpu.dot_dimension_numbers<[1], [0], [0], [1], [0, 0, 1, 1], [], []>} : vector<1x16xf32>, vector<16x128xf32>, vector<1x128xf32> -> vector<1x128xf32>
    %c0_41 = arith.constant 0 : index
    %c0_42 = arith.constant 0 : index
    %41 = vector.load %arg8[%c0_41, %c0_42] : memref<128x16xf32, #tpu.memory_space<vmem>>, vector<128x16xf32>
    %cst_43 = arith.constant dense<0.000000e+00> : vector<1x16xf32>
    %42 = tpu.matmul %38, %41, %cst_43 {dimension_numbers = #tpu.dot_dimension_numbers<[1], [0], [0], [1], [0, 0, 1, 1], [], []>} : vector<1x128xf32>, vector<128x16xf32>, vector<1x16xf32> -> vector<1x16xf32>
    %c0_44 = arith.constant 0 : index
    %c0_45 = arith.constant 0 : index
    %43 = vector.load %arg8[%c0_44, %c0_45] : memref<128x16xf32, #tpu.memory_space<vmem>>, vector<128x16xf32>
    %cst_46 = arith.constant dense<0.000000e+00> : vector<1x16xf32>
    %44 = tpu.matmul %40, %43, %cst_46 {dimension_numbers = #tpu.dot_dimension_numbers<[1], [0], [0], [1], [0, 0, 1, 1], [], []>} : vector<1x128xf32>, vector<128x16xf32>, vector<1x16xf32> -> vector<1x16xf32>
    %cst_47 = arith.constant 1.280000e+02 : f32
    %45 = vector.broadcast %cst_47 : f32 to vector<1x16xf32>
    %46 = arith.divf %42, %45 : vector<1x16xf32>
    %cst_48 = arith.constant 1.280000e+02 : f32
    %47 = vector.broadcast %cst_48 : f32 to vector<1x16xf32>
    %48 = arith.divf %44, %47 : vector<1x16xf32>
    %49 = arith.mulf %46, %46 : vector<1x16xf32>
    %50 = arith.subf %48, %49 : vector<1x16xf32>
    %c0_49 = arith.constant 0 : index
    %c0_50 = arith.constant 0 : index
    %51 = vector.load %arg6[%c0_49, %c0_50] : memref<1x16xf32, #tpu.memory_space<vmem>>, vector<1x16xf32>
    %cst_51 = arith.constant 9.99999974E-6 : f32
    %52 = vector.broadcast %cst_51 : f32 to vector<1x16xf32>
    %53 = arith.addf %50, %52 : vector<1x16xf32>
    %54 = math.rsqrt %53 : vector<1x16xf32>
    %55 = arith.mulf %51, %54 : vector<1x16xf32>
    %c0_52 = arith.constant 0 : index
    %c0_53 = arith.constant 0 : index
    %56 = vector.load %arg7[%c0_52, %c0_53] : memref<1x16xf32, #tpu.memory_space<vmem>>, vector<1x16xf32>
    %57 = arith.mulf %46, %55 : vector<1x16xf32>
    %58 = arith.subf %56, %57 : vector<1x16xf32>
    %c0_54 = arith.constant 0 : index
    %c0_55 = arith.constant 0 : index
    %59 = vector.load %arg9[%c0_54, %c0_55] : memref<16x128xf32, #tpu.memory_space<vmem>>, vector<16x128xf32>
    %cst_56 = arith.constant dense<0.000000e+00> : vector<1x128xf32>
    %60 = tpu.matmul %55, %59, %cst_56 {dimension_numbers = #tpu.dot_dimension_numbers<[1], [0], [0], [1], [0, 0, 1, 1], [], []>} : vector<1x16xf32>, vector<16x128xf32>, vector<1x128xf32> -> vector<1x128xf32>
    %c0_57 = arith.constant 0 : index
    %c0_58 = arith.constant 0 : index
    %61 = vector.load %arg9[%c0_57, %c0_58] : memref<16x128xf32, #tpu.memory_space<vmem>>, vector<16x128xf32>
    %cst_59 = arith.constant dense<0.000000e+00> : vector<1x128xf32>
    %62 = tpu.matmul %58, %61, %cst_59 {dimension_numbers = #tpu.dot_dimension_numbers<[1], [0], [0], [1], [0, 0, 1, 1], [], []>} : vector<1x16xf32>, vector<16x128xf32>, vector<1x128xf32> -> vector<1x128xf32>
    %63 = vector.broadcast %60 : vector<1x128xf32> to vector<16x128xf32>
    %64 = arith.mulf %36, %63 : vector<16x128xf32>
    %65 = vector.broadcast %62 : vector<1x128xf32> to vector<16x128xf32>
    %66 = arith.addf %64, %65 : vector<16x128xf32>
    %cst_60 = arith.constant 2.000000e-01 : f32
    %67 = vector.broadcast %cst_60 : f32 to vector<16x128xf32>
    %68 = arith.mulf %67, %66 : vector<16x128xf32>
    %69 = arith.maximumf %66, %68 : vector<16x128xf32>
    %c0_61 = arith.constant 0 : index
    %c0_62 = arith.constant 0 : index
    %c0_63 = arith.constant 0 : index
    %70 = vector.load %arg10[%c0_61, %c0_62, %c0_63] : memref<4x8x16xf32, #tpu.memory_space<vmem>>, vector<1x8x16xf32>
    %71 = vector.shape_cast %70 : vector<1x8x16xf32> to vector<8x16xf32>
    %cst_64 = arith.constant dense<0.000000e+00> : vector<8x128xf32>
    %72 = tpu.matmul %71, %69, %cst_64 {dimension_numbers = #tpu.dot_dimension_numbers<[1], [0], [0], [1], [0, 0, 1, 1], [], []>} : vector<8x16xf32>, vector<16x128xf32>, vector<8x128xf32> -> vector<8x128xf32>
    %c1_65 = arith.constant 1 : index
    %c0_66 = arith.constant 0 : index
    %c0_67 = arith.constant 0 : index
    %73 = vector.load %arg10[%c1_65, %c0_66, %c0_67] : memref<4x8x16xf32, #tpu.memory_space<vmem>>, vector<1x8x16xf32>
    %74 = vector.shape_cast %73 : vector<1x8x16xf32> to vector<8x16xf32>
    %cst_68 = arith.constant dense<0.000000e+00> : vector<8x128xf32>
    %75 = tpu.matmul %74, %69, %cst_68 {dimension_numbers = #tpu.dot_dimension_numbers<[1], [0], [0], [1], [0, 0, 1, 1], [], []>} : vector<8x16xf32>, vector<16x128xf32>, vector<8x128xf32> -> vector<8x128xf32>
    %c2_69 = arith.constant 2 : index
    %c0_70 = arith.constant 0 : index
    %c0_71 = arith.constant 0 : index
    %76 = vector.load %arg10[%c2_69, %c0_70, %c0_71] : memref<4x8x16xf32, #tpu.memory_space<vmem>>, vector<1x8x16xf32>
    %77 = vector.shape_cast %76 : vector<1x8x16xf32> to vector<8x16xf32>
    %cst_72 = arith.constant dense<0.000000e+00> : vector<8x128xf32>
    %78 = tpu.matmul %77, %69, %cst_72 {dimension_numbers = #tpu.dot_dimension_numbers<[1], [0], [0], [1], [0, 0, 1, 1], [], []>} : vector<8x16xf32>, vector<16x128xf32>, vector<8x128xf32> -> vector<8x128xf32>
    %c3_73 = arith.constant 3 : index
    %c0_74 = arith.constant 0 : index
    %c0_75 = arith.constant 0 : index
    %79 = vector.load %arg10[%c3_73, %c0_74, %c0_75] : memref<4x8x16xf32, #tpu.memory_space<vmem>>, vector<1x8x16xf32>
    %80 = vector.shape_cast %79 : vector<1x8x16xf32> to vector<8x16xf32>
    %cst_76 = arith.constant dense<0.000000e+00> : vector<8x128xf32>
    %81 = tpu.matmul %80, %69, %cst_76 {dimension_numbers = #tpu.dot_dimension_numbers<[1], [0], [0], [1], [0, 0, 1, 1], [], []>} : vector<8x16xf32>, vector<16x128xf32>, vector<8x128xf32> -> vector<8x128xf32>
    %82 = tpu.concatenate %72, %75, %78, %81 in 1 : vector<8x128xf32>, vector<8x128xf32>, vector<8x128xf32>, vector<8x128xf32> -> vector<8x512xf32>
    %c0_77 = arith.constant 0 : index
    %c0_78 = arith.constant 0 : index
    %83 = vector.load %arg11[%c0_77, %c0_78] : memref<512x128xf32, #tpu.memory_space<vmem>>, vector<512x128xf32>
    %cst_79 = arith.constant dense<0.000000e+00> : vector<8x128xf32>
    %84 = tpu.matmul %82, %83, %cst_79 {dimension_numbers = #tpu.dot_dimension_numbers<[1], [0], [0], [1], [0, 0, 1, 1], [], []>} : vector<8x512xf32>, vector<512x128xf32>, vector<8x128xf32> -> vector<8x128xf32>
    %cst_80 = arith.constant 1.000000e+00 : f32
    %85 = vector.broadcast %cst_80 : f32 to vector<1x8xf32>
    %cst_81 = arith.constant dense<0.000000e+00> : vector<1x128xf32>
    %86 = tpu.matmul %85, %84, %cst_81 {dimension_numbers = #tpu.dot_dimension_numbers<[1], [0], [0], [1], [0, 0, 1, 1], [], []>} : vector<1x8xf32>, vector<8x128xf32>, vector<1x128xf32> -> vector<1x128xf32>
    %87 = arith.mulf %84, %84 : vector<8x128xf32>
    %cst_82 = arith.constant dense<0.000000e+00> : vector<1x128xf32>
    %88 = tpu.matmul %85, %87, %cst_82 {dimension_numbers = #tpu.dot_dimension_numbers<[1], [0], [0], [1], [0, 0, 1, 1], [], []>} : vector<1x8xf32>, vector<8x128xf32>, vector<1x128xf32> -> vector<1x128xf32>
    %c0_83 = arith.constant 0 : index
    %c0_84 = arith.constant 0 : index
    %89 = vector.load %arg14[%c0_83, %c0_84] : memref<128x32xf32, #tpu.memory_space<vmem>>, vector<128x32xf32>
    %cst_85 = arith.constant dense<0.000000e+00> : vector<1x32xf32>
    %90 = tpu.matmul %86, %89, %cst_85 {dimension_numbers = #tpu.dot_dimension_numbers<[1], [0], [0], [1], [0, 0, 1, 1], [], []>} : vector<1x128xf32>, vector<128x32xf32>, vector<1x32xf32> -> vector<1x32xf32>
    %c0_86 = arith.constant 0 : index
    %c0_87 = arith.constant 0 : index
    %91 = vector.load %arg14[%c0_86, %c0_87] : memref<128x32xf32, #tpu.memory_space<vmem>>, vector<128x32xf32>
    %cst_88 = arith.constant dense<0.000000e+00> : vector<1x32xf32>
    %92 = tpu.matmul %88, %91, %cst_88 {dimension_numbers = #tpu.dot_dimension_numbers<[1], [0], [0], [1], [0, 0, 1, 1], [], []>} : vector<1x128xf32>, vector<128x32xf32>, vector<1x32xf32> -> vector<1x32xf32>
    %cst_89 = arith.constant 3.200000e+01 : f32
    %93 = vector.broadcast %cst_89 : f32 to vector<1x32xf32>
    %94 = arith.divf %90, %93 : vector<1x32xf32>
    %cst_90 = arith.constant 3.200000e+01 : f32
    %95 = vector.broadcast %cst_90 : f32 to vector<1x32xf32>
    %96 = arith.divf %92, %95 : vector<1x32xf32>
    %97 = arith.mulf %94, %94 : vector<1x32xf32>
    %98 = arith.subf %96, %97 : vector<1x32xf32>
    %c0_91 = arith.constant 0 : index
    %c0_92 = arith.constant 0 : index
    %99 = vector.load %arg12[%c0_91, %c0_92] : memref<1x32xf32, #tpu.memory_space<vmem>>, vector<1x32xf32>
    %cst_93 = arith.constant 9.99999974E-6 : f32
    %100 = vector.broadcast %cst_93 : f32 to vector<1x32xf32>
    %101 = arith.addf %98, %100 : vector<1x32xf32>
    %102 = math.rsqrt %101 : vector<1x32xf32>
    %103 = arith.mulf %99, %102 : vector<1x32xf32>
    %c0_94 = arith.constant 0 : index
    %c0_95 = arith.constant 0 : index
    %104 = vector.load %arg13[%c0_94, %c0_95] : memref<1x32xf32, #tpu.memory_space<vmem>>, vector<1x32xf32>
    %105 = arith.mulf %94, %103 : vector<1x32xf32>
    %106 = arith.subf %104, %105 : vector<1x32xf32>
    %c0_96 = arith.constant 0 : index
    %c0_97 = arith.constant 0 : index
    %107 = vector.load %arg15[%c0_96, %c0_97] : memref<32x128xf32, #tpu.memory_space<vmem>>, vector<32x128xf32>
    %cst_98 = arith.constant dense<0.000000e+00> : vector<1x128xf32>
    %108 = tpu.matmul %103, %107, %cst_98 {dimension_numbers = #tpu.dot_dimension_numbers<[1], [0], [0], [1], [0, 0, 1, 1], [], []>} : vector<1x32xf32>, vector<32x128xf32>, vector<1x128xf32> -> vector<1x128xf32>
    %c0_99 = arith.constant 0 : index
    %c0_100 = arith.constant 0 : index
    %109 = vector.load %arg15[%c0_99, %c0_100] : memref<32x128xf32, #tpu.memory_space<vmem>>, vector<32x128xf32>
    %cst_101 = arith.constant dense<0.000000e+00> : vector<1x128xf32>
    %110 = tpu.matmul %106, %109, %cst_101 {dimension_numbers = #tpu.dot_dimension_numbers<[1], [0], [0], [1], [0, 0, 1, 1], [], []>} : vector<1x32xf32>, vector<32x128xf32>, vector<1x128xf32> -> vector<1x128xf32>
    %111 = vector.broadcast %108 : vector<1x128xf32> to vector<8x128xf32>
    %112 = arith.mulf %84, %111 : vector<8x128xf32>
    %113 = vector.broadcast %110 : vector<1x128xf32> to vector<8x128xf32>
    %114 = arith.addf %112, %113 : vector<8x128xf32>
    %cst_102 = arith.constant 2.000000e-01 : f32
    %115 = vector.broadcast %cst_102 : f32 to vector<8x128xf32>
    %116 = arith.mulf %115, %114 : vector<8x128xf32>
    %117 = arith.maximumf %114, %116 : vector<8x128xf32>
    %c0_103 = arith.constant 0 : index
    %c0_104 = arith.constant 0 : index
    %c0_105 = arith.constant 0 : index
    %118 = vector.load %arg16[%c0_103, %c0_104, %c0_105] : memref<4x6x8xf32, #tpu.memory_space<vmem>>, vector<1x6x8xf32>
    %119 = vector.shape_cast %118 : vector<1x6x8xf32> to vector<6x8xf32>
    %cst_106 = arith.constant dense<0.000000e+00> : vector<6x128xf32>
    %120 = tpu.matmul %119, %117, %cst_106 {dimension_numbers = #tpu.dot_dimension_numbers<[1], [0], [0], [1], [0, 0, 1, 1], [], []>} : vector<6x8xf32>, vector<8x128xf32>, vector<6x128xf32> -> vector<6x128xf32>
    %c1_107 = arith.constant 1 : index
    %c0_108 = arith.constant 0 : index
    %c0_109 = arith.constant 0 : index
    %121 = vector.load %arg16[%c1_107, %c0_108, %c0_109] : memref<4x6x8xf32, #tpu.memory_space<vmem>>, vector<1x6x8xf32>
    %122 = vector.shape_cast %121 : vector<1x6x8xf32> to vector<6x8xf32>
    %cst_110 = arith.constant dense<0.000000e+00> : vector<6x128xf32>
    %123 = tpu.matmul %122, %117, %cst_110 {dimension_numbers = #tpu.dot_dimension_numbers<[1], [0], [0], [1], [0, 0, 1, 1], [], []>} : vector<6x8xf32>, vector<8x128xf32>, vector<6x128xf32> -> vector<6x128xf32>
    %c2_111 = arith.constant 2 : index
    %c0_112 = arith.constant 0 : index
    %c0_113 = arith.constant 0 : index
    %124 = vector.load %arg16[%c2_111, %c0_112, %c0_113] : memref<4x6x8xf32, #tpu.memory_space<vmem>>, vector<1x6x8xf32>
    %125 = vector.shape_cast %124 : vector<1x6x8xf32> to vector<6x8xf32>
    %cst_114 = arith.constant dense<0.000000e+00> : vector<6x128xf32>
    %126 = tpu.matmul %125, %117, %cst_114 {dimension_numbers = #tpu.dot_dimension_numbers<[1], [0], [0], [1], [0, 0, 1, 1], [], []>} : vector<6x8xf32>, vector<8x128xf32>, vector<6x128xf32> -> vector<6x128xf32>
    %c3_115 = arith.constant 3 : index
    %c0_116 = arith.constant 0 : index
    %c0_117 = arith.constant 0 : index
    %127 = vector.load %arg16[%c3_115, %c0_116, %c0_117] : memref<4x6x8xf32, #tpu.memory_space<vmem>>, vector<1x6x8xf32>
    %128 = vector.shape_cast %127 : vector<1x6x8xf32> to vector<6x8xf32>
    %cst_118 = arith.constant dense<0.000000e+00> : vector<6x128xf32>
    %129 = tpu.matmul %128, %117, %cst_118 {dimension_numbers = #tpu.dot_dimension_numbers<[1], [0], [0], [1], [0, 0, 1, 1], [], []>} : vector<6x8xf32>, vector<8x128xf32>, vector<6x128xf32> -> vector<6x128xf32>
    %130 = tpu.concatenate %120, %123, %126, %129 in 1 : vector<6x128xf32>, vector<6x128xf32>, vector<6x128xf32>, vector<6x128xf32> -> vector<6x512xf32>
    %c0_119 = arith.constant 0 : index
    %c0_120 = arith.constant 0 : index
    %131 = vector.load %arg17[%c0_119, %c0_120] : memref<512x256xf32, #tpu.memory_space<vmem>>, vector<512x256xf32>
    %cst_121 = arith.constant dense<0.000000e+00> : vector<6x256xf32>
    %132 = tpu.matmul %130, %131, %cst_121 {dimension_numbers = #tpu.dot_dimension_numbers<[1], [0], [0], [1], [0, 0, 1, 1], [], []>} : vector<6x512xf32>, vector<512x256xf32>, vector<6x256xf32> -> vector<6x256xf32>
    %cst_122 = arith.constant 1.000000e+00 : f32
    %133 = vector.broadcast %cst_122 : f32 to vector<1x6xf32>
    %cst_123 = arith.constant dense<0.000000e+00> : vector<1x256xf32>
    %134 = tpu.matmul %133, %132, %cst_123 {dimension_numbers = #tpu.dot_dimension_numbers<[1], [0], [0], [1], [0, 0, 1, 1], [], []>} : vector<1x6xf32>, vector<6x256xf32>, vector<1x256xf32> -> vector<1x256xf32>
    %135 = arith.mulf %132, %132 : vector<6x256xf32>
    %cst_124 = arith.constant dense<0.000000e+00> : vector<1x256xf32>
    %136 = tpu.matmul %133, %135, %cst_124 {dimension_numbers = #tpu.dot_dimension_numbers<[1], [0], [0], [1], [0, 0, 1, 1], [], []>} : vector<1x6xf32>, vector<6x256xf32>, vector<1x256xf32> -> vector<1x256xf32>
    %c0_125 = arith.constant 0 : index
    %c0_126 = arith.constant 0 : index
    %137 = vector.load %arg20[%c0_125, %c0_126] : memref<256x64xf32, #tpu.memory_space<vmem>>, vector<256x64xf32>
    %cst_127 = arith.constant dense<0.000000e+00> : vector<1x64xf32>
    %138 = tpu.matmul %134, %137, %cst_127 {dimension_numbers = #tpu.dot_dimension_numbers<[1], [0], [0], [1], [0, 0, 1, 1], [], []>} : vector<1x256xf32>, vector<256x64xf32>, vector<1x64xf32> -> vector<1x64xf32>
    %c0_128 = arith.constant 0 : index
    %c0_129 = arith.constant 0 : index
    %139 = vector.load %arg20[%c0_128, %c0_129] : memref<256x64xf32, #tpu.memory_space<vmem>>, vector<256x64xf32>
    %cst_130 = arith.constant dense<0.000000e+00> : vector<1x64xf32>
    %140 = tpu.matmul %136, %139, %cst_130 {dimension_numbers = #tpu.dot_dimension_numbers<[1], [0], [0], [1], [0, 0, 1, 1], [], []>} : vector<1x256xf32>, vector<256x64xf32>, vector<1x64xf32> -> vector<1x64xf32>
    %cst_131 = arith.constant 1.800000e+01 : f32
    %141 = vector.broadcast %cst_131 : f32 to vector<1x64xf32>
    %142 = arith.divf %138, %141 : vector<1x64xf32>
    %cst_132 = arith.constant 1.800000e+01 : f32
    %143 = vector.broadcast %cst_132 : f32 to vector<1x64xf32>
    %144 = arith.divf %140, %143 : vector<1x64xf32>
    %145 = arith.mulf %142, %142 : vector<1x64xf32>
    %146 = arith.subf %144, %145 : vector<1x64xf32>
    %c0_133 = arith.constant 0 : index
    %c0_134 = arith.constant 0 : index
    %147 = vector.load %arg18[%c0_133, %c0_134] : memref<1x64xf32, #tpu.memory_space<vmem>>, vector<1x64xf32>
    %cst_135 = arith.constant 9.99999974E-6 : f32
    %148 = vector.broadcast %cst_135 : f32 to vector<1x64xf32>
    %149 = arith.addf %146, %148 : vector<1x64xf32>
    %150 = math.rsqrt %149 : vector<1x64xf32>
    %151 = arith.mulf %147, %150 : vector<1x64xf32>
    %c0_136 = arith.constant 0 : index
    %c0_137 = arith.constant 0 : index
    %152 = vector.load %arg19[%c0_136, %c0_137] : memref<1x64xf32, #tpu.memory_space<vmem>>, vector<1x64xf32>
    %153 = arith.mulf %142, %151 : vector<1x64xf32>
    %154 = arith.subf %152, %153 : vector<1x64xf32>
    %c0_138 = arith.constant 0 : index
    %c0_139 = arith.constant 0 : index
    %155 = vector.load %arg21[%c0_138, %c0_139] : memref<64x256xf32, #tpu.memory_space<vmem>>, vector<64x256xf32>
    %cst_140 = arith.constant dense<0.000000e+00> : vector<1x256xf32>
    %156 = tpu.matmul %151, %155, %cst_140 {dimension_numbers = #tpu.dot_dimension_numbers<[1], [0], [0], [1], [0, 0, 1, 1], [], []>} : vector<1x64xf32>, vector<64x256xf32>, vector<1x256xf32> -> vector<1x256xf32>
    %c0_141 = arith.constant 0 : index
    %c0_142 = arith.constant 0 : index
    %157 = vector.load %arg21[%c0_141, %c0_142] : memref<64x256xf32, #tpu.memory_space<vmem>>, vector<64x256xf32>
    %cst_143 = arith.constant dense<0.000000e+00> : vector<1x256xf32>
    %158 = tpu.matmul %154, %157, %cst_143 {dimension_numbers = #tpu.dot_dimension_numbers<[1], [0], [0], [1], [0, 0, 1, 1], [], []>} : vector<1x64xf32>, vector<64x256xf32>, vector<1x256xf32> -> vector<1x256xf32>
    %159 = vector.broadcast %156 : vector<1x256xf32> to vector<6x256xf32>
    %160 = arith.mulf %132, %159 : vector<6x256xf32>
    %161 = vector.broadcast %158 : vector<1x256xf32> to vector<6x256xf32>
    %162 = arith.addf %160, %161 : vector<6x256xf32>
    %cst_144 = arith.constant 2.000000e-01 : f32
    %163 = vector.broadcast %cst_144 : f32 to vector<6x256xf32>
    %164 = arith.mulf %163, %162 : vector<6x256xf32>
    %165 = arith.maximumf %162, %164 : vector<6x256xf32>
    %c0_145 = arith.constant 0 : index
    %c0_146 = arith.constant 0 : index
    %c0_147 = arith.constant 0 : index
    %166 = vector.load %arg22[%c0_145, %c0_146, %c0_147] : memref<4x4x6xf32, #tpu.memory_space<vmem>>, vector<1x4x6xf32>
    %167 = vector.shape_cast %166 : vector<1x4x6xf32> to vector<4x6xf32>
    %cst_148 = arith.constant dense<0.000000e+00> : vector<4x256xf32>
    %168 = tpu.matmul %167, %165, %cst_148 {dimension_numbers = #tpu.dot_dimension_numbers<[1], [0], [0], [1], [0, 0, 1, 1], [], []>} : vector<4x6xf32>, vector<6x256xf32>, vector<4x256xf32> -> vector<4x256xf32>
    %c1_149 = arith.constant 1 : index
    %c0_150 = arith.constant 0 : index
    %c0_151 = arith.constant 0 : index
    %169 = vector.load %arg22[%c1_149, %c0_150, %c0_151] : memref<4x4x6xf32, #tpu.memory_space<vmem>>, vector<1x4x6xf32>
    %170 = vector.shape_cast %169 : vector<1x4x6xf32> to vector<4x6xf32>
    %cst_152 = arith.constant dense<0.000000e+00> : vector<4x256xf32>
    %171 = tpu.matmul %170, %165, %cst_152 {dimension_numbers = #tpu.dot_dimension_numbers<[1], [0], [0], [1], [0, 0, 1, 1], [], []>} : vector<4x6xf32>, vector<6x256xf32>, vector<4x256xf32> -> vector<4x256xf32>
    %c2_153 = arith.constant 2 : index
    %c0_154 = arith.constant 0 : index
    %c0_155 = arith.constant 0 : index
    %172 = vector.load %arg22[%c2_153, %c0_154, %c0_155] : memref<4x4x6xf32, #tpu.memory_space<vmem>>, vector<1x4x6xf32>
    %173 = vector.shape_cast %172 : vector<1x4x6xf32> to vector<4x6xf32>
    %cst_156 = arith.constant dense<0.000000e+00> : vector<4x256xf32>
    %174 = tpu.matmul %173, %165, %cst_156 {dimension_numbers = #tpu.dot_dimension_numbers<[1], [0], [0], [1], [0, 0, 1, 1], [], []>} : vector<4x6xf32>, vector<6x256xf32>, vector<4x256xf32> -> vector<4x256xf32>
    %c3_157 = arith.constant 3 : index
    %c0_158 = arith.constant 0 : index
    %c0_159 = arith.constant 0 : index
    %175 = vector.load %arg22[%c3_157, %c0_158, %c0_159] : memref<4x4x6xf32, #tpu.memory_space<vmem>>, vector<1x4x6xf32>
    %176 = vector.shape_cast %175 : vector<1x4x6xf32> to vector<4x6xf32>
    %cst_160 = arith.constant dense<0.000000e+00> : vector<4x256xf32>
    %177 = tpu.matmul %176, %165, %cst_160 {dimension_numbers = #tpu.dot_dimension_numbers<[1], [0], [0], [1], [0, 0, 1, 1], [], []>} : vector<4x6xf32>, vector<6x256xf32>, vector<4x256xf32> -> vector<4x256xf32>
    %178 = tpu.concatenate %168, %171, %174, %177 in 1 : vector<4x256xf32>, vector<4x256xf32>, vector<4x256xf32>, vector<4x256xf32> -> vector<4x1024xf32>
    %c0_161 = arith.constant 0 : index
    %c0_162 = arith.constant 0 : index
    %179 = vector.load %arg23[%c0_161, %c0_162] : memref<1024x128xf32, #tpu.memory_space<vmem>>, vector<1024x128xf32>
    %cst_163 = arith.constant dense<0.000000e+00> : vector<4x128xf32>
    %180 = tpu.matmul %178, %179, %cst_163 {dimension_numbers = #tpu.dot_dimension_numbers<[1], [0], [0], [1], [0, 0, 1, 1], [], []>} : vector<4x1024xf32>, vector<1024x128xf32>, vector<4x128xf32> -> vector<4x128xf32>
    %c0_164 = arith.constant 0 : index
    %c0_165 = arith.constant 0 : index
    %181 = vector.load %arg24[%c0_164, %c0_165] : memref<1x128xf32, #tpu.memory_space<vmem>>, vector<1x128xf32>
    %182 = vector.broadcast %181 : vector<1x128xf32> to vector<4x128xf32>
    %183 = arith.addf %180, %182 : vector<4x128xf32>
    %c0_166 = arith.constant 0 : index
    %c0_167 = arith.constant 0 : index
    %184 = vector.load %arg25[%c0_166, %c0_167] : memref<4x128xf32, #tpu.memory_space<vmem>>, vector<4x128xf32>
    tpu.vector_store %arg25[%c0_166, %c0_167], %183 {strides = array<i32>} : memref<4x128xf32, #tpu.memory_space<vmem>>, vector<4x128xf32>,
    return
  }
}

</mosaic_0001>

<bundles_post_ra>
// kernel: forward.1
= control target key start
LH: loop header
LB: loop body
LE: loop exit
PB: predicated region body
PF: predicated region fallthrough
CT: control target
= control target key end

     0   :  { %s8097_s0 = inlined_call_operand.vmem [shape: f32[64,128], index: 0, kind: input, shape index: {}]   ;;  %s8098_s1 = inlined_call_operand.hbm [shape: f32[4,32,64], index: 1, kind: input, shape index: {}]   ;;  %s8099_s2 = inlined_call_operand.vmem [shape: f32[512,128], index: 2, kind: input, shape index: {}]   ;;  %s8100_s3 = inlined_call_operand.vmem [shape: f32[1,128], index: 3, kind: input, shape index: {}]   ;;  %s8101_s4 = inlined_call_operand.hbm [shape: f32[4,16,32], index: 4, kind: input, shape index: {}]   ;;  %s8102_s5 = inlined_call_operand.vmem [shape: f32[512,128], index: 5, kind: input, shape index: {}]   ;;  %s8103_s6 = inlined_call_operand.vmem [shape: f32[1,16], index: 6, kind: input, shape index: {}]   ;;  %s8104_s7 = inlined_call_operand.vmem [shape: f32[1,16], index: 7, kind: input, shape index: {}]   ;;  %s8105_s8 = inlined_call_operand.hbm [shape: f32[128,16], index: 8, kind: input, shape index: {}]   ;;  %s8106_s9 = inlined_call_operand.hbm [shape: f32[16,128], index: 9, kind: input, shape index: {}]   ;;  %s8107_s10 = inlined_call_operand.hbm [shape: f32[4,8,16], index: 10, kind: input, shape index: {}]   ;;  %s8108_s11 = inlined_call_operand.hbm [shape: f32[512,128], index: 11, kind: input, shape index: {}]   ;;  %s8109_s12 = inlined_call_operand.vmem [shape: f32[1,32], index: 12, kind: input, shape index: {}]   ;;  %s8110_s13 = inlined_call_operand.vmem [shape: f32[1,32], index: 13, kind: input, shape index: {}]   ;;  %s8111_s14 = inlined_call_operand.hbm [shape: f32[128,32], index: 14, kind: input, shape index: {}]   ;;  %s8112_s15 = inlined_call_operand.hbm [shape: f32[32,128], index: 15, kind: input, shape index: {}]   ;;  %s8113_s16 = inlined_call_operand.hbm [shape: f32[4,6,8], index: 16, kind: input, shape index: {}]   ;;  %s8114_s17 = inlined_call_operand.hbm [shape: f32[512,256], index: 17, kind: input, shape index: {}]   ;;  %s8115_s18 = inlined_call_operand.vmem [shape: f32[1,64], index: 18, kind: input, shape index: {}]   ;;  %s8116_s19 = inlined_call_operand.vmem [shape: f32[1,64], index: 19, kind: input, shape index: {}]   ;;  %s8117_s20 = inlined_call_operand.hbm [shape: f32[256,64], index: 20, kind: input, shape index: {}]   ;;  %s8118_s21 = inlined_call_operand.hbm [shape: f32[64,256], index: 21, kind: input, shape index: {}]   ;;  %s8119_s22 = inlined_call_operand.hbm [shape: f32[4,4,6], index: 22, kind: input, shape index: {}]   ;;  %s8120_s23 = inlined_call_operand.hbm [shape: f32[1024,128], index: 23, kind: input, shape index: {}]   ;;  %s8121_s24 = inlined_call_operand.hbm [shape: f32[1,128], index: 24, kind: input, shape index: {}]   ;;  %s8122_s25 = inlined_call_operand.hbm [shape: f32[4,128], index: 25, kind: output, shape index: {}]  }
   0x1   :  { %8131 = sst [smem:[#allocation36_spill]] %s8097_s0 }
   0x2   :  { %8132 = sst [smem:[#allocation37_spill]] %s8098_s1 }
   0x3   :  { %8133 = sst [smem:[#allocation38_spill]] %s8099_s2 }
   0x4   :  { %8134 = sst [smem:[#allocation39_spill]] %s8100_s3 }
   0x5   :  { %8135 = sst [smem:[#allocation40_spill]] %s8101_s4 }
   0x6   :  { %8136 = sst [smem:[#allocation41_spill]] %s8102_s5 }
   0x7   :  { %8137 = sst [smem:[#allocation42_spill]] %s8103_s6 }
   0x8   :  { %8138 = sst [smem:[#allocation43_spill]] %s8104_s7 }
   0x9   :  { %8139 = sst [smem:[#allocation44_spill]] %s8105_s8 }
   0xa   :  { %8140 = sst [smem:[#allocation45_spill]] %s8106_s9 }
   0xb   :  { %8141 = sst [smem:[#allocation46_spill]] %s8116_s19 }
   0xc   :  { %8142 = sst [smem:[#allocation47_spill]] %s8122_s25 }
   0xd   :  { %30 = vsyncpa [#allocation3], 0 }
   0xe   :  { %31 = vsyncpa [#allocation6], 0 }
   0xf   :  { %32 = vsyncpa [#allocation9], 0 }
  0x10   :  { %33 = vsyncpa [#allocation12], 0 }
  0x11   :  { %34 = vsyncpa [#allocation15], 0 }
  0x12   :  { %35 = vsyncpa [#allocation18], 0 }
  0x13   :  { %36 = vsyncpa [#allocation21], 0 }
  0x14   :  { %37 = vsyncpa [#allocation24], 0 }
  0x15   :  { %38 = vsyncpa [#allocation4], 0  ;;  %s7048_s29 = smov [#allocation5]   ;;  %s7049_s6 = smov [#allocation8]  }
  0x16   :  { %s62_s2 = sshll.u32 %s7048_s29, 4  ;;  %s92_s30 = sshll.u32 %s7049_s6, 4  ;;  %s63_s2 = int_to_ptr.vmem [resolvable:$true] %s62_s2  ;;  %s7204_s30 = int_to_ptr.vmem [resolvable:$true] %s92_s30 }
  0x17   :  { %s8143_s26 = sld [smem:[#allocation40_spill]] }
  0x1d   :  { %s6678_s1 = scalar_lea.hbm %s8143_s26, 1024 }
  0x1e   :  { %p6679_p0 = scmp.ne.s32.totalorder %s8143_s26, %s6678_s1  ;;  %p6682_p1 = scmp.lt.u32.totalorder %s6678_s1, %s8143_s26 }
  0x20   :  { %p6684_p2 = pnand %p6682_p1, %p6679_p0 }
  0x22   :  { %6687 = shalt.err (!%p6684_p2)
}
  0x23   :  { %s6688_s9 = scalar_lea.vmem %s63_s2, 1024  ;;  %p6693_p4 = scmp.lt.s32.totalorder %s63_s2, %s63_s2 }
  0x24   :  { %p6689_p3 = scmp.ne.s32.totalorder %s63_s2, %s6688_s9  ;;  %p6694_p5 = scmp.lt.s32.totalorder %s6688_s9, %s6688_s9 }
  0x26   :  { %p6695_p6 = por %p6694_p5, %p6693_p4 }
  0x28   :  { %p6696_p7 = pnand %p6695_p6, %p6689_p3 }
  0x2a   :  { %6699 = shalt.err (!%p6696_p7)
}
  0x2b   :  { %s7050_s5 = smov 128   ;;  %s7051_s0 = smov 8  }
  0x2c   :  { %68 = dma.hbm_to_vmem [thread:$0]  %s8143_s26, 1024, %s63_s2, [#allocation6], %s7050_s5, %s7050_s5, %s7051_s0  }
  0x2d   :  { %s8144_s1 = sld [smem:[#allocation45_spill]] }
  0x33   :  { %s6700_s8 = scalar_lea.hbm %s8144_s1, 256 }
  0x34   :  { %p6701_p8 = scmp.ne.s32.totalorder %s8144_s1, %s6700_s8  ;;  %p6704_p9 = scmp.lt.u32.totalorder %s6700_s8, %s8144_s1 }
  0x36   :  { %p6706_p10 = pnand %p6704_p9, %p6701_p8 }
  0x38   :  { %6709 = shalt.err (!%p6706_p10)
}
  0x39   :  { %s6710_s25 = scalar_lea.vmem %s7204_s30, 256  ;;  %p6715_p12 = scmp.lt.s32.totalorder %s7204_s30, %s7204_s30 }
  0x3a   :  { %p6711_p11 = scmp.ne.s32.totalorder %s7204_s30, %s6710_s25  ;;  %p6716_p13 = scmp.lt.s32.totalorder %s6710_s25, %s6710_s25 }
  0x3c   :  { %p6717_p0 = por %p6716_p13, %p6715_p12 }
  0x3e   :  { %p6718_p1 = pnand %p6717_p0, %p6711_p11 }
  0x40   :  { %6721 = shalt.err (!%p6718_p1)
}
  0x41   :  { %98 = dma.hbm_to_vmem [thread:$0]  %s8144_s1, 256, %s7204_s30, [#allocation9], %s7050_s5, %s7050_s5, %s7051_s0  }
  0x42   :  { %s7052_s29 = smov [#allocation11]   ;;  %s7053_s7 = smov [#allocation14]  }
  0x43   :  { %s116_s6 = sshll.u32 %s7052_s29, 4  ;;  %s144_s3 = sshll.u32 %s7053_s7, 4  ;;  %s117_s6 = int_to_ptr.vmem [resolvable:$true] %s116_s6  ;;  %s7241_s3 = int_to_ptr.vmem [resolvable:$true] %s144_s3 }
  0x44   :  { %s6722_s27 = scalar_lea.hbm %s8108_s11, 8192 }
  0x45   :  { %p6723_p2 = scmp.ne.s32.totalorder %s8108_s11, %s6722_s27  ;;  %p6726_p3 = scmp.lt.u32.totalorder %s6722_s27, %s8108_s11 }
  0x47   :  { %p6728_p4 = pnand %p6726_p3, %p6723_p2 }
  0x49   :  { %6731 = shalt.err (!%p6728_p4)
}
  0x4a   :  { %s6732_s30 = scalar_lea.vmem %s117_s6, 8192  ;;  %p6737_p6 = scmp.lt.s32.totalorder %s117_s6, %s117_s6 }
  0x4b   :  { %p6733_p5 = scmp.ne.s32.totalorder %s117_s6, %s6732_s30  ;;  %p6738_p7 = scmp.lt.s32.totalorder %s6732_s30, %s6732_s30 }
  0x4d   :  { %p6739_p8 = por %p6738_p7, %p6737_p6 }
  0x4f   :  { %p6740_p9 = pnand %p6739_p8, %p6733_p5 }
  0x51   :  { %6743 = shalt.err (!%p6740_p9)
}
  0x52   :  { %122 = dma.hbm_to_vmem [thread:$0]  %s8108_s11, 8192, %s117_s6, [#allocation12], %s7050_s5, %s7050_s5, %s7051_s0  }
  0x53   :  { %s6744_s19 = scalar_lea.hbm %s8112_s15, 512 }
  0x54   :  { %p6745_p10 = scmp.ne.s32.totalorder %s8112_s15, %s6744_s19  ;;  %p6748_p11 = scmp.lt.u32.totalorder %s6744_s19, %s8112_s15 }
  0x56   :  { %p6750_p12 = pnand %p6748_p11, %p6745_p10 }
  0x58   :  { %6753 = shalt.err (!%p6750_p12)
}
  0x59   :  { %s6754_s4 = scalar_lea.vmem %s7241_s3, 512  ;;  %p6759_p0 = scmp.lt.s32.totalorder %s7241_s3, %s7241_s3 }
  0x5a   :  { %p6755_p13 = scmp.ne.s32.totalorder %s7241_s3, %s6754_s4  ;;  %p6760_p1 = scmp.lt.s32.totalorder %s6754_s4, %s6754_s4 }
  0x5c   :  { %p6761_p2 = por %p6760_p1, %p6759_p0 }
  0x5e   :  { %p6762_p3 = pnand %p6761_p2, %p6755_p13 }
  0x60   :  { %6765 = shalt.err (!%p6762_p3)
}
  0x61   :  { %150 = dma.hbm_to_vmem [thread:$0]  %s8112_s15, 512, %s7241_s3, [#allocation15], %s7050_s5, %s7050_s5, %s7051_s0  }
  0x62   :  { %s7054_s28 = smov [#allocation17]   ;;  %s6766_s2 = scalar_lea.hbm %s8114_s17, 16384 }
  0x63   :  { %s168_s9 = sshll.u32 %s7054_s28, 4  ;;  %p6767_p4 = scmp.ne.s32.totalorder %s8114_s17, %s6766_s2  ;;  %s169_s9 = int_to_ptr.vmem [resolvable:$true] %s168_s9 }
  0x64   :  { %p6770_p5 = scmp.lt.u32.totalorder %s6766_s2, %s8114_s17 }
  0x66   :  { %p6772_p6 = pnand %p6770_p5, %p6767_p4 }
  0x68   :  { %6775 = shalt.err (!%p6772_p6)
}
  0x69   :  { %s6776_s8 = scalar_lea.vmem %s169_s9, 16384  ;;  %p6781_p8 = scmp.lt.s32.totalorder %s169_s9, %s169_s9 }
  0x6a   :  { %p6777_p7 = scmp.ne.s32.totalorder %s169_s9, %s6776_s8  ;;  %p6782_p9 = scmp.lt.s32.totalorder %s6776_s8, %s6776_s8 }
  0x6c   :  { %p6783_p10 = por %p6782_p9, %p6781_p8 }
  0x6e   :  { %p6784_p11 = pnand %p6783_p10, %p6777_p7 }
  0x70   :  { %6787 = shalt.err (!%p6784_p11)
}
  0x71   :  { %s7055_s15 = smov 256   ;;  %s7056_s3 = smov 16  }
  0x72   :  { %174 = dma.hbm_to_vmem [thread:$0]  %s8114_s17, 16384, %s169_s9, [#allocation18], %s7055_s15, %s7055_s15, %s7056_s3  }
  0x73   :  { %s7057_s4 = smov [#allocation20]   ;;  %s7058_s6 = smov [#allocation23]  }
  0x74   :  { %s196_s11 = sshll.u32 %s7057_s4, 4  ;;  %s220_s28 = sshll.u32 %s7058_s6, 4  ;;  %s197_s11 = int_to_ptr.vmem [resolvable:$true] %s196_s11  ;;  %s221_s28 = int_to_ptr.vmem [resolvable:$true] %s220_s28 }
  0x75   :  { %s6788_s2 = scalar_lea.hbm %s8118_s21, 2048 }
  0x76   :  { %p6789_p12 = scmp.ne.s32.totalorder %s8118_s21, %s6788_s2  ;;  %p6792_p13 = scmp.lt.u32.totalorder %s6788_s2, %s8118_s21 }
  0x78   :  { %p6794_p0 = pnand %p6792_p13, %p6789_p12 }
  0x7a   :  { %6797 = shalt.err (!%p6794_p0)
}
  0x7b   :  { %s6798_s17 = scalar_lea.vmem %s197_s11, 2048  ;;  %p6803_p2 = scmp.lt.s32.totalorder %s197_s11, %s197_s11 }
  0x7c   :  { %p6799_p1 = scmp.ne.s32.totalorder %s197_s11, %s6798_s17  ;;  %p6804_p3 = scmp.lt.s32.totalorder %s6798_s17, %s6798_s17 }
  0x7e   :  { %p6805_p4 = por %p6804_p3, %p6803_p2 }
  0x80   :  { %p6806_p5 = pnand %p6805_p4, %p6799_p1 }
  0x82   :  { %6809 = shalt.err (!%p6806_p5)
}
  0x83   :  { %202 = dma.hbm_to_vmem [thread:$0]  %s8118_s21, 2048, %s197_s11, [#allocation21], %s7055_s15, %s7055_s15, %s7056_s3  }
  0x84   :  { %s6810_s4 = scalar_lea.hbm %s8120_s23, 16384 }
  0x85   :  { %p6811_p6 = scmp.ne.s32.totalorder %s8120_s23, %s6810_s4  ;;  %p6814_p7 = scmp.lt.u32.totalorder %s6810_s4, %s8120_s23 }
  0x87   :  { %p6816_p8 = pnand %p6814_p7, %p6811_p6 }
  0x89   :  { %6819 = shalt.err (!%p6816_p8)
}
  0x8a   :  { %s6820_s26 = scalar_lea.vmem %s221_s28, 16384  ;;  %p6825_p10 = scmp.lt.s32.totalorder %s221_s28, %s221_s28 }
  0x8b   :  { %p6821_p9 = scmp.ne.s32.totalorder %s221_s28, %s6820_s26  ;;  %p6826_p11 = scmp.lt.s32.totalorder %s6820_s26, %s6820_s26 }
  0x8d   :  { %p6827_p12 = por %p6826_p11, %p6825_p10 }
  0x8f   :  { %p6828_p13 = pnand %p6827_p12, %p6821_p9 }
  0x91   :  { %6831 = shalt.err (!%p6828_p13)
}
  0x92   :  { %226 = dma.hbm_to_vmem [thread:$0]  %s8120_s23, 16384, %s221_s28, [#allocation24], %s7050_s5, %s7050_s5, %s7051_s0  }
  0x93   :  { %s7059_s3 = smov [#allocation2]   ;;  %s7060_s29 = smov [#allocation7]  }
  0x94   :  { %s46_s11 = sshll.u32 %s7059_s3, 4  ;;  %s80_s19 = sshll.u32 %s7060_s29, 4  ;;  %s47_s11 = int_to_ptr.vmem [resolvable:$true] %s46_s11  ;;  %s81_s19 = int_to_ptr.vmem [resolvable:$true] %s80_s19 }
  0x95   :  { %s8145_s9 = sld [smem:[#allocation37_spill]] }
  0x9b   :  { %s6832_s8 = scalar_lea.hbm %s8145_s9, 2048 }
  0x9c   :  { %p6833_p0 = scmp.ne.s32.totalorder %s8145_s9, %s6832_s8  ;;  %p6836_p1 = scmp.lt.u32.totalorder %s6832_s8, %s8145_s9 }
  0x9e   :  { %p6838_p2 = pnand %p6836_p1, %p6833_p0 }
  0xa0   :  { %6841 = shalt.err (!%p6838_p2)
}
  0xa1   :  { %s6842_s23 = scalar_lea.vmem %s47_s11, 2048  ;;  %p6847_p4 = scmp.lt.s32.totalorder %s47_s11, %s47_s11 }
  0xa2   :  { %p6843_p3 = scmp.ne.s32.totalorder %s47_s11, %s6842_s23  ;;  %p6848_p5 = scmp.lt.s32.totalorder %s6842_s23, %s6842_s23 }
  0xa4   :  { %p6849_p6 = por %p6848_p5, %p6847_p4 }
  0xa6   :  { %p6850_p7 = pnand %p6849_p6, %p6843_p3 }
  0xa8   :  { %6853 = shalt.err (!%p6850_p7)
}
  0xa9   :  { %52 = dma.hbm_to_vmem [thread:$0]  %s8145_s9, 2048, %s47_s11, [#allocation3], %s7050_s5, %s7050_s5, %s7051_s0  }
  0xaa   :  { %s8146_s26 = sld [smem:[#allocation44_spill]] }
  0xb0   :  { %s6854_s21 = scalar_lea.hbm %s8146_s26, 2048 }
  0xb1   :  { %p6855_p8 = scmp.ne.s32.totalorder %s8146_s26, %s6854_s21  ;;  %p6858_p9 = scmp.lt.u32.totalorder %s6854_s21, %s8146_s26 }
  0xb3   :  { %p6860_p10 = pnand %p6858_p9, %p6855_p8 }
  0xb5   :  { %6863 = shalt.err (!%p6860_p10)
}
  0xb6   :  { %s6864_s17 = scalar_lea.vmem %s81_s19, 2048  ;;  %p6869_p12 = scmp.lt.s32.totalorder %s81_s19, %s81_s19 }
  0xb7   :  { %p6865_p11 = scmp.ne.s32.totalorder %s81_s19, %s6864_s17  ;;  %p6870_p13 = scmp.lt.s32.totalorder %s6864_s17, %s6864_s17 }
  0xb9   :  { %p6871_p0 = por %p6870_p13, %p6869_p12 }
  0xbb   :  { %p6872_p1 = pnand %p6871_p0, %p6865_p11 }
  0xbd   :  { %6875 = shalt.err (!%p6872_p1)
}
  0xbe   :  { %86 = dma.hbm_to_vmem [thread:$0]  %s8146_s26, 2048, %s81_s19, [#allocation6], %s7050_s5, %s7050_s5, %s7051_s0  }
  0xbf   :  { %s7061_s8 = smov [#allocation10]   ;;  %s7062_s27 = smov [#allocation13]  }
  0xc0   :  { %s104_s25 = sshll.u32 %s7061_s8, 4  ;;  %s132_s4 = sshll.u32 %s7062_s27, 4  ;;  %s105_s25 = int_to_ptr.vmem [resolvable:$true] %s104_s25  ;;  %s133_s4 = int_to_ptr.vmem [resolvable:$true] %s132_s4 }
  0xc1   :  { %s6876_s28 = scalar_lea.hbm %s8107_s10, 512 }
  0xc2   :  { %p6877_p2 = scmp.ne.s32.totalorder %s8107_s10, %s6876_s28  ;;  %p6880_p3 = scmp.lt.u32.totalorder %s6876_s28, %s8107_s10 }
  0xc4   :  { %p6882_p4 = pnand %p6880_p3, %p6877_p2 }
  0xc6   :  { %6885 = shalt.err (!%p6882_p4)
}
  0xc7   :  { %s6886_s19 = scalar_lea.vmem %s105_s25, 512  ;;  %p6891_p6 = scmp.lt.s32.totalorder %s105_s25, %s105_s25 }
  0xc8   :  { %p6887_p5 = scmp.ne.s32.totalorder %s105_s25, %s6886_s19  ;;  %p6892_p7 = scmp.lt.s32.totalorder %s6886_s19, %s6886_s19 }
  0xca   :  { %p6893_p8 = por %p6892_p7, %p6891_p6 }
  0xcc   :  { %p6894_p9 = pnand %p6893_p8, %p6887_p5 }
  0xce   :  { %6897 = shalt.err (!%p6894_p9)
}
  0xcf   :  { %110 = dma.hbm_to_vmem [thread:$0]  %s8107_s10, 512, %s105_s25, [#allocation9], %s7050_s5, %s7050_s5, %s7051_s0  }
  0xd0   :  { %s6898_s7 = scalar_lea.hbm %s8111_s14, 2048 }
  0xd1   :  { %p6899_p10 = scmp.ne.s32.totalorder %s8111_s14, %s6898_s7  ;;  %p6902_p11 = scmp.lt.u32.totalorder %s6898_s7, %s8111_s14 }
  0xd3   :  { %p6904_p12 = pnand %p6902_p11, %p6899_p10 }
  0xd5   :  { %6907 = shalt.err (!%p6904_p12)
}
  0xd6   :  { %s6908_s27 = scalar_lea.vmem %s133_s4, 2048  ;;  %p6913_p0 = scmp.lt.s32.totalorder %s133_s4, %s133_s4 }
  0xd7   :  { %p6909_p13 = scmp.ne.s32.totalorder %s133_s4, %s6908_s27  ;;  %p6914_p1 = scmp.lt.s32.totalorder %s6908_s27, %s6908_s27 }
  0xd9   :  { %p6915_p2 = por %p6914_p1, %p6913_p0 }
  0xdb   :  { %p6916_p3 = pnand %p6915_p2, %p6909_p13 }
  0xdd   :  { %6919 = shalt.err (!%p6916_p3)
}
  0xde   :  { %138 = dma.hbm_to_vmem [thread:$0]  %s8111_s14, 2048, %s133_s4, [#allocation12], %s7050_s5, %s7050_s5, %s7051_s0  }
  0xdf   :  { %s7063_s6 = smov [#allocation16]   ;;  %s7064_s28 = smov [#allocation19]  }
  0xe0   :  { %s156_s23 = sshll.u32 %s7063_s6, 4  ;;  %s184_s30 = sshll.u32 %s7064_s28, 4  ;;  %s157_s23 = int_to_ptr.vmem [resolvable:$true] %s156_s23  ;;  %s185_s30 = int_to_ptr.vmem [resolvable:$true] %s184_s30 }
  0xe1   :  { %s6920_s21 = scalar_lea.hbm %s8113_s16, 512 }
  0xe2   :  { %p6921_p4 = scmp.ne.s32.totalorder %s8113_s16, %s6920_s21  ;;  %p6924_p5 = scmp.lt.u32.totalorder %s6920_s21, %s8113_s16 }
  0xe4   :  { %p6926_p6 = pnand %p6924_p5, %p6921_p4 }
  0xe6   :  { %6929 = shalt.err (!%p6926_p6)
}
  0xe7   :  { %s6930_s14 = scalar_lea.vmem %s157_s23, 512  ;;  %p6935_p8 = scmp.lt.s32.totalorder %s157_s23, %s157_s23 }
  0xe8   :  { %p6931_p7 = scmp.ne.s32.totalorder %s157_s23, %s6930_s14  ;;  %p6936_p9 = scmp.lt.s32.totalorder %s6930_s14, %s6930_s14 }
  0xea   :  { %p6937_p10 = por %p6936_p9, %p6935_p8 }
  0xec   :  { %p6938_p11 = pnand %p6937_p10, %p6931_p7 }
  0xee   :  { %6941 = shalt.err (!%p6938_p11)
}
  0xef   :  { %162 = dma.hbm_to_vmem [thread:$0]  %s8113_s16, 512, %s157_s23, [#allocation15], %s7050_s5, %s7050_s5, %s7051_s0  }
  0xf0   :  { %s6942_s11 = scalar_lea.hbm %s8117_s20, 4096 }
  0xf1   :  { %p6943_p12 = scmp.ne.s32.totalorder %s8117_s20, %s6942_s11  ;;  %p6946_p13 = scmp.lt.u32.totalorder %s6942_s11, %s8117_s20 }
  0xf3   :  { %p6948_p0 = pnand %p6946_p13, %p6943_p12 }
  0xf5   :  { %6951 = shalt.err (!%p6948_p0)
}
  0xf6   :  { %s6952_s25 = scalar_lea.vmem %s185_s30, 4096  ;;  %p6957_p2 = scmp.lt.s32.totalorder %s185_s30, %s185_s30 }
  0xf7   :  { %p6953_p1 = scmp.ne.s32.totalorder %s185_s30, %s6952_s25  ;;  %p6958_p3 = scmp.lt.s32.totalorder %s6952_s25, %s6952_s25 }
  0xf9   :  { %p6959_p4 = por %p6958_p3, %p6957_p2 }
  0xfb   :  { %p6960_p5 = pnand %p6959_p4, %p6953_p1 }
  0xfd   :  { %6963 = shalt.err (!%p6960_p5)
}
  0xfe   :  { %190 = dma.hbm_to_vmem [thread:$0]  %s8117_s20, 4096, %s185_s30, [#allocation18], %s7050_s5, %s7050_s5, %s7051_s0  }
  0xff   :  { %s7065_s23 = smov [#allocation22]   ;;  %s6964_s21 = scalar_lea.hbm %s8119_s22, 256 }
 0x100   :  { %s208_s28 = sshll.u32 %s7065_s23, 4  ;;  %p6965_p6 = scmp.ne.s32.totalorder %s8119_s22, %s6964_s21  ;;  %s209_s28 = int_to_ptr.vmem [resolvable:$true] %s208_s28 }
 0x101   :  { %p6968_p7 = scmp.lt.u32.totalorder %s6964_s21, %s8119_s22 }
 0x103   :  { %p6970_p8 = pnand %p6968_p7, %p6965_p6 }
 0x105   :  { %6973 = shalt.err (!%p6970_p8)
}
 0x106   :  { %s6974_s14 = scalar_lea.vmem %s209_s28, 256  ;;  %p6979_p10 = scmp.lt.s32.totalorder %s209_s28, %s209_s28 }
 0x107   :  { %p6975_p9 = scmp.ne.s32.totalorder %s209_s28, %s6974_s14  ;;  %p6980_p11 = scmp.lt.s32.totalorder %s6974_s14, %s6974_s14 }
 0x109   :  { %p6981_p12 = por %p6980_p11, %p6979_p10 }
 0x10b   :  { %p6982_p13 = pnand %p6981_p12, %p6975_p9 }
 0x10d   :  { %6985 = shalt.err (!%p6982_p13)
}
 0x10e   :  { %s7066_s20 = smov 64   ;;  %s7067_s5 = smov 4  }
 0x10f   :  { %214 = dma.hbm_to_vmem [thread:$0]  %s8119_s22, 256, %s209_s28, [#allocation21], %s7066_s20, %s7066_s20, %s7067_s5  }
 0x110   :  { %s7068_s4 = smov [#allocation25]   ;;  %s6986_s11 = scalar_lea.hbm %s8121_s24, 16 }
 0x111   :  { %s233_s29 = sshll.u32 %s7068_s4, 4  ;;  %p6987_p0 = scmp.ne.s32.totalorder %s8121_s24, %s6986_s11  ;;  %s234_s29 = int_to_ptr.vmem [resolvable:$true] %s233_s29 }
 0x112   :  { %p6990_p1 = scmp.lt.u32.totalorder %s6986_s11, %s8121_s24 }
 0x114   :  { %p6992_p2 = pnand %p6990_p1, %p6987_p0 }
 0x116   :  { %6995 = shalt.err (!%p6992_p2)
}
 0x117   :  { %s6996_s25 = scalar_lea.vmem %s234_s29, 16  ;;  %s7000_s22 = scalar_lea.vmem %s234_s29, 32 }
 0x118   :  { %p6997_p3 = scmp.ne.s32.totalorder %s234_s29, %s6996_s25  ;;  %p7001_p4 = scmp.lt.s32.totalorder %s234_s29, %s234_s29 }
 0x119   :  { %p7002_p5 = scmp.lt.s32.totalorder %s7000_s22, %s6996_s25 }
 0x11b   :  { %p7003_p6 = por %p7002_p5, %p7001_p4 }
 0x11d   :  { %p7004_p7 = pnand %p7003_p6, %p6997_p3 }
 0x11f   :  { %7007 = shalt.err (!%p7004_p7)
}
 0x120   :  { %236 = dma.hbm_to_vmem [thread:$0]  %s8121_s24, 16, %s234_s29, [#allocation24]  }
 0x121   :  { %7030 = dma.done.wait [#allocation3], 2048  }
 0x122   :  { %7031 = vsyncadd [#allocation3], 4294965248 }
 0x123   :  { %7032 = dma.done.wait [#allocation6], 3072  }
 0x124   :  { %7033 = vsyncadd [#allocation6], 4294964224 }
 0x125   :  { %7034 = dma.done.wait [#allocation9], 768  }
 0x126   :  { %7035 = vsyncadd [#allocation9], 4294966528 }
 0x127   :  { %7036 = dma.done.wait [#allocation12], 10240  }
 0x128   :  { %7037 = vsyncadd [#allocation12], 4294957056 }
 0x129   :  { %7038 = dma.done.wait [#allocation15], 1024  }
 0x12a   :  { %7039 = vsyncadd [#allocation15], 4294966272 }
 0x12b   :  { %7040 = dma.done.wait [#allocation18], 20480  }
 0x12c   :  { %7041 = vsyncadd [#allocation18], 4294946816 }
 0x12d   :  { %7042 = dma.done.wait [#allocation21], 2304  }
 0x12e   :  { %7043 = vsyncadd [#allocation21], 4294964992 }
 0x12f   :  { %7044 = dma.done.wait [#allocation24], 16400  }
 0x130   :  { %7045 = vsyncadd [#allocation24], 4294950896  ;;  %s8147_s1 = sld [smem:[#allocation36_spill]]  ;;  %vm294_vm0 = vcmask 523264   ;;  %v393_v8 = vld [vmem:[#allocation2 + $0x20] sm:$0xff]  ;;  %v394_v14 = vld [vmem:[#allocation2 + $0x28] sm:$0xff] }
 0x131   :  { %v290_v9 = vld [vmem:[#allocation2] sm:$0xff]  ;;  %5530 = vmatprep.mubr.msk.f32.mxu1 %vm294_vm0, %v393_v8  ;;  %v291_v15 = vld [vmem:[#allocation2 + $0x8] sm:$0xff]  ;;  %v395_v16 = vld [vmem:[#allocation2 + $0x30] sm:$0xff]  ;;  %s8148_s11 = sld [smem:[#allocation38_spill]]  ;;  %vm949_vm1 = vcmask 261120   ;;  %s8149_s20 = sld [smem:[#allocation39_spill]] }
 0x132   :  { %5508 = vmatprep.mubr.msk.f32.mxu0 %vm294_vm0, %v290_v9  ;;  %v292_v17 = vld [vmem:[#allocation2 + $0x10] sm:$0xff]  ;;  %v396_v18 = vld [vmem:[#allocation2 + $0x38] sm:$0xff]  ;;  %v495_v20 = vld [vmem:[#allocation2 + $0x40] sm:$0xff]  ;;  %s8150_s30 = sld [smem:[#allocation41_spill]]  ;;  %vm7070_vm2 = vmmov 0   ;;  %vm1497_vm3 = vcmask 130048  }
 0x133   :  { %v293_v19 = vld [vmem:[#allocation2 + $0x18] sm:$0xff]  ;;  %v597_v21 = vld [vmem:[#allocation2 + $0x60] sm:$0xff]  ;;  %v496_v36 = vld [vmem:[#allocation2 + $0x48] sm:$0xff]  ;;  %s8151_s26 = sld [smem:[#allocation42_spill]]  ;;  %vm2478_vm4 = vcmask 64512   ;;  %vm3524_vm5 = vcmask 1045504  }
 0x134   :  { %v598_v37 = vld [vmem:[#allocation2 + $0x68] sm:$0xff]  ;;  %v599_v38 = vld [vmem:[#allocation2 + $0x70] sm:$0xff]  ;;  %v600_v52 = vld [vmem:[#allocation2 + $0x78] sm:$0xff]  ;;  %vm3521_vm6 = vcmask 48128   ;;  %s8153_s7 = sld [smem:[#allocation46_spill]] }
 0x135   :  { %v497_v39 = vld [vmem:[#allocation2 + $0x50] sm:$0xff]  ;;  %v498_v53 = vld [vmem:[#allocation2 + $0x58] sm:$0xff] }
 0x136   :  { %v282_v0 = vld [vmem:[%s8147_s1] sm:$0xff]  ;;  %v283_v1 = vld [vmem:[%s8147_s1 + $0x8] sm:$0xff]  ;;  %v284_v2 = vld [vmem:[%s8147_s1 + $0x10] sm:$0xff] }
 0x137   :  { %v5872_v3 = vpack.c.bf16 %v283_v1, %v282_v0  ;;  %v285_v4 = vld [vmem:[%s8147_s1 + $0x18] sm:$0xff]  ;;  %v286_v6 = vld [vmem:[%s8147_s1 + $0x20] sm:$0xff]  ;;  %v287_v7 = vld [vmem:[%s8147_s1 + $0x28] sm:$0xff] }
 0x138   :  { %v5876_v5 = vpack.c.bf16 %v285_v4, %v284_v2  ;;  %v5880_v10 = vpack.c.bf16 %v287_v7, %v286_v6  ;;  %v288_v11 = vld [vmem:[%s8147_s1 + $0x30] sm:$0xff]  ;;  %v289_v12 = vld [vmem:[%s8147_s1 + $0x38] sm:$0xff]  ;;  %v714_v22 = vld [vmem:[%s8148_s11 + $0x80] sm:$0xff] }
 0x139   :  { %5873 = vmatprep.subr.bf16.mxu0 %v5872_v3  ;;  %5889 = vmatprep.subr.bf16.mxu1 %v5872_v3  ;;  %v5884_v13 = vpack.c.bf16 %v289_v12, %v288_v11  ;;  %v715_v23 = vld [vmem:[%s8148_s11 + $0x88] sm:$0xff]  ;;  %v746_v24 = vld [vmem:[%s8148_s11 + $0x180] sm:$0xff]  ;;  %v716_v30 = vld [vmem:[%s8148_s11 + $0x90] sm:$0xff] }
 0x13a   :  { %5875 = vmatpush3.bf16.msra.mxu0 %v5872_v3  ;;  %5891 = vmatpush3.bf16.msra.mxu1 %v5872_v3  ;;  %v747_v25 = vld [vmem:[%s8148_s11 + $0x188] sm:$0xff]  ;;  %v5936_v26 = vpack.c.bf16 %v715_v23, %v714_v22  ;;  %v698_v27 = vld [vmem:[%s8148_s11] sm:$0xff]  ;;  %v717_v33 = vld [vmem:[%s8148_s11 + $0x98] sm:$0xff] }
 0x13b   :  { %5877 = vmatprep.subr.bf16.mxu0 %v5876_v5  ;;  %5893 = vmatprep.subr.bf16.mxu1 %v5876_v5  ;;  %v699_v28 = vld [vmem:[%s8148_s11 + $0x8] sm:$0xff]  ;;  %v5968_v29 = vpack.c.bf16 %v747_v25, %v746_v24  ;;  %v730_v31 = vld [vmem:[%s8148_s11 + $0x100] sm:$0xff]  ;;  %v748_v34 = vld [vmem:[%s8148_s11 + $0x190] sm:$0xff]  ;;  %v5940_v44 = vpack.c.bf16 %v717_v33, %v716_v30 }
 0x13c   :  { %v731_v32 = vld [vmem:[%s8148_s11 + $0x108] sm:$0xff]  ;;  %v749_v35 = vld [vmem:[%s8148_s11 + $0x198] sm:$0xff]  ;;  %v5938_v40 = vpack.c.bf16 %v699_v28, %v698_v27  ;;  %v700_v41 = vld [vmem:[%s8148_s11 + $0x10] sm:$0xff] }
 0x13d   :  { %v701_v42 = vld [vmem:[%s8148_s11 + $0x18] sm:$0xff]  ;;  %v5970_v43 = vpack.c.bf16 %v731_v32, %v730_v31  ;;  %v718_v45 = vld [vmem:[%s8148_s11 + $0xa0] sm:$0xff]  ;;  %v5972_v46 = vpack.c.bf16 %v749_v35, %v748_v34  ;;  %v732_v47 = vld [vmem:[%s8148_s11 + $0x110] sm:$0xff] }
 0x13e   :  { %5879 = vmatpush3.bf16.msra.mxu0 %v5876_v5  ;;  %5895 = vmatpush3.bf16.msra.mxu1 %v5876_v5  ;;  %v733_v48 = vld [vmem:[%s8148_s11 + $0x118] sm:$0xff]  ;;  %v719_v49 = vld [vmem:[%s8148_s11 + $0xa8] sm:$0xff]  ;;  %v750_v50 = vld [vmem:[%s8148_s11 + $0x1a0] sm:$0xff]  ;;  %v5942_v54 = vpack.c.bf16 %v701_v42, %v700_v41 }
 0x13f   :  { %5881 = vmatprep.subr.bf16.mxu0 %v5880_v10  ;;  %5897 = vmatprep.subr.bf16.mxu1 %v5880_v10  ;;  %v751_v51 = vld [vmem:[%s8148_s11 + $0x1a8] sm:$0xff]  ;;  %v702_v55 = vld [vmem:[%s8148_s11 + $0x20] sm:$0xff]  ;;  %v5974_v57 = vpack.c.bf16 %v733_v48, %v732_v47  ;;  %v5944_v58 = vpack.c.bf16 %v719_v49, %v718_v45  ;;  %v720_v59 = vld [vmem:[%s8148_s11 + $0xb0] sm:$0xff] }
 0x140   :  { %v703_v56 = vld [vmem:[%s8148_s11 + $0x28] sm:$0xff]  ;;  %v5976_v60 = vpack.c.bf16 %v751_v51, %v750_v50  ;;  %v734_v61 = vld [vmem:[%s8148_s11 + $0x120] sm:$0xff]  ;;  %v721_v63 = vld [vmem:[%s8148_s11 + $0xb8] sm:$0xff] }
 0x141   :  { %v735_v62 = vld [vmem:[%s8148_s11 + $0x128] sm:$0xff]  ;;  %v752_v0 = vld [vmem:[%s8148_s11 + $0x1b0] sm:$0xff]  ;;  %v753_v1 = vld [vmem:[%s8148_s11 + $0x1b8] sm:$0xff]  ;;  %v5946_v2 = vpack.c.bf16 %v703_v56, %v702_v55  ;;  %v5948_v4 = vpack.c.bf16 %v721_v63, %v720_v59 }
 0x142   :  { %5883 = vmatpush3.bf16.msra.mxu0 %v5880_v10  ;;  %5899 = vmatpush3.bf16.msra.mxu1 %v5880_v10  ;;  %v705_v6 = vld [vmem:[%s8148_s11 + $0x38] sm:$0xff]  ;;  %v5980_v7 = vpack.c.bf16 %v753_v1, %v752_v0  ;;  %v722_v8 = vld [vmem:[%s8148_s11 + $0xc0] sm:$0xff]  ;;  %v723_v9 = vld [vmem:[%s8148_s11 + $0xc8] sm:$0xff] }
 0x143   :  { %5885 = vmatprep.subr.bf16.mxu0 %v5884_v13  ;;  %5901 = vmatprep.subr.bf16.mxu1 %v5884_v13  ;;  %v5952_v11 = vpack.c.bf16 %v723_v9, %v722_v8  ;;  %v706_v12 = vld [vmem:[%s8148_s11 + $0x40] sm:$0xff]  ;;  %v711_v25 = vld [vmem:[%s8148_s11 + $0x68] sm:$0xff]  ;;  %v729_v27 = vld [vmem:[%s8148_s11 + $0xf8] sm:$0xff] }
 0x144   :  { %v710_v24 = vld [vmem:[%s8148_s11 + $0x60] sm:$0xff]  ;;  %v712_v30 = vld [vmem:[%s8148_s11 + $0x70] sm:$0xff]  ;;  %v713_v31 = vld [vmem:[%s8148_s11 + $0x78] sm:$0xff] }
 0x145   :  { %v5962_v28 = vpack.c.bf16 %v711_v25, %v710_v24  ;;  %v736_v32 = vld [vmem:[%s8148_s11 + $0x130] sm:$0xff]  ;;  %v5966_v33 = vpack.c.bf16 %v713_v31, %v712_v30  ;;  %v737_v34 = vld [vmem:[%s8148_s11 + $0x138] sm:$0xff]  ;;  %v758_v48 = vld [vmem:[%s8148_s11 + $0x1e0] sm:$0xff] }
 0x146   :  { %5887 = vmatpush3.bf16.msra.mxu0 %v5884_v13  ;;  %5903 = vmatpush3.bf16.msra.mxu1 %v5884_v13  ;;  %v5982_v35 = vpack.c.bf16 %v737_v34, %v736_v32  ;;  %v756_v42 = vld [vmem:[%s8148_s11 + $0x1d0] sm:$0xff]  ;;  %v759_v49 = vld [vmem:[%s8148_s11 + $0x1e8] sm:$0xff]  ;;  %v742_v51 = vld [vmem:[%s8148_s11 + $0x160] sm:$0xff] }
 0x147   :  { %5905 = vmatprep.subr.bf16.mxu0 %v5872_v3  ;;  %5921 = vmatprep.subr.bf16.mxu1 %v5872_v3  ;;  %v740_v45 = vld [vmem:[%s8148_s11 + $0x150] sm:$0xff]  ;;  %v5992_v50 = vpack.c.bf16 %v759_v49, %v758_v48  ;;  %v761_v55 = vld [vmem:[%s8148_s11 + $0x1f8] sm:$0xff] }
 0x149   :  { %5531 = vmatmul.mubr.msk.f32.vlgmr.msra.gmra.mrb[0].mxu1 %vm294_vm0, %v394_v14  ;;  %5509 = vmatmul.mubr.msk.f32.vlgmr.msra.gmra.mrb[0].mxu0 %vm294_vm0, %v291_v15  ;;  %v724_v14 = vld [vmem:[%s8148_s11 + $0xd0] sm:$0xff]  ;;  %v725_v15 = vld [vmem:[%s8148_s11 + $0xd8] sm:$0xff] }
 0x14a   :  { %5907 = vmatpush3.bf16.msra.mxu0 %v5872_v3  ;;  %5923 = vmatpush3.bf16.msra.mxu1 %v5872_v3  ;;  %v5978_v3 = vpack.c.bf16 %v735_v62, %v734_v61 }
 0x14b   :  { %5909 = vmatprep.subr.bf16.mxu0 %v5876_v5  ;;  %5925 = vmatprep.subr.bf16.mxu1 %v5876_v5 }
 0x14c   :  { %5533 = vmatprep.mubr.msk.f32.mxu1 %vm294_vm0, %v395_v16  ;;  %5511 = vmatprep.mubr.msk.f32.mxu0 %vm294_vm0, %v292_v17  ;;  %v5956_v17 = vpack.c.bf16 %v725_v15, %v724_v14 }
 0x14d   :  { %5534 = vmatmul.mubr.msk.f32.gmra.mrb[2].mxu1 %vm294_vm0, %v396_v18  ;;  %5512 = vmatmul.mubr.msk.f32.gmra.mrb[2].mxu0 %vm294_vm0, %v293_v19  ;;  %v708_v18 = vld [vmem:[%s8148_s11 + $0x50] sm:$0xff]  ;;  %v709_v19 = vld [vmem:[%s8148_s11 + $0x58] sm:$0xff] }
 0x14e   :  { %5911 = vmatpush3.bf16.msra.mxu0 %v5876_v5  ;;  %5927 = vmatpush3.bf16.msra.mxu1 %v5876_v5  ;;  %v704_v5 = vld [vmem:[%s8148_s11 + $0x30] sm:$0xff]  ;;  %v5958_v22 = vpack.c.bf16 %v709_v19, %v708_v18 }
 0x14f   :  { %5913 = vmatprep.subr.bf16.mxu0 %v5880_v10  ;;  %5929 = vmatprep.subr.bf16.mxu1 %v5880_v10 }
 0x150   :  { %5552 = vmatprep.mubr.msk.f32.mxu0 %vm294_vm0, %v495_v20  ;;  %5574 = vmatprep.mubr.msk.f32.mxu1 %vm294_vm0, %v597_v21  ;;  %v726_v20 = vld [vmem:[%s8148_s11 + $0xe0] sm:$0xff]  ;;  %v727_v21 = vld [vmem:[%s8148_s11 + $0xe8] sm:$0xff] }
 0x151   :  { %v5960_v23 = vpack.c.bf16 %v727_v21, %v726_v20 }
 0x152   :  { %5915 = vmatpush3.bf16.msra.mxu0 %v5880_v10  ;;  %5931 = vmatpush3.bf16.msra.mxu1 %v5880_v10  ;;  %v5950_v10 = vpack.c.bf16 %v705_v6, %v704_v5 }
 0x153   :  { %5917 = vmatprep.subr.bf16.mxu0 %v5884_v13  ;;  %5933 = vmatprep.subr.bf16.mxu1 %v5884_v13 }
 0x156   :  { %5919 = vmatpush3.bf16.msra.mxu0 %v5884_v13  ;;  %5935 = vmatpush3.bf16.msra.mxu1 %v5884_v13  ;;  %v707_v13 = vld [vmem:[%s8148_s11 + $0x48] sm:$0xff] }
 0x157   :  { %5937 = vmatprep.subr.bf16.mxu0 %v5936_v26  ;;  %5969 = vmatprep.subr.bf16.mxu1 %v5968_v29  ;;  %v5954_v16 = vpack.c.bf16 %v707_v13, %v706_v12  ;;  %v728_v26 = vld [vmem:[%s8148_s11 + $0xf0] sm:$0xff]  ;;  %v947_v13 = vld [vmem:[#allocation5] sm:$0xff] }
 0x158   :  { %v5964_v29 = vpack.c.bf16 %v729_v27, %v728_v26  ;;  %v1032_v12 = vld [vmem:[#allocation5 + $0x10] sm:$0xff]  ;;  %v4816_v26 = vld [vmem:[%s8149_s20] ss:$0 sm:$0xff] }
 0x159   :  { %5553 = vmatmul.mubr.msk.f32.vlgmr.msra.gmra.mrb[4].mxu0 %vm294_vm0, %v496_v36  ;;  %5575 = vmatmul.mubr.msk.f32.vlgmr.msra.gmra.mrb[4].mxu1 %vm294_vm0, %v598_v37  ;;  %v754_v36 = vld [vmem:[%s8148_s11 + $0x1c0] sm:$0xff]  ;;  %v755_v37 = vld [vmem:[%s8148_s11 + $0x1c8] sm:$0xff] }
 0x15a   :  { %5577 = vmatprep.mubr.msk.f32.mxu1 %vm294_vm0, %v599_v38  ;;  %5555 = vmatprep.mubr.msk.f32.mxu0 %vm294_vm0, %v497_v39  ;;  %v5984_v38 = vpack.c.bf16 %v755_v37, %v754_v36  ;;  %v738_v39 = vld [vmem:[%s8148_s11 + $0x140] sm:$0xff] }
 0x15b   :  { %5939 = vmatpush3.bf16.msra.mxu0 %v5938_v40  ;;  %5971 = vmatpush3.bf16.msra.mxu1 %v5970_v43  ;;  %v739_v40 = vld [vmem:[%s8148_s11 + $0x148] sm:$0xff]  ;;  %v757_v43 = vld [vmem:[%s8148_s11 + $0x1d8] sm:$0xff] }
 0x15c   :  { %5941 = vmatprep.subr.bf16.mxu0 %v5940_v44  ;;  %5973 = vmatprep.subr.bf16.mxu1 %v5972_v46  ;;  %v5986_v41 = vpack.c.bf16 %v739_v40, %v738_v39  ;;  %v5988_v44 = vpack.c.bf16 %v757_v43, %v756_v42  ;;  %v741_v46 = vld [vmem:[%s8148_s11 + $0x158] sm:$0xff] }
 0x15d   :  { %5578 = vmatmul.mubr.msk.f32.gmra.mrb[6].mxu1 %vm294_vm0, %v600_v52  ;;  %5556 = vmatmul.mubr.msk.f32.gmra.mrb[6].mxu0 %vm294_vm0, %v498_v53  ;;  %v5990_v47 = vpack.c.bf16 %v741_v46, %v740_v45  ;;  %v743_v52 = vld [vmem:[%s8148_s11 + $0x168] sm:$0xff] }
 0x15e   :  { %v5994_v53 = vpack.c.bf16 %v743_v52, %v742_v51 }
 0x15f   :  { %5943 = vmatpush3.bf16.msra.mxu0 %v5942_v54  ;;  %5975 = vmatpush3.bf16.msra.mxu1 %v5974_v57  ;;  %v760_v54 = vld [vmem:[%s8148_s11 + $0x1f0] sm:$0xff] }
 0x160   :  { %5945 = vmatprep.subr.bf16.mxu0 %v5944_v58  ;;  %5977 = vmatprep.subr.bf16.mxu1 %v5976_v60  ;;  %v5996_v56 = vpack.c.bf16 %v761_v55, %v760_v54  ;;  %v744_v57 = vld [vmem:[%s8148_s11 + $0x170] sm:$0xff]  ;;  %v745_v58 = vld [vmem:[%s8148_s11 + $0x178] sm:$0xff]  ;;  %s8152_s11 = sld [smem:[#allocation43_spill]] }
 0x161   :  { %v5998_v59 = vpack.c.bf16 %v745_v58, %v744_v57  ;;  %v1033_v57 = vld [vmem:[#allocation5 + $0x18] sm:$0xff]  ;;  %v948_v58 = vld [vmem:[#allocation5 + $0x8] sm:$0xff] }
 0x163   :  { %5947 = vmatpush3.bf16.msra.mxu0 %v5946_v2  ;;  %5979 = vmatpush3.bf16.msra.mxu1 %v5978_v3 }
 0x164   :  { %5949 = vmatprep.subr.bf16.mxu0 %v5948_v4  ;;  %5981 = vmatprep.subr.bf16.mxu1 %v5980_v7 }
 0x167   :  { %5951 = vmatpush3.bf16.msra.mxu0 %v5950_v10  ;;  %5983 = vmatpush3.bf16.msra.mxu1 %v5982_v35 }
 0x168   :  { %5953 = vmatprep.subr.bf16.mxu0 %v5952_v11  ;;  %5985 = vmatprep.subr.bf16.mxu1 %v5984_v38 }
 0x16b   :  { %5955 = vmatpush3.bf16.msra.mxu0 %v5954_v16  ;;  %5987 = vmatpush3.bf16.msra.mxu1 %v5986_v41 }
 0x16c   :  { %5957 = vmatprep.subr.bf16.mxu0 %v5956_v17  ;;  %5989 = vmatprep.subr.bf16.mxu1 %v5988_v44 }
 0x16f   :  { %5959 = vmatpush3.bf16.msra.mxu0 %v5958_v22  ;;  %5991 = vmatpush3.bf16.msra.mxu1 %v5990_v47 }
 0x170   :  { %5961 = vmatprep.subr.bf16.mxu0 %v5960_v23  ;;  %5993 = vmatprep.subr.bf16.mxu1 %v5992_v50 }
 0x173   :  { %5963 = vmatpush3.bf16.msra.mxu0 %v5962_v28  ;;  %5995 = vmatpush3.bf16.msra.mxu1 %v5994_v53 }
 0x174   :  { %5965 = vmatprep.subr.bf16.mxu0 %v5964_v29  ;;  %5997 = vmatprep.subr.bf16.mxu1 %v5996_v56 }
 0x177   :  { %5967 = vmatpush3.bf16.msra.mxu0 %v5966_v33  ;;  %5999 = vmatpush3.bf16.msra.mxu1 %v5998_v59  ;;  %v1299_v59 = vld [vmem:[%s8150_s30 + $0x80] sm:$0xff] }
 0x21c   :  { %v5532_v60 = vpop.f32.mrb[0].mxu1  ;;  %v5510_v61 = vpop.f32.mrb[0].mxu0 }
 0x21d   :  { %v475_v62 = vpop.f32.mrb[1].mxu1  ;;  %v373_v63 = vpop.f32.mrb[1].mxu0 }
 0x21e   :  { %833 = vmatprep.mubr.f32.mxu0 %v475_v62  ;;  %v1332_v62 = vld [vmem:[%s8150_s30 + $0x188] sm:$0xff] }
 0x21f   :  { %834 = vmatmul.mubr.f32.vlgmr.msra.gmra.mrb[8].mxu0 %v373_v63  ;;  %v1116_v63 = vld [vmem:[#allocation5 + $0x20] sm:$0xff] }
 0x220   :  { %838 = vmatprep.mubr.f32.mxu0 %v5532_v60  ;;  %v5535_v0 = vpop.f32.mrb[2].mxu1  ;;  %v5513_v1 = vpop.f32.mrb[2].mxu0  ;;  %v1300_v60 = vld [vmem:[%s8150_s30 + $0x88] sm:$0xff] }
 0x221   :  { %v485_v2 = vpop.f32.mrb[3].mxu1  ;;  %v383_v3 = vpop.f32.mrb[3].mxu0 }
 0x223   :  { %839 = vmatmul.mubr.f32.gmra.mrb[10].mxu0 %v5510_v61  ;;  %v1331_v61 = vld [vmem:[%s8150_s30 + $0x180] sm:$0xff] }
 0x224   :  { %843 = vmatprep.mubr.f32.mxu0 %v485_v2  ;;  %v1284_v2 = vld [vmem:[%s8150_s30 + $0x8] sm:$0xff] }
 0x227   :  { %844 = vmatmul.mubr.f32.gmra.mrb[12].mxu0 %v383_v3  ;;  %v6032_v3 = vpack.c.bf16 %v1300_v60, %v1299_v59  ;;  %v1341_v59 = vld [vmem:[%s8150_s30 + $0x1d0] sm:$0xff]  ;;  %v1342_v60 = vld [vmem:[%s8150_s30 + $0x1d8] sm:$0xff] }
 0x228   :  { %848 = vmatprep.mubr.f32.mxu0 %v5535_v0  ;;  %v1200_v0 = vld [vmem:[#allocation5 + $0x30] sm:$0xff] }
 0x22b   :  { %849 = vmatmul.mubr.f32.gmra.mrb[14].mxu0 %v5513_v1  ;;  %v1283_v1 = vld [vmem:[%s8150_s30] sm:$0xff] }
 0x22c   :  { %v5554_v4 = vpop.f32.mrb[4].mxu0  ;;  %v5576_v5 = vpop.f32.mrb[4].mxu1  ;;  %5588 = vmatprep.mubr.msk.f32.mxu0 %vm949_vm1, %v947_v13  ;;  %v6034_v13 = vpack.c.bf16 %v1284_v2, %v1283_v1  ;;  %v1294_v1 = vld [vmem:[%s8150_s30 + $0x58] sm:$0xff]  ;;  %v6084_v2 = vpack.c.bf16 %v1342_v60, %v1341_v59  ;;  %v1655_v59 = vld [vmem:[#allocation7 + $0x60] sm:$0xff]  ;;  %v1656_v60 = vld [vmem:[#allocation7 + $0x68] sm:$0xff] }
 0x22d   :  { %v577_v6 = vpop.f32.mrb[5].mxu0  ;;  %v679_v7 = vpop.f32.mrb[5].mxu1 }
 0x22e   :  { %918 = vmatprep.mubr.f32.mxu1 %v679_v7  ;;  %v1316_v7 = vld [vmem:[%s8150_s30 + $0x108] sm:$0xff] }
 0x22f   :  { %919 = vmatmul.mubr.f32.vlgmr.msra.gmra.mrb[8].mxu1 %v577_v6  ;;  %v1315_v6 = vld [vmem:[%s8150_s30 + $0x100] sm:$0xff] }
 0x230   :  { %923 = vmatprep.mubr.f32.mxu1 %v5576_v5  ;;  %v5579_v8 = vpop.f32.mrb[6].mxu1  ;;  %v5557_v9 = vpop.f32.mrb[6].mxu0  ;;  %v6064_v5 = vpack.c.bf16 %v1332_v62, %v1331_v61 }
 0x231   :  { %v689_v10 = vpop.f32.mrb[7].mxu1  ;;  %v587_v11 = vpop.f32.mrb[7].mxu0 }
 0x233   :  { %924 = vmatmul.mubr.f32.gmra.mrb[10].mxu1 %v5554_v4  ;;  %v1301_v4 = vld [vmem:[%s8150_s30 + $0x90] sm:$0xff] }
 0x234   :  { %928 = vmatprep.mubr.f32.mxu1 %v689_v10  ;;  %v1334_v10 = vld [vmem:[%s8150_s30 + $0x198] sm:$0xff] }
 0x237   :  { %929 = vmatmul.mubr.f32.gmra.mrb[12].mxu1 %v587_v11  ;;  %v1117_v11 = vld [vmem:[#allocation5 + $0x28] sm:$0xff] }
 0x238   :  { %933 = vmatprep.mubr.f32.mxu1 %v5579_v8  ;;  %v1302_v8 = vld [vmem:[%s8150_s30 + $0x98] sm:$0xff] }
 0x23b   :  { %934 = vmatmul.mubr.f32.gmra.mrb[14].mxu1 %v5557_v9  ;;  %v1333_v9 = vld [vmem:[%s8150_s30 + $0x190] sm:$0xff] }
 0x23c   :  { %5599 = vmatprep.mubr.msk.f32.mxu1 %vm949_vm1, %v1032_v12  ;;  %v1201_v12 = vld [vmem:[#allocation5 + $0x38] sm:$0xff] }
 0x2f2   :  { %v4942_v14 = vpop.f32.mrb[8].mxu0 }
 0x2f3   :  { %v4943_v15 = vpop.f32.mrb[9].mxu0 }
 0x2f4   :  { %v4944_v16 = vadd.f32 %v4943_v15, %v4942_v14  ;;  %v1285_v14 = vld [vmem:[%s8150_s30 + $0x10] sm:$0xff]  ;;  %v1286_v15 = vld [vmem:[%s8150_s30 + $0x18] sm:$0xff] }
 0x2f6   :  { %v4945_v17 = vpop.f32.mrb[10].mxu0  ;;  %v836_v29 = vadd.f32 %v4944_v16, %v4816_v26  ;;  %v6066_v16 = vpack.c.bf16 %v1316_v7, %v1315_v6  ;;  %v1295_v7 = vld [vmem:[%s8150_s30 + $0x60] sm:$0xff] }
 0x2f7   :  { %v4946_v18 = vpop.f32.mrb[11].mxu0 }
 0x2f8   :  { %v4947_v19 = vadd.f32 %v4946_v18, %v4945_v17  ;;  %v6036_v17 = vpack.c.bf16 %v1302_v8, %v1301_v4  ;;  %v1303_v18 = vld [vmem:[%s8150_s30 + $0xa0] sm:$0xff]  ;;  %v1312_v4 = vld [vmem:[%s8150_s30 + $0xe8] sm:$0xff] }
 0x2f9   :  { %v1296_v8 = vld [vmem:[%s8150_s30 + $0x68] sm:$0xff] }
 0x2fa   :  { %v4948_v20 = vpop.f32.mrb[12].mxu0  ;;  %v841_v34 = vadd.f32 %v4947_v19, %v4816_v26  ;;  %v6068_v19 = vpack.c.bf16 %v1334_v10, %v1333_v9  ;;  %v1313_v9 = vld [vmem:[%s8150_s30 + $0xf0] sm:$0xff]  ;;  %v1314_v10 = vld [vmem:[%s8150_s30 + $0xf8] sm:$0xff] }
 0x2fb   :  { %v4949_v21 = vpop.f32.mrb[13].mxu0 }
 0x2fc   :  { %v4950_v22 = vadd.f32 %v4949_v21, %v4948_v20  ;;  %v1317_v20 = vld [vmem:[%s8150_s30 + $0x110] sm:$0xff]  ;;  %v1318_v21 = vld [vmem:[%s8150_s30 + $0x118] sm:$0xff] }
 0x2fe   :  { %v4951_v23 = vpop.f32.mrb[14].mxu0  ;;  %v846_v40 = vadd.f32 %v4950_v22, %v4816_v26  ;;  %v1304_v22 = vld [vmem:[%s8150_s30 + $0xa8] sm:$0xff] }
 0x2ff   :  { %v4952_v24 = vpop.f32.mrb[15].mxu0 }
 0x300   :  { %v4953_v25 = vadd.f32 %v4952_v24, %v4951_v23  ;;  %v1335_v23 = vld [vmem:[%s8150_s30 + $0x1a0] sm:$0xff]  ;;  %v1336_v24 = vld [vmem:[%s8150_s30 + $0x1a8] sm:$0xff] }
 0x302   :  { %v4986_v27 = vpop.f32.mrb[8].mxu1  ;;  %v851_v48 = vadd.f32 %v4953_v25, %v4816_v26  ;;  %v6038_v25 = vpack.c.bf16 %v1286_v15, %v1285_v14  ;;  %v1287_v26 = vld [vmem:[%s8150_s30 + $0x20] sm:$0xff]  ;;  %v1298_v14 = vld [vmem:[%s8150_s30 + $0x78] sm:$0xff]  ;;  %v1325_v15 = vld [vmem:[%s8150_s30 + $0x150] sm:$0xff] }
 0x303   :  { %v4987_v28 = vpop.f32.mrb[9].mxu1 }
 0x304   :  { %v4988_v30 = vadd.f32 %v4987_v28, %v4986_v27  ;;  %v1288_v27 = vld [vmem:[%s8150_s30 + $0x28] sm:$0xff]  ;;  %v6070_v28 = vpack.c.bf16 %v1318_v21, %v1317_v20 }
 0x305   :  { %v1344_v20 = vld [vmem:[%s8150_s30 + $0x1e8] sm:$0xff] }
 0x306   :  { %v921_v31 = vadd.f32 %v4988_v30, %v836_v29  ;;  %v4989_v32 = vpop.f32.mrb[10].mxu1  ;;  %v6040_v29 = vpack.c.bf16 %v1304_v22, %v1303_v18  ;;  %v1305_v30 = vld [vmem:[%s8150_s30 + $0xb0] sm:$0xff]  ;;  %v1327_v22 = vld [vmem:[%s8150_s30 + $0x160] sm:$0xff] }
 0x307   :  { %v4990_v33 = vpop.f32.mrb[11].mxu1 }
 0x308   :  { %v4991_v35 = vadd.f32 %v4990_v33, %v4989_v32  ;;  %v939_v36 = vmul.f32 0.2, %v921_v31  ;;  %v1319_v32 = vld [vmem:[%s8150_s30 + $0x120] sm:$0xff]  ;;  %v1320_v33 = vld [vmem:[%s8150_s30 + $0x128] sm:$0xff] }
 0x30a   :  { %v926_v37 = vadd.f32 %v4991_v35, %v841_v34  ;;  %v4992_v38 = vpop.f32.mrb[12].mxu1  ;;  %v943_v43 = vmax.f32 %v921_v31, %v939_v36  ;;  %v6072_v31 = vpack.c.bf16 %v1336_v24, %v1335_v23  ;;  %v1306_v34 = vld [vmem:[%s8150_s30 + $0xb8] sm:$0xff]  ;;  %v1337_v35 = vld [vmem:[%s8150_s30 + $0x1b0] sm:$0xff]  ;;  %v1328_v23 = vld [vmem:[%s8150_s30 + $0x168] sm:$0xff] }
 0x30b   :  { %v4993_v39 = vpop.f32.mrb[13].mxu1  ;;  %v1338_v36 = vld [vmem:[%s8150_s30 + $0x1b8] sm:$0xff]  ;;  %v6090_v24 = vpack.c.bf16 %v1328_v23, %v1327_v22 }
 0x30c   :  { %v940_v41 = vmul.f32 0.2, %v926_v37  ;;  %v4994_v42 = vadd.f32 %v4993_v39, %v4992_v38  ;;  %v1289_v38 = vld [vmem:[%s8150_s30 + $0x30] sm:$0xff]  ;;  %v1290_v39 = vld [vmem:[%s8150_s30 + $0x38] sm:$0xff] }
 0x30e   :  { %v944_v44 = vmax.f32 %v926_v37, %v940_v41  ;;  %v931_v45 = vadd.f32 %v4994_v42, %v846_v40  ;;  %v4995_v46 = vpop.f32.mrb[14].mxu1  ;;  %v6042_v37 = vpack.c.bf16 %v1288_v27, %v1287_v26  ;;  %v6074_v40 = vpack.c.bf16 %v1320_v33, %v1319_v32  ;;  %v1307_v42 = vld [vmem:[%s8150_s30 + $0xc0] sm:$0xff]  ;;  %v1346_v26 = vld [vmem:[%s8150_s30 + $0x1f8] sm:$0xff] }
 0x30f   :  { %v4996_v47 = vpop.f32.mrb[15].mxu1  ;;  %v6044_v41 = vpack.c.bf16 %v1306_v34, %v1305_v30 }
 0x310   :  { %v6000_v49 = vpack.c.bf16 %v944_v44, %v943_v43  ;;  %v4997_v50 = vadd.f32 %v4996_v47, %v4995_v46  ;;  %v941_v51 = vmul.f32 0.2, %v931_v45  ;;  %v6076_v43 = vpack.c.bf16 %v1338_v36, %v1337_v35  ;;  %v1321_v44 = vld [vmem:[%s8150_s30 + $0x130] sm:$0xff]  ;;  %v1308_v46 = vld [vmem:[%s8150_s30 + $0xc8] sm:$0xff]  ;;  %v1339_v47 = vld [vmem:[%s8150_s30 + $0x1c0] sm:$0xff] }
 0x312   :  { %v936_v52 = vadd.f32 %v4997_v50, %v851_v48  ;;  %6001 = vmatprep.subr.bf16.mxu0 %v6000_v49  ;;  %6009 = vmatprep.subr.bf16.mxu1 %v6000_v49  ;;  %v945_v54 = vmax.f32 %v931_v45, %v941_v51  ;;  %v1322_v45 = vld [vmem:[%s8150_s30 + $0x138] sm:$0xff]  ;;  %v1340_v48 = vld [vmem:[%s8150_s30 + $0x1c8] sm:$0xff]  ;;  %v1291_v50 = vld [vmem:[%s8150_s30 + $0x40] sm:$0xff] }
 0x313   :  { %6003 = vmatpush3.bf16.msra.mxu0 %v6000_v49  ;;  %6011 = vmatpush3.bf16.msra.mxu1 %v6000_v49  ;;  %v1292_v51 = vld [vmem:[%s8150_s30 + $0x48] sm:$0xff] }
 0x314   :  { %v942_v53 = vmul.f32 0.2, %v936_v52  ;;  %v6050_v61 = vpack.c.bf16 %v1292_v51, %v1291_v50  ;;  %v1649_v50 = vld [vmem:[#allocation7 + $0x30] sm:$0xff]  ;;  %v1650_v51 = vld [vmem:[#allocation7 + $0x38] sm:$0xff] }
 0x316   :  { %v946_v55 = vmax.f32 %v936_v52, %v942_v53  ;;  %v6078_v52 = vpack.c.bf16 %v1322_v45, %v1321_v44  ;;  %v6048_v53 = vpack.c.bf16 %v1308_v46, %v1307_v42  ;;  %v1644_v42 = vld [vmem:[#allocation7 + $0x8] sm:$0xff]  ;;  %v1645_v44 = vld [vmem:[#allocation7 + $0x10] sm:$0xff]  ;;  %v1646_v45 = vld [vmem:[#allocation7 + $0x18] sm:$0xff] }
 0x317   :  { %v7875_v46 = vpack.c.bf16 %v1646_v45, %v1645_v44  ;;  %v1959_v44 = vlaneseq }
 0x318   :  { %v6004_v56 = vpack.c.bf16 %v946_v55, %v945_v54  ;;  %v1309_v54 = vld [vmem:[%s8150_s30 + $0xd0] sm:$0xff]  ;;  %v6080_v55 = vpack.c.bf16 %v1340_v48, %v1339_v47  ;;  %v1647_v47 = vld [vmem:[#allocation7 + $0x20] sm:$0xff]  ;;  %v1648_v48 = vld [vmem:[#allocation7 + $0x28] sm:$0xff] }
 0x319   :  { %v1960_v45 = vshrl.u32 %v1959_v44, 7 }
 0x31a   :  { %6005 = vmatprep.subr.bf16.mxu0 %v6004_v56  ;;  %6013 = vmatprep.subr.bf16.mxu1 %v6004_v56 }
 0x31b   :  { %6007 = vmatpush3.bf16.msra.mxu0 %v6004_v56  ;;  %6015 = vmatpush3.bf16.msra.mxu1 %v6004_v56 }
 0x31c   :  { %6017 = vmatprep.subr.bf16.mxu0 %v6000_v49  ;;  %6025 = vmatprep.subr.bf16.mxu1 %v6000_v49 }
 0x31e   :  { %5600 = vmatmul.mubr.msk.f32.vlgmr.msra.gmra.mrb[16].mxu1 %vm949_vm1, %v1033_v57  ;;  %5589 = vmatmul.mubr.msk.f32.vlgmr.msra.gmra.mrb[16].mxu0 %vm949_vm1, %v948_v58  ;;  %v1324_v57 = vld [vmem:[%s8150_s30 + $0x148] sm:$0xff]  ;;  %v1310_v58 = vld [vmem:[%s8150_s30 + $0xd8] sm:$0xff] }
 0x31f   :  { %6019 = vmatpush3.bf16.msra.mxu0 %v6000_v49  ;;  %6027 = vmatpush3.bf16.msra.mxu1 %v6000_v49  ;;  %v6046_v49 = vpack.c.bf16 %v1290_v39, %v1289_v38  ;;  %v7069_v39 = vmov 0.0|0.0  }
 0x320   :  { %6021 = vmatprep.subr.bf16.mxu0 %v6004_v56  ;;  %6029 = vmatprep.subr.bf16.mxu1 %v6004_v56 }
 0x321   :  { %5610 = vmatprep.mubr.msk.f32.mxu0 %vm949_vm1, %v1116_v63  ;;  %5621 = vmatprep.mubr.msk.f32.mxu1 %vm949_vm1, %v1200_v0  ;;  %v6052_v63 = vpack.c.bf16 %v1310_v58, %v1309_v54  ;;  %v1293_v0 = vld [vmem:[%s8150_s30 + $0x50] sm:$0xff]  ;;  %v1652_v54 = vld [vmem:[#allocation7 + $0x48] sm:$0xff] }
 0x323   :  { %6023 = vmatpush3.bf16.msra.mxu0 %v6004_v56  ;;  %6031 = vmatpush3.bf16.msra.mxu1 %v6004_v56  ;;  %v1323_v56 = vld [vmem:[%s8150_s30 + $0x140] sm:$0xff] }
 0x324   :  { %6033 = vmatprep.subr.bf16.mxu0 %v6032_v3  ;;  %6065 = vmatprep.subr.bf16.mxu1 %v6064_v5  ;;  %v6082_v62 = vpack.c.bf16 %v1324_v57, %v1323_v56  ;;  %v1311_v3 = vld [vmem:[%s8150_s30 + $0xe0] sm:$0xff]  ;;  %v6054_v5 = vpack.c.bf16 %v1294_v1, %v1293_v0  ;;  %v1653_v56 = vld [vmem:[#allocation7 + $0x50] sm:$0xff]  ;;  %v1654_v57 = vld [vmem:[#allocation7 + $0x58] sm:$0xff] }
 0x325   :  { %v6056_v6 = vpack.c.bf16 %v1312_v4, %v1311_v3  ;;  %v6118_v58 = vpack.c.bf16 %v1654_v57, %v1653_v56 }
 0x326   :  { %5611 = vmatmul.mubr.msk.f32.vlgmr.msra.gmra.mrb[18].mxu0 %vm949_vm1, %v1117_v11  ;;  %5622 = vmatmul.mubr.msk.f32.vlgmr.msra.gmra.mrb[18].mxu1 %vm949_vm1, %v1201_v12  ;;  %v6058_v11 = vpack.c.bf16 %v1296_v8, %v1295_v7  ;;  %v6060_v12 = vpack.c.bf16 %v1314_v10, %v1313_v9 }
 0x327   :  { %6035 = vmatpush3.bf16.msra.mxu0 %v6034_v13  ;;  %6067 = vmatpush3.bf16.msra.mxu1 %v6066_v16  ;;  %v1297_v13 = vld [vmem:[%s8150_s30 + $0x70] sm:$0xff] }
 0x328   :  { %6037 = vmatprep.subr.bf16.mxu0 %v6036_v17  ;;  %6069 = vmatprep.subr.bf16.mxu1 %v6068_v19  ;;  %v6062_v16 = vpack.c.bf16 %v1298_v14, %v1297_v13  ;;  %v1326_v17 = vld [vmem:[%s8150_s30 + $0x158] sm:$0xff]  ;;  %v1343_v19 = vld [vmem:[%s8150_s30 + $0x1e0] sm:$0xff] }
 0x329   :  { %v6086_v18 = vpack.c.bf16 %v1326_v17, %v1325_v15  ;;  %v6088_v21 = vpack.c.bf16 %v1344_v20, %v1343_v19  ;;  %v7072_v19 = vmov 1.0  }
 0x32b   :  { %6039 = vmatpush3.bf16.msra.mxu0 %v6038_v25  ;;  %6071 = vmatpush3.bf16.msra.mxu1 %v6070_v28  ;;  %v1345_v25 = vld [vmem:[%s8150_s30 + $0x1f0] sm:$0xff] }
 0x32c   :  { %6041 = vmatprep.subr.bf16.mxu0 %v6040_v29  ;;  %6073 = vmatprep.subr.bf16.mxu1 %v6072_v31  ;;  %v6092_v27 = vpack.c.bf16 %v1346_v26, %v1345_v25  ;;  %v1329_v28 = vld [vmem:[%s8150_s30 + $0x170] sm:$0xff]  ;;  %v1330_v29 = vld [vmem:[%s8150_s30 + $0x178] sm:$0xff]  ;;  %v1812_v25 = vld [vmem:[#allocation8 + $0x8] sm:$0xff] }
 0x32d   :  { %v6094_v30 = vpack.c.bf16 %v1330_v29, %v1329_v28 }
 0x32f   :  { %6043 = vmatpush3.bf16.msra.mxu0 %v6042_v37  ;;  %6075 = vmatpush3.bf16.msra.mxu1 %v6074_v40  ;;  %v7071_v40 = vmov 0.0  }
 0x330   :  { %6045 = vmatprep.subr.bf16.mxu0 %v6044_v41  ;;  %6077 = vmatprep.subr.bf16.mxu1 %v6076_v43  ;;  %v1643_v41 = vld [vmem:[#allocation7] sm:$0xff] }
 0x331   :  { %v7872_v43 = vpack.c.bf16 %v1644_v42, %v1643_v41  ;;  %v1808_v41 = vld [vmem:[%s8152_s11] sm:$0x1] }
 0x333   :  { %6047 = vmatpush3.bf16.msra.mxu0 %v6046_v49  ;;  %6079 = vmatpush3.bf16.msra.mxu1 %v6078_v52  ;;  %v6109_v49 = vpack.c.bf16 %v1648_v48, %v1647_v47  ;;  %v6112_v52 = vpack.c.bf16 %v1650_v51, %v1649_v50 }
 0x334   :  { %6049 = vmatprep.subr.bf16.mxu0 %v6048_v53  ;;  %6081 = vmatprep.subr.bf16.mxu1 %v6080_v55  ;;  %v1651_v53 = vld [vmem:[#allocation7 + $0x40] sm:$0xff] }
 0x335   :  { %v6115_v55 = vpack.c.bf16 %v1652_v54, %v1651_v53 }
 0x337   :  { %6051 = vmatpush3.bf16.msra.mxu0 %v6050_v61  ;;  %6083 = vmatpush3.bf16.msra.mxu1 %v6082_v62  ;;  %v6121_v61 = vpack.c.bf16 %v1656_v60, %v1655_v59  ;;  %v1657_v62 = vld [vmem:[#allocation7 + $0x70] sm:$0xff] }
 0x338   :  { %6053 = vmatprep.subr.bf16.mxu0 %v6052_v63  ;;  %6085 = vmatprep.subr.bf16.mxu1 %v6084_v2  ;;  %v1658_v63 = vld [vmem:[#allocation7 + $0x78] sm:$0xff] }
 0x339   :  { %v6124_v0 = vpack.c.bf16 %v1658_v63, %v1657_v62  ;;  %v2050_v62 = vld [vmem:[#allocation10 + $0x8] sm:$0xff]  ;;  %v2290_v63 = vld [vmem:[#allocation11 + $0x80] sm:$0xff] }
 0x33b   :  { %6055 = vmatpush3.bf16.msra.mxu0 %v6054_v5  ;;  %6087 = vmatpush3.bf16.msra.mxu1 %v6086_v18 }
 0x33c   :  { %6057 = vmatprep.subr.bf16.mxu0 %v6056_v6  ;;  %6089 = vmatprep.subr.bf16.mxu1 %v6088_v21 }
 0x33f   :  { %6059 = vmatpush3.bf16.msra.mxu0 %v6058_v11  ;;  %6091 = vmatpush3.bf16.msra.mxu1 %v6090_v24  ;;  %v1811_v24 = vld [vmem:[#allocation8] sm:$0xff] }
 0x340   :  { %6061 = vmatprep.subr.bf16.mxu0 %v6060_v12  ;;  %6093 = vmatprep.subr.bf16.mxu1 %v6092_v27  ;;  %v6151_v26 = vpack.c.bf16 %v1812_v25, %v1811_v24  ;;  %v2308_v24 = vld [vmem:[#allocation11 + $0x110] sm:$0xff]  ;;  %v2309_v25 = vld [vmem:[#allocation11 + $0x118] sm:$0xff] }
 0x343   :  { %6063 = vmatpush3.bf16.msra.mxu0 %v6062_v16  ;;  %6095 = vmatpush3.bf16.msra.mxu1 %v6094_v30 }
 0x344   :  { %6096 = vmatprep.subr.bf16.mxu1 %v7069_v39  ;;  %6102 = vmatprep.subr.bf16.mxu0 %v7069_v39 }
 0x3f1   :  { %v5601_v31 = vpop.f32.mrb[16].mxu1  ;;  %v5590_v32 = vpop.f32.mrb[16].mxu0 }
 0x3f2   :  { %v1106_v33 = vpop.f32.mrb[17].mxu1  ;;  %v1022_v34 = vpop.f32.mrb[17].mxu0 }
 0x3f3   :  { %1411 = vmatprep.mubr.f32.mxu0 %v1106_v33 }
 0x3f4   :  { %1412 = vmatmul.mubr.f32.vlgmr.msra.gmra.mrb[20].mxu0 %v1022_v34 }
 0x3f5   :  { %1416 = vmatprep.mubr.f32.mxu0 %v5601_v31  ;;  %6104 = vmatpush3.bf16.msra.mxu0 %v7872_v43 }
 0x3f6   :  { %6105 = vmatprep.subr.bf16.mxu0 %v7069_v39 }
 0x3f8   :  { %1417 = vmatmul.mubr.f32.gmra.mrb[22].mxu0 %v5590_v32 }
 0x3f9   :  { %v5612_v35 = vpop.f32.mrb[18].mxu0  ;;  %v5623_v36 = vpop.f32.mrb[18].mxu1  ;;  %5670 = vmatprep.mubr.msk.f32.mxu0 %vm7070_vm2, %v7071_v40  ;;  %6107 = vmatpush3.bf16.msra.mxu0 %v7875_v46 }
 0x3fa   :  { %v1190_v37 = vpop.f32.mrb[19].mxu0  ;;  %v1274_v38 = vpop.f32.mrb[19].mxu1  ;;  %6108 = vmatprep.subr.bf16.mxu0 %v7069_v39 }
 0x3fb   :  { %1486 = vmatprep.mubr.f32.mxu1 %v1274_v38 }
 0x3fc   :  { %1487 = vmatmul.mubr.f32.vlgmr.msra.gmra.mrb[20].mxu1 %v1190_v37 }
 0x3fd   :  { %1491 = vmatprep.mubr.f32.mxu1 %v5623_v36  ;;  %6110 = vmatpush3.bf16.msra.mxu0 %v6109_v49  ;;  %v1804_v36 = vld [vmem:[%s8151_s26] sm:$0x1] }
 0x3fe   :  { %6111 = vmatprep.subr.bf16.mxu0 %v7069_v39 }
 0x400   :  { %1492 = vmatmul.mubr.f32.gmra.mrb[22].mxu1 %v5612_v35 }
 0x401   :  { %5628 = vmatprep.mubr.msk.f32.mxu1 %vm7070_vm2, %v7071_v40  ;;  %6113 = vmatpush3.bf16.msra.mxu0 %v6112_v52 }
 0x402   :  { %6114 = vmatprep.subr.bf16.mxu0 %v7069_v39 }
 0x405   :  { %6116 = vmatpush3.bf16.msra.mxu0 %v6115_v55 }
 0x406   :  { %6117 = vmatprep.subr.bf16.mxu0 %v7069_v39 }
 0x409   :  { %6119 = vmatpush3.bf16.msra.mxu0 %v6118_v58 }
 0x40a   :  { %6120 = vmatprep.subr.bf16.mxu0 %v7069_v39 }
 0x40d   :  { %6122 = vmatpush3.bf16.msra.mxu0 %v6121_v61 }
 0x40e   :  { %6123 = vmatprep.subr.bf16.mxu0 %v7069_v39 }
 0x411   :  { %6125 = vmatpush3.bf16.msra.mxu0 %v6124_v0 }
 0x412   :  { %6150 = vmatprep.subr.bf16.mxu0 %v7069_v39 }
 0x4c7   :  { %v5054_v1 = vpop.f32.mrb[20].mxu0 }
 0x4c8   :  { %v5055_v2 = vpop.f32.mrb[21].mxu0 }
 0x4c9   :  { %v5056_v3 = vadd.f32 %v5055_v2, %v5054_v1  ;;  %v2322_v1 = vld [vmem:[#allocation11 + $0x180] sm:$0xff]  ;;  %v2323_v2 = vld [vmem:[#allocation11 + $0x188] sm:$0xff] }
 0x4cb   :  { %v5057_v4 = vpop.f32.mrb[22].mxu0 }
 0x4cc   :  { %v5058_v5 = vpop.f32.mrb[23].mxu0 }
 0x4cd   :  { %v5059_v6 = vadd.f32 %v5058_v5, %v5057_v4  ;;  %v2274_v4 = vld [vmem:[#allocation11] sm:$0xff]  ;;  %v2275_v5 = vld [vmem:[#allocation11 + $0x8] sm:$0xff] }
 0x4cf   :  { %v5092_v7 = vpop.f32.mrb[20].mxu1 }
 0x4d0   :  { %v5093_v8 = vpop.f32.mrb[21].mxu1 }
 0x4d1   :  { %v5094_v9 = vadd.f32 %v5093_v8, %v5092_v7  ;;  %v2306_v7 = vld [vmem:[#allocation11 + $0x100] sm:$0xff]  ;;  %v2307_v8 = vld [vmem:[#allocation11 + $0x108] sm:$0xff] }
 0x4d3   :  { %v7886_v10 = vadd.f32 %v5094_v9, %v5056_v3  ;;  %v5095_v11 = vpop.f32.mrb[22].mxu1  ;;  %v1975_v3 = vld [vmem:[#allocation10] sm:$0xff] }
 0x4d4   :  { %v5096_v12 = vpop.f32.mrb[23].mxu1 }
 0x4d5   :  { %v5097_v13 = vadd.f32 %v5096_v12, %v5095_v11  ;;  %v1571_v17 = vmul.f32 %v7886_v10, %v7886_v10  ;;  %v2293_v11 = vld [vmem:[#allocation11 + $0x98] sm:$0xff]  ;;  %v2324_v12 = vld [vmem:[#allocation11 + $0x190] sm:$0xff] }
 0x4d7   :  { %v7888_v14 = vadd.f32 %v5097_v13, %v5059_v6  ;;  %v2292_v6 = vld [vmem:[#allocation11 + $0x90] sm:$0xff]  ;;  %v2325_v13 = vld [vmem:[#allocation11 + $0x198] sm:$0xff] }
 0x4d9   :  { %v6097_v15 = vpack.c.bf16 %v7888_v14, %v7886_v10  ;;  %v1572_v16 = vmul.f32 %v7888_v14, %v7888_v14 }
 0x4db   :  { %6098 = vmatpush3.bf16.msra.mxu1 %v6097_v15  ;;  %v6100_v18 = vpack.c.bf16 %v1572_v16, %v1571_v17  ;;  %v2125_v15 = vld [vmem:[#allocation10 + $0x10] sm:$0xff]  ;;  %v6170_v16 = vpack.c.bf16 %v2275_v5, %v2274_v4  ;;  %v6202_v17 = vpack.c.bf16 %v2307_v8, %v2306_v7  ;;  %v2285_v7 = vld [vmem:[#allocation11 + $0x58] sm:$0xff] }
 0x4dc   :  { %6099 = vmatprep.subr.bf16.mxu1 %v7069_v39 }
 0x4de   :  { %5629 = vmatmul.mubr.msk.f32.vlgmr.msra.gmra.mrb[24].mxu1 %vm1497_vm3, %v7072_v19 }
 0x4df   :  { %6101 = vmatpush3.bf16.msra.mxu1 %v6100_v18  ;;  %5635 = vmatprep.mubr.msk.f32.mxu1 %vm7070_vm2, %v7071_v40  ;;  %v2276_v18 = vld [vmem:[#allocation11 + $0x10] sm:$0xff] }
 0x4e0   :  { %6126 = vmatprep.subr.bf16.mxu1 %v7069_v39 }
 0x4e2   :  { %5636 = vmatmul.mubr.msk.f32.vlgmr.msra.gmra.mrb[26].mxu1 %vm1497_vm3, %v7072_v19 }
 0x4e3   :  { %6128 = vmatpush3.bf16.msra.mxu1 %v7872_v43  ;;  %5705 = vmatprep.mubr.msk.f32.mxu1 %vm7070_vm2, %v7071_v40 }
 0x4e4   :  { %6129 = vmatprep.subr.bf16.mxu1 %v7069_v39 }
 0x4e7   :  { %6131 = vmatpush3.bf16.msra.mxu1 %v7875_v46  ;;  %v7934_v46 = vsub.s32 0, %v1960_v45  ;;  %v2280_v45 = vld [vmem:[#allocation11 + $0x30] sm:$0xff] }
 0x4e8   :  { %6132 = vmatprep.subr.bf16.mxu1 %v7069_v39 }
 0x4eb   :  { %6134 = vmatpush3.bf16.msra.mxu1 %v6109_v49 }
 0x4ec   :  { %6135 = vmatprep.subr.bf16.mxu1 %v7069_v39 }
 0x4ef   :  { %6137 = vmatpush3.bf16.msra.mxu1 %v6112_v52 }
 0x4f0   :  { %6138 = vmatprep.subr.bf16.mxu1 %v7069_v39 }
 0x4f3   :  { %6140 = vmatpush3.bf16.msra.mxu1 %v6115_v55 }
 0x4f4   :  { %6141 = vmatprep.subr.bf16.mxu1 %v7069_v39 }
 0x4f7   :  { %6143 = vmatpush3.bf16.msra.mxu1 %v6118_v58 }
 0x4f8   :  { %6144 = vmatprep.subr.bf16.mxu1 %v7069_v39 }
 0x4fb   :  { %6146 = vmatpush3.bf16.msra.mxu1 %v6121_v61 }
 0x4fc   :  { %6147 = vmatprep.subr.bf16.mxu1 %v7069_v39 }
 0x4ff   :  { %6149 = vmatpush3.bf16.msra.mxu1 %v6124_v0  ;;  %v2291_v0 = vld [vmem:[#allocation11 + $0x88] sm:$0xff] }
 0x500   :  { %6153 = vmatprep.subr.bf16.mxu1 %v7069_v39  ;;  %v6168_v9 = vpack.c.bf16 %v2291_v0, %v2290_v63  ;;  %v2314_v63 = vld [vmem:[#allocation11 + $0x140] sm:$0xff]  ;;  %v2315_v0 = vld [vmem:[#allocation11 + $0x148] sm:$0xff] }
 0x501   :  { %v6218_v5 = vpack.c.bf16 %v2315_v0, %v2314_v63  ;;  %v2626_v0 = vld [vmem:[#allocation13 + $0x20] sm:$0xff] }
 0x5b1   :  { %v1567_v20 = vpop.f32.mrb[24].mxu1 }
 0x5b2   :  { %v5630_v21 = vpop.f32.mrb[25].mxu1  ;;  %5671 = vmatmul.mubr.f32.vlgmr.msra.gmra.mrb[24].mxu0 %v1567_v20  ;;  %v2277_v20 = vld [vmem:[#allocation11 + $0x18] sm:$0xff] }
 0x5b3   :  { %5712 = vmatprep.mubr.msk.f32.mxu0 %vm7070_vm2, %v7071_v40  ;;  %6152 = vmatpush3.bf16.msra.mxu0 %v6151_v26  ;;  %v6172_v21 = vpack.c.bf16 %v2293_v11, %v2292_v6  ;;  %v2284_v6 = vld [vmem:[#allocation11 + $0x50] sm:$0xff] }
 0x5b4   :  { %6156 = vmatprep.subr.bf16.mxu0 %v7069_v39  ;;  %v2316_v11 = vld [vmem:[#allocation11 + $0x150] sm:$0xff] }
 0x5b5   :  { %v1639_v22 = vpop.f32.mrb[26].mxu1 }
 0x5b6   :  { %5706 = vmatmul.mubr.f32.vlgmr.msra.gmra.mrb[28].mxu1 %v1639_v22  ;;  %v5637_v23 = vpop.f32.mrb[27].mxu1  ;;  %v6204_v22 = vpack.c.bf16 %v2325_v13, %v2324_v12  ;;  %v2317_v12 = vld [vmem:[#allocation11 + $0x158] sm:$0xff]  ;;  %v2303_v13 = vld [vmem:[#allocation11 + $0xe8] sm:$0xff] }
 0x5b7   :  { %5719 = vmatprep.mubr.msk.f32.mxu1 %vm7070_vm2, %v7071_v40  ;;  %6155 = vmatpush3.bf16.msra.mxu1 %v6151_v26  ;;  %v2294_v23 = vld [vmem:[#allocation11 + $0xa0] sm:$0xff]  ;;  %v2295_v26 = vld [vmem:[#allocation11 + $0xa8] sm:$0xff] }
 0x5b8   :  { %6159 = vmatprep.subr.bf16.mxu1 %v7069_v39 }
 0x685   :  { %v1725_v27 = vpop.f32.mrb[24].mxu0 }
 0x686   :  { %v1800_v28 = vmul.f32 0.0078125, %v1725_v27  ;;  %v5672_v29 = vpop.f32.mrb[25].mxu0  ;;  %v2326_v27 = vld [vmem:[#allocation11 + $0x1a0] sm:$0xff] }
 0x687   :  { %v6174_v29 = vpack.c.bf16 %v2277_v20, %v2276_v18  ;;  %v2286_v18 = vld [vmem:[#allocation11 + $0x60] sm:$0xff] }
 0x688   :  { %v1802_v31 = vmul.f32 %v1800_v28, %v1800_v28 }
 0x689   :  { %v1795_v30 = vpop.f32.mrb[28].mxu1 }
 0x68a   :  { %v1801_v32 = vmul.f32 0.0078125, %v1795_v30  ;;  %v5707_v33 = vpop.f32.mrb[29].mxu1  ;;  %v6206_v30 = vpack.c.bf16 %v2309_v25, %v2308_v24  ;;  %v2319_v24 = vld [vmem:[#allocation11 + $0x168] sm:$0xff]  ;;  %v2304_v25 = vld [vmem:[#allocation11 + $0xf0] sm:$0xff] }
 0x68b   :  { %v6176_v33 = vpack.c.bf16 %v2295_v26, %v2294_v23  ;;  %v2318_v23 = vld [vmem:[#allocation11 + $0x160] sm:$0xff]  ;;  %v2305_v26 = vld [vmem:[#allocation11 + $0xf8] sm:$0xff] }
 0x68c   :  { %v1803_v34 = vsub.f32 %v1801_v32, %v1802_v31  ;;  %v2278_v31 = vld [vmem:[#allocation11 + $0x20] sm:$0xff]  ;;  %v2279_v32 = vld [vmem:[#allocation11 + $0x28] sm:$0xff] }
 0x68e   :  { %v1805_v35 = vadd.f32 1e-05, %v1803_v34 }
 0x690   :  { %6672 = vrsqrt.f32 %v1805_v35  ;;  %v2296_v35 = vld [vmem:[#allocation11 + $0xb0] sm:$0xff] }
 0x69a   :  { %v6673_v37 = vpop.eup %6672 }
 0x69b   :  { %v1807_v38 = vmul.f32 %v6673_v37, %v1804_v36  ;;  %v2310_v36 = vld [vmem:[#allocation11 + $0x120] sm:$0xff]  ;;  %v2311_v37 = vld [vmem:[#allocation11 + $0x128] sm:$0xff] }
 0x69c   :  { %v6210_v44 = vpack.c.bf16 %v2311_v37, %v2310_v36  ;;  %v2320_v36 = vld [vmem:[#allocation11 + $0x170] sm:$0xff]  ;;  %v2321_v37 = vld [vmem:[#allocation11 + $0x178] sm:$0xff] }
 0x69d   :  { %5713 = vmatmul.mubr.msk.f32.vlgmr.msra.gmra.mrb[26].mxu0 %vm1497_vm3, %v1807_v38  ;;  %v1809_v42 = vmul.f32 %v1807_v38, %v1800_v28  ;;  %v2327_v28 = vld [vmem:[#allocation11 + $0x1a8] sm:$0xff]  ;;  %v2297_v38 = vld [vmem:[#allocation11 + $0xb8] sm:$0xff] }
 0x69e   :  { %5726 = vmatprep.mubr.msk.f32.mxu0 %vm7070_vm2, %v7071_v40  ;;  %v6208_v34 = vpack.c.bf16 %v2327_v28, %v2326_v27  ;;  %v6226_v28 = vpack.c.bf16 %v2319_v24, %v2318_v23  ;;  %v2790_v23 = vld [vmem:[#allocation14] sm:$0xff]  ;;  %v2791_v24 = vld [vmem:[#allocation14 + $0x8] sm:$0xff] }
 0x69f   :  { %v1810_v43 = vsub.f32 %v1808_v41, %v1809_v42  ;;  %v2328_v41 = vld [vmem:[#allocation11 + $0x1b0] sm:$0xff]  ;;  %v2329_v42 = vld [vmem:[#allocation11 + $0x1b8] sm:$0xff] }
 0x6a1   :  { %5720 = vmatmul.mubr.msk.f32.vlgmr.msra.gmra.mrb[30].mxu1 %vm1497_vm3, %v1810_v43  ;;  %v6178_v43 = vpack.c.bf16 %v2279_v32, %v2278_v31  ;;  %v2289_v31 = vld [vmem:[#allocation11 + $0x78] sm:$0xff] }
 0x6a2   :  { %5733 = vmatprep.mubr.msk.f32.mxu1 %vm7070_vm2, %v7071_v40 }
 0x770   :  { %v1882_v47 = vpop.f32.mrb[26].mxu0 }
 0x771   :  { %v1962_v48 = vrot.slane %v1882_v47, %v7934_v46  ;;  %v5714_v49 = vpop.f32.mrb[27].mxu0  ;;  %v2281_v47 = vld [vmem:[#allocation11 + $0x38] sm:$0xff] }
 0x772   :  { %v6212_v49 = vpack.c.bf16 %v2329_v42, %v2328_v41 }
 0x773   :  { %v1963_v51 = vmul.f32 %v1962_v48, %v7886_v10  ;;  %v1964_v52 = vmul.f32 %v1962_v48, %v7888_v14  ;;  %v6200_v10 = vpack.c.bf16 %v2323_v2, %v2322_v1  ;;  %v2200_v14 = vld [vmem:[#allocation10 + $0x18] sm:$0xff]  ;;  %v6180_v48 = vpack.c.bf16 %v2297_v38, %v2296_v35  ;;  %v2332_v2 = vld [vmem:[#allocation11 + $0x1d0] sm:$0xff] }
 0x774   :  { %v1955_v50 = vpop.f32.mrb[30].mxu1  ;;  %v2301_v1 = vld [vmem:[#allocation11 + $0xd8] sm:$0xff]  ;;  %v6230_v38 = vpack.c.bf16 %v2321_v37, %v2320_v36 }
 0x775   :  { %v1968_v53 = vrot.slane %v1955_v50, %v7934_v46  ;;  %v5721_v54 = vpop.f32.mrb[31].mxu1  ;;  %v2298_v50 = vld [vmem:[#allocation11 + $0xc0] sm:$0xff] }
 0x776   :  { %v2330_v54 = vld [vmem:[#allocation11 + $0x1c0] sm:$0xff] }
 0x777   :  { %v1969_v55 = vadd.f32 %v1968_v53, %v1963_v51  ;;  %v1970_v56 = vadd.f32 %v1968_v53, %v1964_v52  ;;  %v2312_v51 = vld [vmem:[#allocation11 + $0x130] sm:$0xff]  ;;  %v2313_v52 = vld [vmem:[#allocation11 + $0x138] sm:$0xff]  ;;  %v2299_v53 = vld [vmem:[#allocation11 + $0xc8] sm:$0xff] }
 0x779   :  { %v1971_v57 = vmul.f32 0.2, %v1969_v55  ;;  %v1972_v58 = vmul.f32 0.2, %v1970_v56 }
 0x77b   :  { %v1973_v59 = vmax.f32 %v1969_v55, %v1971_v57  ;;  %v1974_v60 = vmax.f32 %v1970_v56, %v1972_v58  ;;  %v2331_v55 = vld [vmem:[#allocation11 + $0x1c8] sm:$0xff]  ;;  %v6182_v56 = vpack.c.bf16 %v2281_v47, %v2280_v45  ;;  %v6214_v57 = vpack.c.bf16 %v2313_v52, %v2312_v51  ;;  %v2282_v58 = vld [vmem:[#allocation11 + $0x40] sm:$0xff] }
 0x77d   :  { %v6157_v61 = vpack.c.bf16 %v1974_v60, %v1973_v59  ;;  %v2283_v59 = vld [vmem:[#allocation11 + $0x48] sm:$0xff]  ;;  %v6184_v60 = vpack.c.bf16 %v2299_v53, %v2298_v50 }
 0x77e   :  { %v6186_v4 = vpack.c.bf16 %v2283_v59, %v2282_v58 }
 0x77f   :  { %6158 = vmatpush3.bf16.msra.mxu0 %v6157_v61  ;;  %6161 = vmatpush3.bf16.msra.mxu1 %v6157_v61 }
 0x780   :  { %6162 = vmatprep.subr.bf16.mxu0 %v7069_v39  ;;  %6165 = vmatprep.subr.bf16.mxu1 %v7069_v39 }
 0x782   :  { %5734 = vmatmul.mubr.msk.f32.vlgmr.msra.gmra.mrb[32].mxu1 %vm1497_vm3, %v2050_v62  ;;  %5727 = vmatmul.mubr.msk.f32.vlgmr.msra.gmra.mrb[28].mxu0 %vm1497_vm3, %v1975_v3  ;;  %v2300_v62 = vld [vmem:[#allocation11 + $0xd0] sm:$0xff]  ;;  %v2333_v3 = vld [vmem:[#allocation11 + $0x1d8] sm:$0xff] }
 0x783   :  { %6164 = vmatpush3.bf16.msra.mxu0 %v6157_v61  ;;  %6167 = vmatpush3.bf16.msra.mxu1 %v6157_v61  ;;  %v6216_v61 = vpack.c.bf16 %v2331_v55, %v2330_v54  ;;  %v6188_v8 = vpack.c.bf16 %v2301_v1, %v2300_v62  ;;  %v2622_v55 = vld [vmem:[#allocation13] sm:$0xff]  ;;  %v2627_v1 = vld [vmem:[#allocation13 + $0x28] sm:$0xff] }
 0x784   :  { %5747 = vmatprep.mubr.msk.f32.mxu1 %vm7070_vm2, %v7071_v40  ;;  %5740 = vmatprep.mubr.msk.f32.mxu0 %vm7070_vm2, %v7071_v40 }
 0x785   :  { %6169 = vmatprep.subr.bf16.mxu0 %v6168_v9  ;;  %6201 = vmatprep.subr.bf16.mxu1 %v6200_v10  ;;  %v6220_v9 = vpack.c.bf16 %v2333_v3, %v2332_v2  ;;  %v2302_v10 = vld [vmem:[#allocation11 + $0xe0] sm:$0xff]  ;;  %v6239_v2 = vpack.c.bf16 %v2627_v1, %v2626_v0  ;;  %v2628_v3 = vld [vmem:[#allocation13 + $0x30] sm:$0xff]  ;;  %v3258_v0 = vld [vmem:[#allocation17 + $0x38] sm:$0xff] }
 0x786   :  { %5748 = vmatmul.mubr.msk.f32.vlgmr.msra.gmra.mrb[34].mxu1 %vm1497_vm3, %v2200_v14  ;;  %5741 = vmatmul.mubr.msk.f32.vlgmr.msra.gmra.mrb[30].mxu0 %vm1497_vm3, %v2125_v15  ;;  %v2334_v14 = vld [vmem:[#allocation11 + $0x1e0] sm:$0xff]  ;;  %v2335_v15 = vld [vmem:[#allocation11 + $0x1e8] sm:$0xff]  ;;  %v6192_v20 = vpack.c.bf16 %v2303_v13, %v2302_v10  ;;  %v2633_v10 = vld [vmem:[#allocation13 + $0x58] sm:$0xff] }
 0x787   :  { %6171 = vmatpush3.bf16.msra.mxu0 %v6170_v16  ;;  %6203 = vmatpush3.bf16.msra.mxu1 %v6202_v17  ;;  %v6190_v16 = vpack.c.bf16 %v2285_v7, %v2284_v6  ;;  %v6222_v17 = vpack.c.bf16 %v2317_v12, %v2316_v11  ;;  %v2630_v6 = vld [vmem:[#allocation13 + $0x40] sm:$0xff]  ;;  %v2631_v7 = vld [vmem:[#allocation13 + $0x48] sm:$0xff]  ;;  %v3177_v1 = vld [vmem:[#allocation16 + $0x18] sm:$0x3f] }
 0x788   :  { %6173 = vmatprep.subr.bf16.mxu0 %v6172_v21  ;;  %6205 = vmatprep.subr.bf16.mxu1 %v6204_v22  ;;  %v2287_v21 = vld [vmem:[#allocation11 + $0x68] sm:$0xff]  ;;  %v6224_v22 = vpack.c.bf16 %v2335_v15, %v2334_v14  ;;  %v2634_v12 = vld [vmem:[#allocation13 + $0x60] sm:$0xff]  ;;  %v2636_v15 = vld [vmem:[#allocation13 + $0x70] sm:$0xff] }
 0x789   :  { %v6194_v27 = vpack.c.bf16 %v2287_v21, %v2286_v18  ;;  %v2635_v13 = vld [vmem:[#allocation13 + $0x68] sm:$0xff] }
 0x78a   :  { %v6251_v14 = vpack.c.bf16 %v2635_v13, %v2634_v12  ;;  %v3261_v12 = vld [vmem:[#allocation17 + $0x50] sm:$0xff]  ;;  %v3264_v13 = vld [vmem:[#allocation17 + $0x68] sm:$0xff] }
 0x78b   :  { %6175 = vmatpush3.bf16.msra.mxu0 %v6174_v29  ;;  %6207 = vmatpush3.bf16.msra.mxu1 %v6206_v30  ;;  %v6196_v29 = vpack.c.bf16 %v2305_v26, %v2304_v25  ;;  %v2288_v30 = vld [vmem:[#allocation11 + $0x70] sm:$0xff]  ;;  %v6281_v26 = vpack.c.bf16 %v2791_v24, %v2790_v23  ;;  %v3267_v24 = vld [vmem:[#allocation17 + $0x80] sm:$0xff] }
 0x78c   :  { %6177 = vmatprep.subr.bf16.mxu0 %v6176_v33  ;;  %6209 = vmatprep.subr.bf16.mxu1 %v6208_v34  ;;  %v6198_v32 = vpack.c.bf16 %v2289_v31, %v2288_v30  ;;  %v2336_v33 = vld [vmem:[#allocation11 + $0x1f0] sm:$0xff]  ;;  %v2337_v34 = vld [vmem:[#allocation11 + $0x1f8] sm:$0xff] }
 0x78d   :  { %v6228_v35 = vpack.c.bf16 %v2337_v34, %v2336_v33  ;;  %v2792_v25 = vld [vmem:[#allocation14 + $0x10] sm:$0xff] }
 0x78f   :  { %6179 = vmatpush3.bf16.msra.mxu0 %v6178_v43  ;;  %6211 = vmatpush3.bf16.msra.mxu1 %v6210_v44 }
 0x790   :  { %6181 = vmatprep.subr.bf16.mxu0 %v6180_v48  ;;  %6213 = vmatprep.subr.bf16.mxu1 %v6212_v49 }
 0x793   :  { %6183 = vmatpush3.bf16.msra.mxu0 %v6182_v56  ;;  %6215 = vmatpush3.bf16.msra.mxu1 %v6214_v57  ;;  %v2623_v56 = vld [vmem:[#allocation13 + $0x8] sm:$0xff] }
 0x794   :  { %6185 = vmatprep.subr.bf16.mxu0 %v6184_v60  ;;  %6217 = vmatprep.subr.bf16.mxu1 %v6216_v61  ;;  %v6233_v59 = vpack.c.bf16 %v2623_v56, %v2622_v55  ;;  %v2624_v60 = vld [vmem:[#allocation13 + $0x10] sm:$0xff]  ;;  %v2625_v61 = vld [vmem:[#allocation13 + $0x18] sm:$0xff]  ;;  %v3027_v56 = vld [vmem:[#allocation16 + $0x8] sm:$0x3f] }
 0x795   :  { %v6236_v63 = vpack.c.bf16 %v2625_v61, %v2624_v60  ;;  %v2952_v60 = vld [vmem:[#allocation16] sm:$0x3f] }
 0x796   :  { %v3251_v61 = vld [vmem:[#allocation17] sm:$0xff] }
 0x797   :  { %6187 = vmatpush3.bf16.msra.mxu0 %v6186_v4  ;;  %6219 = vmatpush3.bf16.msra.mxu1 %v6218_v5  ;;  %v2629_v4 = vld [vmem:[#allocation13 + $0x38] sm:$0xff] }
 0x798   :  { %6189 = vmatprep.subr.bf16.mxu0 %v6188_v8  ;;  %6221 = vmatprep.subr.bf16.mxu1 %v6220_v9  ;;  %v6242_v5 = vpack.c.bf16 %v2629_v4, %v2628_v3  ;;  %v6245_v8 = vpack.c.bf16 %v2631_v7, %v2630_v6  ;;  %v2632_v9 = vld [vmem:[#allocation13 + $0x50] sm:$0xff]  ;;  %v3260_v7 = vld [vmem:[#allocation17 + $0x48] sm:$0xff] }
 0x799   :  { %v6248_v11 = vpack.c.bf16 %v2633_v10, %v2632_v9  ;;  %v3257_v6 = vld [vmem:[#allocation17 + $0x30] sm:$0xff] }
 0x79b   :  { %6191 = vmatpush3.bf16.msra.mxu0 %v6190_v16  ;;  %6223 = vmatpush3.bf16.msra.mxu1 %v6222_v17  ;;  %v2637_v16 = vld [vmem:[#allocation13 + $0x78] sm:$0xff] }
 0x79c   :  { %6193 = vmatprep.subr.bf16.mxu0 %v6192_v20  ;;  %6225 = vmatprep.subr.bf16.mxu1 %v6224_v22  ;;  %v6254_v17 = vpack.c.bf16 %v2637_v16, %v2636_v15 }
 0x79f   :  { %6195 = vmatpush3.bf16.msra.mxu0 %v6194_v27  ;;  %6227 = vmatpush3.bf16.msra.mxu1 %v6226_v28  ;;  %v2793_v27 = vld [vmem:[#allocation14 + $0x18] sm:$0xff] }
 0x7a0   :  { %6197 = vmatprep.subr.bf16.mxu0 %v6196_v29  ;;  %6229 = vmatprep.subr.bf16.mxu1 %v6228_v35  ;;  %v6284_v28 = vpack.c.bf16 %v2793_v27, %v2792_v25  ;;  %v3269_v25 = vld [vmem:[#allocation17 + $0x90] sm:$0xff]  ;;  %v3274_v27 = vld [vmem:[#allocation17 + $0xb8] sm:$0xff] }
 0x7a3   :  { %6199 = vmatpush3.bf16.msra.mxu0 %v6198_v32  ;;  %6231 = vmatpush3.bf16.msra.mxu1 %v6230_v38 }
 0x7a4   :  { %5750 = vmatprep.subr.mxu0 %v7071_v40  ;;  %5755 = vmatprep.subr.mxu1 %v7071_v40 }
 0x855   :  { %v2120_v41 = vpop.f32.mrb[32].mxu1  ;;  %v2045_v42 = vpop.f32.mrb[28].mxu0 }
 0x856   :  { %v5735_v43 = vpop.f32.mrb[33].mxu1  ;;  %2402 = vmatprep.mubr.f32.mxu0 %v2120_v41  ;;  %v5728_v44 = vpop.f32.mrb[29].mxu0 }
 0x857   :  { %2403 = vmatmul.mubr.f32.vlgmr.msra.gmra.mrb[32].mxu0 %v2045_v42  ;;  %v2787_v42 = vld [vmem:[%s8110_s13] sm:$0x1] }
 0x858   :  { %5752 = vmatprep.mubr.msk.f32.mxu0 %vm7070_vm2, %v7071_v40 }
 0x859   :  { %v2270_v45 = vpop.f32.mrb[34].mxu1  ;;  %v2195_v47 = vpop.f32.mrb[30].mxu0 }
 0x85a   :  { %2472 = vmatprep.mubr.f32.mxu1 %v2270_v45  ;;  %v5749_v48 = vpop.f32.mrb[35].mxu1  ;;  %v5742_v49 = vpop.f32.mrb[31].mxu0 }
 0x85b   :  { %2473 = vmatmul.mubr.f32.vlgmr.msra.gmra.mrb[36].mxu1 %v2195_v47 }
 0x85c   :  { %5757 = vmatprep.mubr.msk.f32.mxu1 %vm7070_vm2, %v7071_v40 }
 0x92a   :  { %v5188_v50 = vpop.f32.mrb[32].mxu0 }
 0x92b   :  { %v5189_v51 = vpop.f32.mrb[33].mxu0 }
 0x92c   :  { %v5190_v52 = vadd.f32 %v5189_v51, %v5188_v50 }
 0x92e   :  { %v5223_v53 = vpop.f32.mrb[36].mxu1 }
 0x92f   :  { %v5224_v54 = vpop.f32.mrb[37].mxu1 }
 0x930   :  { %v5225_v57 = vadd.f32 %v5224_v54, %v5223_v53 }
 0x932   :  { %v7956_v58 = vadd.f32 %v5225_v57, %v5190_v52  ;;  %v3252_v57 = vld [vmem:[#allocation17 + $0x8] sm:$0xff] }
 0x934   :  { %v2551_v62 = vmul.f32 %v7956_v58, %v7956_v58  ;;  %5751 = vmatpush3.msra.mxu0 %v7956_v58 }
 0x935   :  { %5753 = vmatmul.mubr.msk.f32.vlgmr.msra.gmra.mrb[34].mxu0 %vm2478_vm4, %v7072_v19  ;;  %6232 = vmatprep.subr.bf16.mxu0 %v7069_v39 }
 0x936   :  { %5756 = vmatpush3.msra.mxu1 %v2551_v62  ;;  %6234 = vmatpush3.bf16.msra.mxu0 %v6233_v59  ;;  %v3253_v62 = vld [vmem:[#allocation17 + $0x10] sm:$0xff] }
 0x937   :  { %5758 = vmatmul.mubr.msk.f32.vlgmr.msra.gmra.mrb[38].mxu1 %vm2478_vm4, %v7072_v19  ;;  %6256 = vmatprep.subr.bf16.mxu1 %v7069_v39  ;;  %v6294_v3 = vpack.c.bf16 %v3253_v62, %v3251_v61 }
 0x938   :  { %6258 = vmatpush3.bf16.msra.mxu1 %v6233_v59  ;;  %6235 = vmatprep.subr.bf16.mxu0 %v7069_v39  ;;  %v3254_v59 = vld [vmem:[#allocation17 + $0x18] sm:$0xff] }
 0x939   :  { %6259 = vmatprep.subr.bf16.mxu1 %v7069_v39  ;;  %5792 = vmatprep.mubr.msk.f32.mxu0 %vm7070_vm2, %v7071_v40 }
 0x93a   :  { %6237 = vmatpush3.bf16.msra.mxu0 %v6236_v63  ;;  %5827 = vmatprep.mubr.msk.f32.mxu1 %vm7070_vm2, %v7071_v40 }
 0x93b   :  { %6238 = vmatprep.subr.bf16.mxu0 %v7069_v39 }
 0x93c   :  { %6261 = vmatpush3.bf16.msra.mxu1 %v6236_v63  ;;  %v6292_v63 = vpack.c.bf16 %v3254_v59, %v3252_v57  ;;  %v3289_v57 = vld [vmem:[#allocation17 + $0x130] sm:$0xff]  ;;  %v3292_v59 = vld [vmem:[#allocation17 + $0x148] sm:$0xff] }
 0x93d   :  { %6262 = vmatprep.subr.bf16.mxu1 %v7069_v39 }
 0x93e   :  { %6240 = vmatpush3.bf16.msra.mxu0 %v6239_v2 }
 0x93f   :  { %6241 = vmatprep.subr.bf16.mxu0 %v7069_v39 }
 0x940   :  { %6264 = vmatpush3.bf16.msra.mxu1 %v6239_v2  ;;  %v3102_v2 = vld [vmem:[#allocation16 + $0x10] sm:$0x3f] }
 0x941   :  { %6265 = vmatprep.subr.bf16.mxu1 %v7069_v39 }
 0x942   :  { %6243 = vmatpush3.bf16.msra.mxu0 %v6242_v5 }
 0x943   :  { %6244 = vmatprep.subr.bf16.mxu0 %v7069_v39 }
 0x944   :  { %6267 = vmatpush3.bf16.msra.mxu1 %v6242_v5  ;;  %v3255_v5 = vld [vmem:[#allocation17 + $0x20] sm:$0xff] }
 0x945   :  { %6268 = vmatprep.subr.bf16.mxu1 %v7069_v39  ;;  %v6298_v9 = vpack.c.bf16 %v3257_v6, %v3255_v5  ;;  %v3297_v5 = vld [vmem:[#allocation17 + $0x170] sm:$0xff]  ;;  %v3300_v6 = vld [vmem:[#allocation17 + $0x188] sm:$0xff] }
 0x946   :  { %6246 = vmatpush3.bf16.msra.mxu0 %v6245_v8 }
 0x947   :  { %6247 = vmatprep.subr.bf16.mxu0 %v7069_v39 }
 0x948   :  { %6270 = vmatpush3.bf16.msra.mxu1 %v6245_v8  ;;  %v3262_v8 = vld [vmem:[#allocation17 + $0x58] sm:$0xff] }
 0x949   :  { %6271 = vmatprep.subr.bf16.mxu1 %v7069_v39  ;;  %v6300_v10 = vpack.c.bf16 %v3262_v8, %v3260_v7  ;;  %v3302_v7 = vld [vmem:[#allocation17 + $0x198] sm:$0xff] }
 0x94a   :  { %6249 = vmatpush3.bf16.msra.mxu0 %v6248_v11 }
 0x94b   :  { %6250 = vmatprep.subr.bf16.mxu0 %v7069_v39 }
 0x94c   :  { %6273 = vmatpush3.bf16.msra.mxu1 %v6248_v11  ;;  %v3259_v11 = vld [vmem:[#allocation17 + $0x40] sm:$0xff] }
 0x94d   :  { %6274 = vmatprep.subr.bf16.mxu1 %v7069_v39  ;;  %v6302_v15 = vpack.c.bf16 %v3261_v12, %v3259_v11  ;;  %v3301_v11 = vld [vmem:[#allocation17 + $0x190] sm:$0xff]  ;;  %v3304_v12 = vld [vmem:[#allocation17 + $0x1a8] sm:$0xff] }
 0x94e   :  { %6252 = vmatpush3.bf16.msra.mxu0 %v6251_v14 }
 0x94f   :  { %6253 = vmatprep.subr.bf16.mxu0 %v7069_v39 }
 0x950   :  { %6276 = vmatpush3.bf16.msra.mxu1 %v6251_v14  ;;  %v3266_v14 = vld [vmem:[#allocation17 + $0x78] sm:$0xff] }
 0x951   :  { %6277 = vmatprep.subr.bf16.mxu1 %v7069_v39  ;;  %v6304_v16 = vpack.c.bf16 %v3266_v14, %v3264_v13  ;;  %v3306_v13 = vld [vmem:[#allocation17 + $0x1b8] sm:$0xff] }
 0x952   :  { %6255 = vmatpush3.bf16.msra.mxu0 %v6254_v17 }
 0x953   :  { %6280 = vmatprep.subr.bf16.mxu0 %v7069_v39 }
 0x954   :  { %6279 = vmatpush3.bf16.msra.mxu1 %v6254_v17  ;;  %v3263_v17 = vld [vmem:[#allocation17 + $0x60] sm:$0xff] }
 0x955   :  { %6286 = vmatprep.subr.bf16.mxu1 %v7069_v39 }
 0xa08   :  { %v2547_v18 = vpop.f32.mrb[34].mxu0 }
 0xa09   :  { %5793 = vmatmul.mubr.f32.vlgmr.msra.gmra.mrb[36].mxu0 %v2547_v18  ;;  %v5754_v20 = vpop.f32.mrb[35].mxu0  ;;  %v3265_v18 = vld [vmem:[#allocation17 + $0x70] sm:$0xff] }
 0xa0a   :  { %v2618_v21 = vpop.f32.mrb[38].mxu1  ;;  %5838 = vmatprep.mubr.msk.f32.mxu0 %vm7070_vm2, %v7071_v40  ;;  %6282 = vmatpush3.bf16.msra.mxu0 %v6281_v26  ;;  %v3268_v20 = vld [vmem:[#allocation17 + $0x88] sm:$0xff] }
 0xa0b   :  { %5828 = vmatmul.mubr.f32.vlgmr.msra.gmra.mrb[40].mxu1 %v2618_v21  ;;  %v5759_v22 = vpop.f32.mrb[39].mxu1  ;;  %6283 = vmatprep.subr.bf16.mxu0 %v7069_v39  ;;  %v3270_v21 = vld [vmem:[#allocation17 + $0x98] sm:$0xff] }
 0xa0c   :  { %5849 = vmatprep.mubr.msk.f32.mxu1 %vm7070_vm2, %v7071_v40  ;;  %6288 = vmatpush3.bf16.msra.mxu1 %v6281_v26  ;;  %v6306_v22 = vpack.c.bf16 %v3265_v18, %v3263_v17  ;;  %v6308_v23 = vpack.c.bf16 %v3270_v21, %v3268_v20  ;;  %v3272_v26 = vld [vmem:[#allocation17 + $0xa8] sm:$0xff]  ;;  %v3305_v17 = vld [vmem:[#allocation17 + $0x1b0] sm:$0xff]  ;;  %v3310_v20 = vld [vmem:[#allocation17 + $0x1d8] sm:$0xff] }
 0xa0d   :  { %6289 = vmatprep.subr.bf16.mxu1 %v7069_v39  ;;  %v2783_v39 = vld [vmem:[%s8109_s12] sm:$0x1]  ;;  %v3308_v18 = vld [vmem:[#allocation17 + $0x1c8] sm:$0xff] }
 0xa0e   :  { %6285 = vmatpush3.bf16.msra.mxu0 %v6284_v28 }
 0xa0f   :  { %5852 = vmatprep.subr.mxu0 %v7071_v40 }
 0xa10   :  { %6291 = vmatpush3.bf16.msra.mxu1 %v6284_v28  ;;  %v6310_v28 = vpack.c.bf16 %v3269_v25, %v3267_v24  ;;  %v3309_v24 = vld [vmem:[#allocation17 + $0x1d0] sm:$0xff]  ;;  %v3312_v25 = vld [vmem:[#allocation17 + $0x1e8] sm:$0xff] }
 0xa11   :  { %5857 = vmatprep.subr.mxu1 %v7071_v40 }
 0xadc   :  { %v2704_v29 = vpop.f32.mrb[36].mxu0 }
 0xadd   :  { %v2779_v30 = vmul.f32 0.03125, %v2704_v29  ;;  %v5794_v31 = vpop.f32.mrb[37].mxu0  ;;  %v6312_v29 = vpack.c.bf16 %v3274_v27, %v3272_v26  ;;  %v3314_v26 = vld [vmem:[#allocation17 + $0x1f8] sm:$0xff] }
 0xade   :  { %v2774_v32 = vpop.f32.mrb[40].mxu1  ;;  %v3273_v31 = vld [vmem:[#allocation17 + $0xb0] sm:$0xff] }
 0xadf   :  { %v2781_v33 = vmul.f32 %v2779_v30, %v2779_v30  ;;  %v2780_v34 = vmul.f32 0.03125, %v2774_v32  ;;  %v5829_v35 = vpop.f32.mrb[41].mxu1  ;;  %v3276_v32 = vld [vmem:[#allocation17 + $0xc8] sm:$0xff] }
 0xae1   :  { %v2782_v36 = vsub.f32 %v2780_v34, %v2781_v33  ;;  %v3278_v33 = vld [vmem:[#allocation17 + $0xd8] sm:$0xff] }
 0xae2   :  { %v6316_v35 = vpack.c.bf16 %v3278_v33, %v3276_v32  ;;  %v3316_v32 = vld [vmem:[#allocation17 + $0x208] sm:$0xff]  ;;  %v3318_v33 = vld [vmem:[#allocation17 + $0x218] sm:$0xff] }
 0xae3   :  { %v2784_v37 = vadd.f32 1e-05, %v2782_v36  ;;  %v3275_v36 = vld [vmem:[#allocation17 + $0xc0] sm:$0xff] }
 0xae5   :  { %6674 = vrsqrt.f32 %v2784_v37  ;;  %v3277_v37 = vld [vmem:[#allocation17 + $0xd0] sm:$0xff] }
 0xaef   :  { %v6675_v38 = vpop.eup %6674 }
 0xaf0   :  { %v2786_v41 = vmul.f32 %v6675_v38, %v2783_v39  ;;  %v3280_v39 = vld [vmem:[#allocation17 + $0xe8] sm:$0xff]  ;;  %v3282_v38 = vld [vmem:[#allocation17 + $0xf8] sm:$0xff] }
 0xaf2   :  { %5839 = vmatmul.mubr.msk.f32.vlgmr.msra.gmra.mrb[38].mxu0 %vm949_vm1, %v2786_v41  ;;  %v2788_v43 = vmul.f32 %v2786_v41, %v2779_v30  ;;  %v3271_v30 = vld [vmem:[#allocation17 + $0xa0] sm:$0xff]  ;;  %v6318_v41 = vpack.c.bf16 %v3277_v37, %v3275_v36  ;;  %v3317_v36 = vld [vmem:[#allocation17 + $0x210] sm:$0xff]  ;;  %v3320_v37 = vld [vmem:[#allocation17 + $0x228] sm:$0xff] }
 0xaf3   :  { %5854 = vmatprep.mubr.msk.f32.mxu0 %vm7070_vm2, %v7071_v40  ;;  %v6314_v34 = vpack.c.bf16 %v3273_v31, %v3271_v30  ;;  %v3313_v30 = vld [vmem:[#allocation17 + $0x1f0] sm:$0xff] }
 0xaf4   :  { %v2789_v44 = vsub.f32 %v2787_v42, %v2788_v43  ;;  %v6320_v42 = vpack.c.bf16 %v3282_v38, %v3280_v39  ;;  %v3279_v43 = vld [vmem:[#allocation17 + $0xe0] sm:$0xff]  ;;  %v3322_v39 = vld [vmem:[#allocation17 + $0x238] sm:$0xff] }
 0xaf6   :  { %5850 = vmatmul.mubr.msk.f32.vlgmr.msra.gmra.mrb[42].mxu1 %vm949_vm1, %v2789_v44  ;;  %v3281_v44 = vld [vmem:[#allocation17 + $0xf0] sm:$0xff] }
 0xaf7   :  { %5859 = vmatprep.mubr.msk.f32.mxu1 %vm7070_vm2, %v7071_v40 }
 0xbc5   :  { %v2863_v45 = vpop.f32.mrb[38].mxu0 }
 0xbc6   :  { %v2943_v47 = vrot.slane %v2863_v45, %v7934_v46  ;;  %v5840_v48 = vpop.f32.mrb[39].mxu0  ;;  %v3284_v45 = vld [vmem:[#allocation17 + $0x108] sm:$0xff] }
 0xbc7   :  { %v6322_v48 = vpack.c.bf16 %v3281_v44, %v3279_v43  ;;  %v3319_v43 = vld [vmem:[#allocation17 + $0x220] sm:$0xff]  ;;  %v3321_v44 = vld [vmem:[#allocation17 + $0x230] sm:$0xff] }
 0xbc8   :  { %v2944_v50 = vmul.f32 %v2943_v47, %v7956_v58  ;;  %v3256_v58 = vld [vmem:[#allocation17 + $0x28] sm:$0xff]  ;;  %v3286_v47 = vld [vmem:[#allocation17 + $0x118] sm:$0xff] }
 0xbc9   :  { %v2936_v49 = vpop.f32.mrb[42].mxu1  ;;  %v6296_v4 = vpack.c.bf16 %v3258_v0, %v3256_v58  ;;  %v3293_v58 = vld [vmem:[#allocation17 + $0x150] sm:$0xff]  ;;  %v3296_v0 = vld [vmem:[#allocation17 + $0x168] sm:$0xff] }
 0xbca   :  { %v2948_v51 = vrot.slane %v2936_v49, %v7934_v46  ;;  %v5851_v52 = vpop.f32.mrb[43].mxu1  ;;  %v6324_v49 = vpack.c.bf16 %v3286_v47, %v3284_v45 }
 0xbcb   :  { %v3288_v52 = vld [vmem:[#allocation17 + $0x128] sm:$0xff] }
 0xbcc   :  { %v2949_v53 = vadd.f32 %v2948_v51, %v2944_v50  ;;  %v3283_v50 = vld [vmem:[#allocation17 + $0x100] sm:$0xff]  ;;  %v3285_v51 = vld [vmem:[#allocation17 + $0x110] sm:$0xff] }
 0xbce   :  { %v2950_v54 = vmul.f32 0.2, %v2949_v53 }
 0xbd0   :  { %v2951_v55 = vmax.f32 %v2949_v53, %v2950_v54  ;;  %v3290_v53 = vld [vmem:[#allocation17 + $0x138] sm:$0xff]  ;;  %v6326_v54 = vpack.c.bf16 %v3285_v51, %v3283_v50  ;;  %v6362_v51 = vpack.c.bf16 %v3321_v44, %v3319_v43  ;;  %v3355_v43 = vld [vmem:[#allocation17 + $0x340] sm:$0xff]  ;;  %v3357_v44 = vld [vmem:[#allocation17 + $0x350] sm:$0xff] }
 0xbd2   :  { %5853 = vmatpush3.msra.mxu0 %v2951_v55  ;;  %5858 = vmatpush3.msra.mxu1 %v2951_v55 }
 0xbd3   :  { %5860 = vmatmul.mubr.msk.f32.vlgmr.msra.gmra.mrb[44].mxu1 %vm2478_vm4, %v3027_v56  ;;  %5862 = vmatprep.subr.mxu0 %v7071_v40  ;;  %v3287_v56 = vld [vmem:[#allocation17 + $0x120] sm:$0xff] }
 0xbd4   :  { %5867 = vmatprep.subr.mxu1 %v7071_v40  ;;  %5855 = vmatmul.mubr.msk.f32.vlgmr.msra.gmra.mrb[40].mxu0 %vm2478_vm4, %v2952_v60  ;;  %v3294_v60 = vld [vmem:[#allocation17 + $0x158] sm:$0xff]  ;;  %v6330_v61 = vpack.c.bf16 %v3289_v57, %v3287_v56  ;;  %v3328_v56 = vld [vmem:[#allocation17 + $0x268] sm:$0xff] }
 0xbd5   :  { %5863 = vmatpush3.msra.mxu0 %v2951_v55  ;;  %5868 = vmatpush3.msra.mxu1 %v2951_v55  ;;  %v6328_v55 = vpack.c.bf16 %v3290_v53, %v3288_v52  ;;  %v6332_v62 = vpack.c.bf16 %v3294_v60, %v3292_v59  ;;  %v3323_v53 = vld [vmem:[#allocation17 + $0x240] sm:$0xff]  ;;  %v3330_v57 = vld [vmem:[#allocation17 + $0x278] sm:$0xff] }
 0xbd6   :  { %5869 = vmatprep.mubr.msk.f32.mxu1 %vm7070_vm2, %v7071_v40  ;;  %5864 = vmatprep.mubr.msk.f32.mxu0 %vm7070_vm2, %v7071_v40 }
 0xbd7   :  { %5870 = vmatmul.mubr.msk.f32.vlgmr.msra.gmra.mrb[46].mxu1 %vm2478_vm4, %v3177_v1  ;;  %6293 = vmatprep.subr.bf16.mxu0 %v6292_v63  ;;  %v3291_v63 = vld [vmem:[#allocation17 + $0x140] sm:$0xff]  ;;  %v3298_v1 = vld [vmem:[#allocation17 + $0x178] sm:$0xff] }
 0xbd8   :  { %5865 = vmatmul.mubr.msk.f32.vlgmr.msra.gmra.mrb[42].mxu0 %vm2478_vm4, %v3102_v2  ;;  %3595 = vmatprep.mubr.f32.mxu1 %v7071_v40  ;;  %v6334_v2 = vpack.c.bf16 %v3293_v58, %v3291_v63  ;;  %v6368_v63 = vpack.c.bf16 %v3330_v57, %v3328_v56  ;;  %v3327_v58 = vld [vmem:[#allocation17 + $0x260] sm:$0xff]  ;;  %v3365_v57 = vld [vmem:[#allocation17 + $0x390] sm:$0xff] }
 0xbd9   :  { %6295 = vmatpush1.bf16.msra.mxu0 %v6294_v3  ;;  %v6336_v3 = vpack.c.bf16 %v3298_v1, %v3296_v0  ;;  %v3329_v0 = vld [vmem:[#allocation17 + $0x270] sm:$0xff]  ;;  %v3332_v1 = vld [vmem:[#allocation17 + $0x288] sm:$0xff]  ;;  %v3363_v56 = vld [vmem:[#allocation17 + $0x380] sm:$0xff] }
 0xbda   :  { %6297 = vmatprep.subr.bf16.mxu0 %v6296_v4  ;;  %v3295_v4 = vld [vmem:[#allocation17 + $0x160] sm:$0xff] }
 0xbdb   :  { %v6338_v8 = vpack.c.bf16 %v3297_v5, %v3295_v4  ;;  %v3331_v5 = vld [vmem:[#allocation17 + $0x280] sm:$0xff] }
 0xbdd   :  { %6299 = vmatpush1.bf16.msra.mxu0 %v6298_v9  ;;  %v6340_v9 = vpack.c.bf16 %v3302_v7, %v3300_v6  ;;  %v3333_v6 = vld [vmem:[#allocation17 + $0x290] sm:$0xff]  ;;  %v3336_v7 = vld [vmem:[#allocation17 + $0x2a8] sm:$0xff] }
 0xbde   :  { %6301 = vmatprep.subr.bf16.mxu0 %v6300_v10  ;;  %v3299_v10 = vld [vmem:[#allocation17 + $0x180] sm:$0xff] }
 0xbdf   :  { %v6342_v14 = vpack.c.bf16 %v3301_v11, %v3299_v10  ;;  %v3335_v11 = vld [vmem:[#allocation17 + $0x2a0] sm:$0xff] }
 0xbe1   :  { %6303 = vmatpush1.bf16.msra.mxu0 %v6302_v15  ;;  %v6344_v15 = vpack.c.bf16 %v3306_v13, %v3304_v12  ;;  %v3337_v12 = vld [vmem:[#allocation17 + $0x2b0] sm:$0xff]  ;;  %v3340_v13 = vld [vmem:[#allocation17 + $0x2c8] sm:$0xff] }
 0xbe2   :  { %6305 = vmatprep.subr.bf16.mxu0 %v6304_v16  ;;  %v3303_v16 = vld [vmem:[#allocation17 + $0x1a0] sm:$0xff] }
 0xbe3   :  { %v6346_v21 = vpack.c.bf16 %v3305_v17, %v3303_v16  ;;  %v3339_v17 = vld [vmem:[#allocation17 + $0x2c0] sm:$0xff] }
 0xbe5   :  { %6307 = vmatpush1.bf16.msra.mxu0 %v6306_v22  ;;  %v6348_v22 = vpack.c.bf16 %v3310_v20, %v3308_v18  ;;  %v3341_v18 = vld [vmem:[#allocation17 + $0x2d0] sm:$0xff]  ;;  %v3344_v20 = vld [vmem:[#allocation17 + $0x2e8] sm:$0xff] }
 0xbe6   :  { %6309 = vmatprep.subr.bf16.mxu0 %v6308_v23  ;;  %v3307_v23 = vld [vmem:[#allocation17 + $0x1c0] sm:$0xff] }
 0xbe7   :  { %v6350_v27 = vpack.c.bf16 %v3309_v24, %v3307_v23  ;;  %v3343_v24 = vld [vmem:[#allocation17 + $0x2e0] sm:$0xff] }
 0xbe9   :  { %6311 = vmatpush1.bf16.msra.mxu0 %v6310_v28  ;;  %v6352_v28 = vpack.c.bf16 %v3314_v26, %v3312_v25  ;;  %v3345_v25 = vld [vmem:[#allocation17 + $0x2f0] sm:$0xff]  ;;  %v3348_v26 = vld [vmem:[#allocation17 + $0x308] sm:$0xff] }
 0xbea   :  { %6313 = vmatprep.subr.bf16.mxu0 %v6312_v29  ;;  %v3311_v29 = vld [vmem:[#allocation17 + $0x1e0] sm:$0xff] }
 0xbeb   :  { %v6354_v31 = vpack.c.bf16 %v3313_v30, %v3311_v29  ;;  %v3347_v30 = vld [vmem:[#allocation17 + $0x300] sm:$0xff] }
 0xbed   :  { %6315 = vmatpush1.bf16.msra.mxu0 %v6314_v34  ;;  %v6356_v34 = vpack.c.bf16 %v3318_v33, %v3316_v32  ;;  %v3352_v32 = vld [vmem:[#allocation17 + $0x328] sm:$0xff]  ;;  %v3354_v33 = vld [vmem:[#allocation17 + $0x338] sm:$0xff] }
 0xbee   :  { %6317 = vmatprep.subr.bf16.mxu0 %v6316_v35  ;;  %v3315_v35 = vld [vmem:[#allocation17 + $0x200] sm:$0xff] }
 0xbef   :  { %v6358_v38 = vpack.c.bf16 %v3317_v36, %v3315_v35  ;;  %v6392_v35 = vpack.c.bf16 %v3354_v33, %v3352_v32  ;;  %v3351_v36 = vld [vmem:[#allocation17 + $0x320] sm:$0xff] }
 0xbf0   :  { %v3685_v33 = vld [vmem:[#allocation19 + $0x20] sm:$0xff] }
 0xbf1   :  { %6319 = vmatpush1.bf16.msra.mxu0 %v6318_v41 }
 0xbf2   :  { %6321 = vmatprep.subr.bf16.mxu0 %v6320_v42  ;;  %v6360_v42 = vpack.c.bf16 %v3322_v39, %v3320_v37  ;;  %v3353_v37 = vld [vmem:[#allocation17 + $0x330] sm:$0xff]  ;;  %v3356_v39 = vld [vmem:[#allocation17 + $0x348] sm:$0xff] }
 0xbf5   :  { %6323 = vmatpush1.bf16.msra.mxu0 %v6322_v48  ;;  %v3324_v48 = vld [vmem:[#allocation17 + $0x248] sm:$0xff] }
 0xbf6   :  { %6325 = vmatprep.subr.bf16.mxu0 %v6324_v49  ;;  %v3326_v49 = vld [vmem:[#allocation17 + $0x258] sm:$0xff] }
 0xbf7   :  { %v6364_v52 = vpack.c.bf16 %v3326_v49, %v3324_v48  ;;  %v6398_v48 = vpack.c.bf16 %v3357_v44, %v3355_v43  ;;  %v3706_v43 = vld [vmem:[#allocation19 + $0xc8] sm:$0xff] }
 0xbf9   :  { %6327 = vmatpush1.bf16.msra.mxu0 %v6326_v54  ;;  %v3325_v54 = vld [vmem:[#allocation17 + $0x250] sm:$0xff] }
 0xbfa   :  { %6329 = vmatprep.subr.bf16.mxu0 %v6328_v55 }
 0xbfd   :  { %6331 = vmatpush1.bf16.msra.mxu0 %v6330_v61 }
 0xbfe   :  { %6333 = vmatprep.subr.bf16.mxu0 %v6332_v62  ;;  %v6366_v62 = vpack.c.bf16 %v3325_v54, %v3323_v53  ;;  %v3366_v53 = vld [vmem:[#allocation17 + $0x398] sm:$0xff] }
 0xc01   :  { %6335 = vmatpush1.bf16.msra.mxu0 %v6334_v2  ;;  %v3334_v2 = vld [vmem:[#allocation17 + $0x298] sm:$0xff] }
 0xc02   :  { %6337 = vmatprep.subr.bf16.mxu0 %v6336_v3  ;;  %v6370_v3 = vpack.c.bf16 %v3329_v0, %v3327_v58  ;;  %v6372_v4 = vpack.c.bf16 %v3334_v2, %v3332_v1  ;;  %v3367_v58 = vld [vmem:[#allocation17 + $0x3a0] sm:$0xff]  ;;  %v3369_v0 = vld [vmem:[#allocation17 + $0x3b0] sm:$0xff]  ;;  %v3372_v1 = vld [vmem:[#allocation17 + $0x3c8] sm:$0xff] }
 0xc03   :  { %v3374_v2 = vld [vmem:[#allocation17 + $0x3d8] sm:$0xff] }
 0xc05   :  { %6339 = vmatpush1.bf16.msra.mxu0 %v6338_v8  ;;  %v3338_v8 = vld [vmem:[#allocation17 + $0x2b8] sm:$0xff] }
 0xc06   :  { %6341 = vmatprep.subr.bf16.mxu0 %v6340_v9  ;;  %v6374_v9 = vpack.c.bf16 %v3333_v6, %v3331_v5  ;;  %v6376_v10 = vpack.c.bf16 %v3338_v8, %v3336_v7  ;;  %v3371_v5 = vld [vmem:[#allocation17 + $0x3c0] sm:$0xff]  ;;  %v3373_v6 = vld [vmem:[#allocation17 + $0x3d0] sm:$0xff]  ;;  %v3376_v7 = vld [vmem:[#allocation17 + $0x3e8] sm:$0xff] }
 0xc07   :  { %v3378_v8 = vld [vmem:[#allocation17 + $0x3f8] sm:$0xff] }
 0xc09   :  { %6343 = vmatpush1.bf16.msra.mxu0 %v6342_v14  ;;  %v3342_v14 = vld [vmem:[#allocation17 + $0x2d8] sm:$0xff] }
 0xc0a   :  { %6345 = vmatprep.subr.bf16.mxu0 %v6344_v15  ;;  %v6378_v15 = vpack.c.bf16 %v3337_v12, %v3335_v11  ;;  %v6380_v16 = vpack.c.bf16 %v3342_v14, %v3340_v13  ;;  %v3375_v11 = vld [vmem:[#allocation17 + $0x3e0] sm:$0xff]  ;;  %v3377_v12 = vld [vmem:[#allocation17 + $0x3f0] sm:$0xff] }
 0xc0b   :  { %v6418_v13 = vpack.c.bf16 %v3377_v12, %v3375_v11  ;;  %v3697_v14 = vld [vmem:[#allocation19 + $0x80] sm:$0xff]  ;;  %v3867_v12 = vld [vmem:[#allocation20 + $0x10] sm:$0xff] }
 0xc0c   :  { %v3865_v11 = vld [vmem:[#allocation20] sm:$0xff] }
 0xc0d   :  { %6347 = vmatpush1.bf16.msra.mxu0 %v6346_v21  ;;  %v3346_v21 = vld [vmem:[#allocation17 + $0x2f8] sm:$0xff] }
 0xc0e   :  { %6349 = vmatprep.subr.bf16.mxu0 %v6348_v22  ;;  %v6382_v22 = vpack.c.bf16 %v3341_v18, %v3339_v17  ;;  %v6384_v23 = vpack.c.bf16 %v3346_v21, %v3344_v20  ;;  %v3681_v21 = vld [vmem:[#allocation19] sm:$0xff] }
 0xc11   :  { %6351 = vmatpush1.bf16.msra.mxu0 %v6350_v27  ;;  %v3350_v27 = vld [vmem:[#allocation17 + $0x318] sm:$0xff] }
 0xc12   :  { %6353 = vmatprep.subr.bf16.mxu0 %v6352_v28  ;;  %v6386_v28 = vpack.c.bf16 %v3345_v25, %v3343_v24  ;;  %v6388_v29 = vpack.c.bf16 %v3350_v27, %v3348_v26  ;;  %v3700_v24 = vld [vmem:[#allocation19 + $0x98] sm:$0xff]  ;;  %v3683_v27 = vld [vmem:[#allocation19 + $0x10] sm:$0xff] }
 0xc15   :  { %6355 = vmatpush1.bf16.msra.mxu0 %v6354_v31  ;;  %v3349_v31 = vld [vmem:[#allocation17 + $0x310] sm:$0xff] }
 0xc16   :  { %6357 = vmatprep.subr.bf16.mxu0 %v6356_v34  ;;  %v6390_v34 = vpack.c.bf16 %v3349_v31, %v3347_v30  ;;  %v3702_v30 = vld [vmem:[#allocation19 + $0xa8] sm:$0xff] }
 0xca6   :  { %v3097_v41 = vpop.f32.mrb[44].mxu1 }
 0xca7   :  { %v3022_v45 = vpop.f32.mrb[40].mxu0  ;;  %3443 = vmatprep.mubr.f32.mxu0 %v3097_v41  ;;  %v5861_v47 = vpop.f32.mrb[45].mxu1  ;;  %v6394_v41 = vpack.c.bf16 %v3353_v37, %v3351_v36  ;;  %v3704_v36 = vld [vmem:[#allocation19 + $0xb8] sm:$0xff] }
 0xca8   :  { %3444 = vmatmul.mubr.f32.vlgmr.msra.gmra.mrb[44].mxu0 %v3022_v45  ;;  %v5856_v50 = vpop.f32.mrb[41].mxu0  ;;  %v3360_v45 = vld [vmem:[#allocation17 + $0x368] sm:$0xff]  ;;  %v3362_v47 = vld [vmem:[#allocation17 + $0x378] sm:$0xff] }
 0xca9   :  { %6359 = vmatpush1.bf16.msra.mxu0 %v6358_v38  ;;  %v3358_v38 = vld [vmem:[#allocation17 + $0x358] sm:$0xff]  ;;  %v6400_v49 = vpack.c.bf16 %v3362_v47, %v3360_v45  ;;  %v3359_v50 = vld [vmem:[#allocation17 + $0x360] sm:$0xff]  ;;  %v3690_v47 = vld [vmem:[#allocation19 + $0x48] sm:$0xff] }
 0xcaa   :  { %6361 = vmatprep.subr.bf16.mxu0 %v6360_v42  ;;  %v3247_v55 = vpop.f32.mrb[46].mxu1  ;;  %v6396_v42 = vpack.c.bf16 %v3358_v38, %v3356_v39  ;;  %v3687_v38 = vld [vmem:[#allocation19 + $0x30] sm:$0xff]  ;;  %v3689_v45 = vld [vmem:[#allocation19 + $0x40] sm:$0xff] }
 0xcab   :  { %v8021_v59 = vpop.f32.mrb[42].mxu0  ;;  %3514 = vmatprep.mubr.f32.mxu0 %v3247_v55  ;;  %v5871_v60 = vpop.f32.mrb[47].mxu1 }
 0xcac   :  { %v5866_v61 = vpop.f32.mrb[43].mxu0  ;;  %v3368_v60 = vld [vmem:[#allocation17 + $0x3a8] sm:$0xff] }
 0xcad   :  { %6363 = vmatpush1.bf16.msra.mxu0 %v6362_v51  ;;  %v3361_v51 = vld [vmem:[#allocation17 + $0x370] sm:$0xff]  ;;  %v3370_v61 = vld [vmem:[#allocation17 + $0x3b8] sm:$0xff] }
 0xcae   :  { %6365 = vmatprep.subr.bf16.mxu0 %v6364_v52  ;;  %v3364_v52 = vld [vmem:[#allocation17 + $0x388] sm:$0xff]  ;;  %v6402_v54 = vpack.c.bf16 %v3361_v51, %v3359_v50  ;;  %v6438_v50 = vpack.c.bf16 %v3690_v47, %v3689_v45  ;;  %v3858_v45 = vld [vmem:[%s8115_s18] sm:$0x1]  ;;  %s7073_s18 = smov [#allocation26]  }
 0xcaf   :  { %v6404_v55 = vpack.c.bf16 %v3366_v53, %v3364_v52  ;;  %v3691_v52 = vld [vmem:[#allocation19 + $0x50] sm:$0xff]  ;;  %v3692_v53 = vld [vmem:[#allocation19 + $0x58] sm:$0xff]  ;;  %s4784_s17 = sshll.u32 %s7073_s18, 4  ;;  %s4785_s17 = int_to_ptr.vmem [resolvable:$true] %s4784_s17 }
 0xcb0   :  { %s7008_s9 = scalar_lea.vmem %s4785_s17, 64  ;;  %p7013_p9 = scmp.lt.s32.totalorder %s4785_s17, %s4785_s17 }
 0xcb1   :  { %6367 = vmatpush1.bf16.msra.mxu0 %v6366_v62  ;;  %v6406_v62 = vpack.c.bf16 %v3365_v57, %v3363_v56  ;;  %v6442_v56 = vpack.c.bf16 %v3692_v53, %v3691_v52  ;;  %v4410_v52 = vld [vmem:[#allocation23 + $0x180] sm:$0xff]  ;;  %v4411_v53 = vld [vmem:[#allocation23 + $0x188] sm:$0xff]  ;;  %p7009_p8 = scmp.ne.s32.totalorder %s4785_s17, %s7008_s9  ;;  %p7014_p10 = scmp.lt.s32.totalorder %s7008_s9, %s7008_s9 }
 0xcb2   :  { %6369 = vmatprep.subr.bf16.mxu0 %v6368_v63  ;;  %v6408_v63 = vpack.c.bf16 %v3370_v61, %v3368_v60  ;;  %v3693_v60 = vld [vmem:[#allocation19 + $0x60] sm:$0xff]  ;;  %v3694_v61 = vld [vmem:[#allocation19 + $0x68] sm:$0xff] }
 0xcb3   :  { %p7015_p11 = por %p7014_p10, %p7013_p9 }
 0xcb5   :  { %6371 = vmatpush1.bf16.msra.mxu0 %v6370_v3  ;;  %v6410_v3 = vpack.c.bf16 %v3369_v0, %v3367_v58  ;;  %v6446_v58 = vpack.c.bf16 %v3694_v61, %v3693_v60  ;;  %v4412_v60 = vld [vmem:[#allocation23 + $0x190] sm:$0xff]  ;;  %v4413_v61 = vld [vmem:[#allocation23 + $0x198] sm:$0xff]  ;;  %p7016_p12 = pnand %p7015_p11, %p7009_p8 }
 0xcb6   :  { %6373 = vmatprep.subr.bf16.mxu0 %v6372_v4  ;;  %v6412_v4 = vpack.c.bf16 %v3374_v2, %v3372_v1  ;;  %v3695_v1 = vld [vmem:[#allocation19 + $0x70] sm:$0xff]  ;;  %v3696_v2 = vld [vmem:[#allocation19 + $0x78] sm:$0xff] }
 0xcb9   :  { %6375 = vmatpush1.bf16.msra.mxu0 %v6374_v9  ;;  %v6414_v9 = vpack.c.bf16 %v3373_v6, %v3371_v5 }
 0xcba   :  { %6377 = vmatprep.subr.bf16.mxu0 %v6376_v10  ;;  %v6416_v10 = vpack.c.bf16 %v3378_v8, %v3376_v7  ;;  %v3866_v8 = vld [vmem:[#allocation20 + $0x8] sm:$0xff] }
 0xcbd   :  { %6379 = vmatpush1.bf16.msra.mxu0 %v6378_v15  ;;  %v3698_v15 = vld [vmem:[#allocation19 + $0x88] sm:$0xff] }
 0xcbe   :  { %6381 = vmatprep.subr.bf16.mxu0 %v6380_v16  ;;  %v8032_v20 = vpack.c.bf16 %v3698_v15, %v3697_v14  ;;  %v3870_v14 = vld [vmem:[#allocation20 + $0x28] sm:$0xff]  ;;  %v3872_v15 = vld [vmem:[#allocation20 + $0x38] sm:$0xff] }
 0xcc1   :  { %6383 = vmatpush1.bf16.msra.mxu0 %v6382_v22  ;;  %v3682_v22 = vld [vmem:[#allocation19 + $0x8] sm:$0xff] }
 0xcc2   :  { %6385 = vmatprep.subr.bf16.mxu0 %v6384_v23  ;;  %v3699_v23 = vld [vmem:[#allocation19 + $0x90] sm:$0xff]  ;;  %v6422_v25 = vpack.c.bf16 %v3682_v22, %v3681_v21 }
 0xcc3   :  { %v6424_v26 = vpack.c.bf16 %v3700_v24, %v3699_v23  ;;  %v3871_v21 = vld [vmem:[#allocation20 + $0x30] sm:$0xff]  ;;  %v3876_v23 = vld [vmem:[#allocation20 + $0x58] sm:$0xff]  ;;  %v3873_v24 = vld [vmem:[#allocation20 + $0x40] sm:$0xff] }
 0xcc5   :  { %6387 = vmatpush1.bf16.msra.mxu0 %v6386_v28  ;;  %v3684_v28 = vld [vmem:[#allocation19 + $0x18] sm:$0xff] }
 0xcc6   :  { %6389 = vmatprep.subr.bf16.mxu0 %v6388_v29  ;;  %v3701_v29 = vld [vmem:[#allocation19 + $0xa0] sm:$0xff]  ;;  %v6426_v31 = vpack.c.bf16 %v3684_v28, %v3683_v27  ;;  %v3878_v27 = vld [vmem:[#allocation20 + $0x68] sm:$0xff]  ;;  %v3880_v28 = vld [vmem:[#allocation20 + $0x78] sm:$0xff] }
 0xcc7   :  { %v6428_v32 = vpack.c.bf16 %v3702_v30, %v3701_v29  ;;  %v6496_v30 = vpack.c.bf16 %v3880_v28, %v3878_v27  ;;  %v4422_v27 = vld [vmem:[#allocation23 + $0x1e0] sm:$0xff]  ;;  %v4423_v28 = vld [vmem:[#allocation23 + $0x1e8] sm:$0xff] }
 0xcc9   :  { %6391 = vmatpush1.bf16.msra.mxu0 %v6390_v34  ;;  %v3686_v34 = vld [vmem:[#allocation19 + $0x28] sm:$0xff] }
 0xcca   :  { %6393 = vmatprep.subr.bf16.mxu0 %v6392_v35  ;;  %v3703_v35 = vld [vmem:[#allocation19 + $0xb0] sm:$0xff]  ;;  %v6430_v37 = vpack.c.bf16 %v3686_v34, %v3685_v33 }
 0xccb   :  { %v6432_v39 = vpack.c.bf16 %v3704_v36, %v3703_v35 }
 0xccd   :  { %6395 = vmatpush1.bf16.msra.mxu0 %v6394_v41  ;;  %v3688_v41 = vld [vmem:[#allocation19 + $0x38] sm:$0xff] }
 0xcce   :  { %6397 = vmatprep.subr.bf16.mxu0 %v6396_v42  ;;  %v3705_v42 = vld [vmem:[#allocation19 + $0xc0] sm:$0xff]  ;;  %v6434_v44 = vpack.c.bf16 %v3688_v41, %v3687_v38 }
 0xcd1   :  { %6399 = vmatpush1.bf16.msra.mxu0 %v6398_v48  ;;  %v3707_v48 = vld [vmem:[#allocation19 + $0xd0] sm:$0xff] }
 0xcd2   :  { %6401 = vmatprep.subr.bf16.mxu0 %v6400_v49  ;;  %v3708_v49 = vld [vmem:[#allocation19 + $0xd8] sm:$0xff] }
 0xcd3   :  { %v6440_v51 = vpack.c.bf16 %v3708_v49, %v3707_v48 }
 0xcd5   :  { %6403 = vmatpush1.bf16.msra.mxu0 %v6402_v54  ;;  %v3709_v54 = vld [vmem:[#allocation19 + $0xe0] sm:$0xff] }
 0xcd6   :  { %6405 = vmatprep.subr.bf16.mxu0 %v6404_v55  ;;  %v3710_v55 = vld [vmem:[#allocation19 + $0xe8] sm:$0xff] }
 0xcd7   :  { %v6444_v57 = vpack.c.bf16 %v3710_v55, %v3709_v54  ;;  %v6548_v54 = vpack.c.bf16 %v4411_v53, %v4410_v52  ;;  %v4394_v55 = vld [vmem:[#allocation23 + $0x100] sm:$0xff] }
 0xcd8   :  { %v4362_v53 = vld [vmem:[#allocation23] sm:$0xff] }
 0xcd9   :  { %6407 = vmatpush1.bf16.msra.mxu0 %v6406_v62  ;;  %v3711_v62 = vld [vmem:[#allocation19 + $0xf0] sm:$0xff] }
 0xcda   :  { %6409 = vmatprep.subr.bf16.mxu0 %v6408_v63  ;;  %v3712_v63 = vld [vmem:[#allocation19 + $0xf8] sm:$0xff] }
 0xcdb   :  { %v6448_v0 = vpack.c.bf16 %v3712_v63, %v3711_v62  ;;  %v6552_v62 = vpack.c.bf16 %v4413_v61, %v4412_v60  ;;  %v4396_v63 = vld [vmem:[#allocation23 + $0x110] sm:$0xff] }
 0xcdd   :  { %6411 = vmatpush1.bf16.msra.mxu0 %v6410_v3  ;;  %v6450_v3 = vpack.c.bf16 %v3696_v2, %v3695_v1  ;;  %v4414_v1 = vld [vmem:[#allocation23 + $0x1a0] sm:$0xff]  ;;  %v4415_v2 = vld [vmem:[#allocation23 + $0x1a8] sm:$0xff] }
 0xcde   :  { %6413 = vmatprep.subr.bf16.mxu0 %v6412_v4 }
 0xce1   :  { %6415 = vmatpush1.bf16.msra.mxu0 %v6414_v9  ;;  %v3868_v9 = vld [vmem:[#allocation20 + $0x18] sm:$0xff] }
 0xce2   :  { %6417 = vmatprep.subr.bf16.mxu0 %v6416_v10  ;;  %v6484_v10 = vpack.c.bf16 %v3868_v9, %v3866_v8  ;;  %v4417_v8 = vld [vmem:[#allocation23 + $0x1b8] sm:$0xff] }
 0xce5   :  { %6419 = vmatpush1.bf16.msra.mxu0 %v6418_v13  ;;  %v6486_v13 = vpack.c.bf16 %v3867_v12, %v3865_v11  ;;  %v4401_v11 = vld [vmem:[#allocation23 + $0x138] sm:$0xff] }
 0xce6   :  { %6549 = vmatprep.subr.bf16.mxu0 %v6548_v54  ;;  %v4363_v54 = vld [vmem:[#allocation23 + $0x8] sm:$0xff] }
 0xce7   :  { %v6518_v60 = vpack.c.bf16 %v4363_v54, %v4362_v53  ;;  %v4428_v53 = vld [vmem:[#allocation23 + $0x210] sm:$0xff]  ;;  %v4429_v54 = vld [vmem:[#allocation23 + $0x218] sm:$0xff] }
 0xce8   :  { %3515 = vmatmul.mubr.f32.vlgmr.msra.gmra.mrb[44].mxu0 %v8021_v59 }
 0xdbb   :  { %v8024_v16 = vpop.f32.mrb[44].mxu0 }
 0xdbc   :  { %v8026_v17 = vpop.f32.mrb[45].mxu0  ;;  %v3602_v59 = vmul.f32 %v8024_v16, %v8024_v16 }
 0xdbd   :  { %v3603_v18 = vmul.f32 %v8026_v17, %v8026_v17  ;;  %4841 = vmatprep.subr.msk.mxu1 %vm3524_vm5, %v8026_v17 }
 0xdbe   :  { %4842 = vmatpush1.msk.msra.mxu1 %vm3524_vm5, %v8024_v16 }
 0xdbf   :  { %4843 = vmatmul.mubr.msk.f32.vlgmr.msra.gmra.mrb[48].mxu1 %vm3521_vm6, %v7072_v19  ;;  %4844 = vmatprep.subr.msk.mxu1 %vm3524_vm5, %v3603_v18  ;;  %v6488_v18 = vpack.c.bf16 %v3872_v15, %v3870_v14  ;;  %v4419_v14 = vld [vmem:[#allocation23 + $0x1c8] sm:$0xff] }
 0xdc0   :  { %4845 = vmatpush1.msk.msra.mxu1 %vm3524_vm5, %v3602_v59  ;;  %3674 = vmatprep.mubr.f32.mxu1 %v7071_v40  ;;  %v3874_v59 = vld [vmem:[#allocation20 + $0x48] sm:$0xff] }
 0xdc1   :  { %6421 = vmatprep.subr.bf16.mxu1 %v8032_v20 }
 0xdc3   :  { %4846 = vmatmul.mubr.msk.f32.vlgmr.msra.gmra.mrb[50].mxu1 %vm3521_vm6, %v7072_v19  ;;  %v6436_v19 = vpack.c.bf16 %v3706_v43, %v3705_v42 }
 0xdc4   :  { %6423 = vmatpush3.bf16.msra.mxu1 %v6422_v25 }
 0xdc5   :  { %6425 = vmatprep.subr.bf16.mxu1 %v6424_v26 }
 0xdc8   :  { %6427 = vmatpush3.bf16.msra.mxu1 %v6426_v31 }
 0xdc9   :  { %6429 = vmatprep.subr.bf16.mxu1 %v6428_v32 }
 0xdcc   :  { %6431 = vmatpush3.bf16.msra.mxu1 %v6430_v37 }
 0xdcd   :  { %6433 = vmatprep.subr.bf16.mxu1 %v6432_v39 }
 0xdd0   :  { %6435 = vmatpush3.bf16.msra.mxu1 %v6434_v44 }
 0xdd1   :  { %6437 = vmatprep.subr.bf16.mxu1 %v6436_v19 }
 0xdd4   :  { %6439 = vmatpush3.bf16.msra.mxu1 %v6438_v50 }
 0xdd5   :  { %6441 = vmatprep.subr.bf16.mxu1 %v6440_v51 }
 0xdd8   :  { %6443 = vmatpush3.bf16.msra.mxu1 %v6442_v56 }
 0xdd9   :  { %6445 = vmatprep.subr.bf16.mxu1 %v6444_v57 }
 0xddc   :  { %6447 = vmatpush3.bf16.msra.mxu1 %v6446_v58 }
 0xddd   :  { %6449 = vmatprep.subr.bf16.mxu1 %v6448_v0 }
 0xde0   :  { %6451 = vmatpush3.bf16.msra.mxu1 %v6450_v3 }
 0xde1   :  { %6453 = vmatprep.subr.bf16.mxu1 %v8032_v20  ;;  %v3869_v20 = vld [vmem:[#allocation20 + $0x20] sm:$0xff] }
 0xde2   :  { %v6490_v22 = vpack.c.bf16 %v3871_v21, %v3869_v20  ;;  %v4403_v20 = vld [vmem:[#allocation23 + $0x148] sm:$0xff] }
 0xe92   :  { %v3597_v4 = vpop.f32.mrb[48].mxu1 }
 0xe93   :  { %v3599_v5 = vpop.f32.mrb[49].mxu1 }
 0xe94   :  { %3777 = vmatprep.mubr.f32.mxu1 %v3599_v5  ;;  %v4399_v5 = vld [vmem:[#allocation23 + $0x128] sm:$0xff] }
 0xe95   :  { %3778 = vmatmul.mubr.f32.vlgmr.msra.gmra.mrb[52].mxu1 %v3597_v4  ;;  %v4398_v4 = vld [vmem:[#allocation23 + $0x120] sm:$0xff] }
 0xe96   :  { %6455 = vmatpush3.bf16.msra.mxu1 %v6422_v25  ;;  %v3676_v6 = vpop.f32.mrb[50].mxu1  ;;  %v6492_v25 = vpack.c.bf16 %v3876_v23, %v3874_v59  ;;  %v4421_v59 = vld [vmem:[#allocation23 + $0x1d8] sm:$0xff] }
 0xe97   :  { %6457 = vmatprep.subr.bf16.mxu1 %v6424_v26  ;;  %v3678_v7 = vpop.f32.mrb[51].mxu1  ;;  %v3875_v26 = vld [vmem:[#allocation20 + $0x50] sm:$0xff] }
 0xe98   :  { %3847 = vmatprep.mubr.f32.mxu1 %v3678_v7  ;;  %v6494_v29 = vpack.c.bf16 %v3875_v26, %v3873_v24  ;;  %v4416_v7 = vld [vmem:[#allocation23 + $0x1b0] sm:$0xff] }
 0xe99   :  { %v6560_v9 = vpack.c.bf16 %v4417_v8, %v4416_v7  ;;  %v4404_v24 = vld [vmem:[#allocation23 + $0x150] sm:$0xff] }
 0xe9a   :  { %6459 = vmatpush3.bf16.msra.mxu1 %v6426_v31  ;;  %v3877_v31 = vld [vmem:[#allocation20 + $0x60] sm:$0xff] }
 0xe9b   :  { %6461 = vmatprep.subr.bf16.mxu1 %v6428_v32  ;;  %v3879_v32 = vld [vmem:[#allocation20 + $0x70] sm:$0xff]  ;;  %v4368_v8 = vld [vmem:[#allocation23 + $0x30] sm:$0xff] }
 0xe9c   :  { %v6498_v33 = vpack.c.bf16 %v3879_v32, %v3877_v31  ;;  %v4407_v31 = vld [vmem:[#allocation23 + $0x168] sm:$0xff] }
 0xe9e   :  { %6463 = vmatpush3.bf16.msra.mxu1 %v6430_v37 }
 0xe9f   :  { %6465 = vmatprep.subr.bf16.mxu1 %v6432_v39 }
 0xea2   :  { %6467 = vmatpush3.bf16.msra.mxu1 %v6434_v44 }
 0xea3   :  { %6469 = vmatprep.subr.bf16.mxu1 %v6436_v19 }
 0xea6   :  { %6471 = vmatpush3.bf16.msra.mxu1 %v6438_v50  ;;  %v3862_v50 = vld [vmem:[%s8153_s7] sm:$0x1] }
 0xea7   :  { %6473 = vmatprep.subr.bf16.mxu1 %v6440_v51 }
 0xeaa   :  { %6475 = vmatpush3.bf16.msra.mxu1 %v6442_v56  ;;  %v4395_v56 = vld [vmem:[#allocation23 + $0x108] sm:$0xff] }
 0xeab   :  { %6477 = vmatprep.subr.bf16.mxu1 %v6444_v57  ;;  %v6550_v57 = vpack.c.bf16 %v4395_v56, %v4394_v55  ;;  %v4380_v55 = vld [vmem:[#allocation23 + $0x90] sm:$0xff]  ;;  %v4381_v56 = vld [vmem:[#allocation23 + $0x98] sm:$0xff] }
 0xeac   :  { %v6520_v61 = vpack.c.bf16 %v4381_v56, %v4380_v55 }
 0xead   :  { %6551 = vmatpush3.bf16.msra.mxu0 %v6550_v57  ;;  %v4287_v57 = vld [vmem:[#allocation22 + $0xc] sm:$0xf] }
 0xeae   :  { %6479 = vmatpush3.bf16.msra.mxu1 %v6446_v58  ;;  %6553 = vmatprep.subr.bf16.mxu0 %v6552_v62  ;;  %v4397_v58 = vld [vmem:[#allocation23 + $0x118] sm:$0xff]  ;;  %v4364_v62 = vld [vmem:[#allocation23 + $0x10] sm:$0xff] }
 0xeaf   :  { %6481 = vmatprep.subr.bf16.mxu1 %v6448_v0  ;;  %v6554_v0 = vpack.c.bf16 %v4397_v58, %v4396_v63  ;;  %v4365_v63 = vld [vmem:[#allocation23 + $0x18] sm:$0xff]  ;;  %v4382_v58 = vld [vmem:[#allocation23 + $0xa0] sm:$0xff] }
 0xeb1   :  { %6555 = vmatpush3.bf16.msra.mxu0 %v6554_v0  ;;  %v4383_v0 = vld [vmem:[#allocation23 + $0xa8] sm:$0xff] }
 0xeb2   :  { %6483 = vmatpush3.bf16.msra.mxu1 %v6450_v3  ;;  %v6556_v3 = vpack.c.bf16 %v4415_v2, %v4414_v1  ;;  %v6522_v1 = vpack.c.bf16 %v4365_v63, %v4364_v62  ;;  %v6524_v2 = vpack.c.bf16 %v4383_v0, %v4382_v58  ;;  %v4447_v62 = vld [vmem:[#allocation23 + $0x2a8] sm:$0xff]  ;;  %v4476_v63 = vld [vmem:[#allocation23 + $0x390] sm:$0xff]  ;;  %v4477_v58 = vld [vmem:[#allocation23 + $0x398] sm:$0xff] }
 0xeb3   :  { %6485 = vmatprep.subr.bf16.mxu1 %v6484_v10 }
 0xeb4   :  { %6557 = vmatprep.subr.bf16.mxu0 %v6556_v3  ;;  %v4366_v3 = vld [vmem:[#allocation23 + $0x20] sm:$0xff] }
 0xeb5   :  { %3848 = vmatmul.mubr.f32.vlgmr.msra.gmra.mrb[54].mxu1 %v3676_v6  ;;  %v6558_v6 = vpack.c.bf16 %v4399_v5, %v4398_v4  ;;  %v4367_v4 = vld [vmem:[#allocation23 + $0x28] sm:$0xff]  ;;  %v4384_v5 = vld [vmem:[#allocation23 + $0xb0] sm:$0xff] }
 0xeb6   :  { %3948 = vmatprep.mubr.f32.mxu1 %v7071_v40  ;;  %6487 = vmatpush1.bf16.msra.mxu1 %v6486_v13 }
 0xeb7   :  { %6489 = vmatprep.subr.bf16.mxu1 %v6488_v18  ;;  %6559 = vmatpush3.bf16.msra.mxu0 %v6558_v6  ;;  %v4385_v6 = vld [vmem:[#allocation23 + $0xb8] sm:$0xff] }
 0xeb8   :  { %6561 = vmatprep.subr.bf16.mxu0 %v6560_v9  ;;  %v6528_v7 = vpack.c.bf16 %v4385_v6, %v4384_v5  ;;  %v4369_v9 = vld [vmem:[#allocation23 + $0x38] sm:$0xff] }
 0xeba   :  { %6491 = vmatpush1.bf16.msra.mxu1 %v6490_v22 }
 0xebb   :  { %6493 = vmatprep.subr.bf16.mxu1 %v6492_v25 }
 0xebe   :  { %6495 = vmatpush1.bf16.msra.mxu1 %v6494_v29 }
 0xebf   :  { %6497 = vmatprep.subr.bf16.mxu1 %v6496_v30 }
 0xec2   :  { %6499 = vmatpush1.bf16.msra.mxu1 %v6498_v33 }
 0xec3   :  { %6501 = vmatprep.subr.bf16.mxu1 %v6484_v10  ;;  %v4400_v10 = vld [vmem:[#allocation23 + $0x130] sm:$0xff] }
 0xec4   :  { %v6562_v12 = vpack.c.bf16 %v4401_v11, %v4400_v10  ;;  %v4386_v10 = vld [vmem:[#allocation23 + $0xc0] sm:$0xff]  ;;  %v4387_v11 = vld [vmem:[#allocation23 + $0xc8] sm:$0xff] }
 0xec6   :  { %6563 = vmatpush3.bf16.msra.mxu0 %v6562_v12  ;;  %v6530_v12 = vpack.c.bf16 %v4369_v9, %v4368_v8  ;;  %v4461_v8 = vld [vmem:[#allocation23 + $0x318] sm:$0xff]  ;;  %v4448_v9 = vld [vmem:[#allocation23 + $0x2b0] sm:$0xff] }
 0xf68   :  { %v5314_v34 = vpop.f32.mrb[52].mxu1 }
 0xf69   :  { %v5315_v35 = vpop.f32.mrb[53].mxu1 }
 0xf6a   :  { %v5316_v36 = vadd.f32 %v5315_v35, %v5314_v34 }
 0xf6c   :  { %v3854_v37 = vmul.f32 0.055555556, %v5316_v36 }
 0xf6e   :  { %v3856_v42 = vmul.f32 %v3854_v37, %v3854_v37 }
 0xf88   :  { %v5349_v39 = vpop.f32.mrb[54].mxu1 }
 0xf89   :  { %v5350_v38 = vpop.f32.mrb[55].mxu1 }
 0xf8a   :  { %v5351_v41 = vadd.f32 %v5350_v38, %v5349_v39 }
 0xf8c   :  { %v3855_v43 = vmul.f32 0.055555556, %v5351_v41 }
 0xf8e   :  { %v3857_v44 = vsub.f32 %v3855_v43, %v3856_v42 }
 0xf90   :  { %v3859_v19 = vadd.f32 1e-05, %v3857_v44 }
 0xf92   :  { %6676 = vrsqrt.f32 %v3859_v19 }
 0xf9c   :  { %v6677_v47 = vpop.eup %6676 }
 0xf9d   :  { %v3861_v48 = vmul.f32 %v6677_v47, %v3858_v45 }
 0xf9f   :  { %4847 = vmatmul.mubr.msk.f32.vlgmr.msra.gmra.mrb[56].mxu1 %vm294_vm0, %v3861_v48  ;;  %v3863_v49 = vmul.f32 %v3861_v48, %v3854_v37 }
 0xfa0   :  { %6503 = vmatpush1.bf16.msra.mxu1 %v6486_v13  ;;  %4022 = vmatprep.mubr.f32.mxu1 %v7071_v40  ;;  %v4418_v13 = vld [vmem:[#allocation23 + $0x1c0] sm:$0xff] }
 0xfa1   :  { %6505 = vmatprep.subr.bf16.mxu1 %v6488_v18  ;;  %v3864_v51 = vsub.f32 %v3862_v50, %v3863_v49  ;;  %v6564_v15 = vpack.c.bf16 %v4419_v14, %v4418_v13  ;;  %v4402_v18 = vld [vmem:[#allocation23 + $0x140] sm:$0xff]  ;;  %v4053_v50 = vld [vmem:[#allocation22] sm:$0xf]  ;;  %v6532_v13 = vpack.c.bf16 %v4387_v11, %v4386_v10  ;;  %v4449_v10 = vld [vmem:[#allocation23 + $0x2b8] sm:$0xff] }
 0xfa2   :  { %v6566_v21 = vpack.c.bf16 %v4403_v20, %v4402_v18  ;;  %v4370_v14 = vld [vmem:[#allocation23 + $0x40] sm:$0xff]  ;;  %v4388_v18 = vld [vmem:[#allocation23 + $0xd0] sm:$0xff]  ;;  %v4389_v20 = vld [vmem:[#allocation23 + $0xd8] sm:$0xff] }
 0xfa3   :  { %6565 = vmatprep.subr.bf16.mxu0 %v6564_v15  ;;  %v4371_v15 = vld [vmem:[#allocation23 + $0x48] sm:$0xff]  ;;  %v4478_v11 = vld [vmem:[#allocation23 + $0x3a0] sm:$0xff] }
 0xfa4   :  { %6507 = vmatpush1.bf16.msra.mxu1 %v6490_v22  ;;  %v4420_v22 = vld [vmem:[#allocation23 + $0x1d0] sm:$0xff]  ;;  %6567 = vmatpush3.bf16.msra.mxu0 %v6566_v21  ;;  %v6534_v21 = vpack.c.bf16 %v4371_v15, %v4370_v14 }
 0xfa5   :  { %6509 = vmatprep.subr.bf16.mxu1 %v6492_v25  ;;  %v6568_v23 = vpack.c.bf16 %v4421_v59, %v4420_v22  ;;  %v4405_v25 = vld [vmem:[#allocation23 + $0x158] sm:$0xff]  ;;  %v6536_v22 = vpack.c.bf16 %v4389_v20, %v4388_v18  ;;  %v4372_v59 = vld [vmem:[#allocation23 + $0x50] sm:$0xff] }
 0xfa6   :  { %v6570_v26 = vpack.c.bf16 %v4405_v25, %v4404_v24  ;;  %v4390_v24 = vld [vmem:[#allocation23 + $0xe0] sm:$0xff]  ;;  %v4391_v25 = vld [vmem:[#allocation23 + $0xe8] sm:$0xff]  ;;  %v4432_v15 = vld [vmem:[#allocation23 + $0x230] sm:$0xff] }
 0xfa7   :  { %6569 = vmatprep.subr.bf16.mxu0 %v6568_v23  ;;  %v4373_v23 = vld [vmem:[#allocation23 + $0x58] sm:$0xff] }
 0xfa8   :  { %6511 = vmatpush1.bf16.msra.mxu1 %v6494_v29  ;;  %v6572_v29 = vpack.c.bf16 %v4423_v28, %v4422_v27  ;;  %6571 = vmatpush3.bf16.msra.mxu0 %v6570_v26  ;;  %v6538_v26 = vpack.c.bf16 %v4373_v23, %v4372_v59  ;;  %v6540_v27 = vpack.c.bf16 %v4391_v25, %v4390_v24  ;;  %v4374_v28 = vld [vmem:[#allocation23 + $0x60] sm:$0xff]  ;;  %v4433_v18 = vld [vmem:[#allocation23 + $0x238] sm:$0xff]  ;;  %v4463_v23 = vld [vmem:[#allocation23 + $0x328] sm:$0xff] }
 0xfa9   :  { %6513 = vmatprep.subr.bf16.mxu1 %v6496_v30  ;;  %v4406_v30 = vld [vmem:[#allocation23 + $0x160] sm:$0xff] }
 0xfaa   :  { %6573 = vmatprep.subr.bf16.mxu0 %v6572_v29  ;;  %v6574_v32 = vpack.c.bf16 %v4407_v31, %v4406_v30  ;;  %v4375_v29 = vld [vmem:[#allocation23 + $0x68] sm:$0xff]  ;;  %v4392_v30 = vld [vmem:[#allocation23 + $0xf0] sm:$0xff]  ;;  %v4393_v31 = vld [vmem:[#allocation23 + $0xf8] sm:$0xff] }
 0xfab   :  { %v4462_v59 = vld [vmem:[#allocation23 + $0x320] sm:$0xff] }
 0xfac   :  { %6515 = vmatpush1.bf16.msra.mxu1 %v6498_v33  ;;  %6575 = vmatpush3.bf16.msra.mxu0 %v6574_v32  ;;  %v6542_v32 = vpack.c.bf16 %v4375_v29, %v4374_v28  ;;  %v4450_v24 = vld [vmem:[#allocation23 + $0x2c0] sm:$0xff]  ;;  %v4481_v28 = vld [vmem:[#allocation23 + $0x3b8] sm:$0xff]  ;;  %v6594_v29 = vpack.c.bf16 %v4433_v18, %v4432_v15 }
 0xfad   :  { %v4473_v15 = vld [vmem:[#allocation23 + $0x378] sm:$0xff] }
 0xfaf   :  { %4848 = vmatmul.mubr.msk.f32.vlgmr.msra.gmra.mrb[58].mxu1 %vm294_vm0, %v3864_v51  ;;  %v4211_v51 = vld [vmem:[#allocation22 + $0x8] sm:$0xf] }
 0xfb0   :  { %4127 = vmatprep.mubr.f32.mxu1 %v7071_v40 }
0x1072   :  { %v3950_v33 = vpop.f32.mrb[56].mxu1 }
0x1073   :  { %v4032_v34 = vrot.slane %v3950_v33, %v7934_v46  ;;  %v3952_v35 = vpop.f32.mrb[57].mxu1  ;;  %v6544_v33 = vpack.c.bf16 %v4393_v31, %v4392_v30  ;;  %v6622_v30 = vpack.c.bf16 %v4463_v23, %v4462_v59  ;;  %v4434_v31 = vld [vmem:[#allocation23 + $0x240] sm:$0xff] }
0x1074   :  { %v4036_v36 = vrot.slane %v3952_v35, %v7934_v46  ;;  %v4377_v35 = vld [vmem:[#allocation23 + $0x78] sm:$0xff]  ;;  %v4861_v23 = vld [vmem:[#allocation25] ss:$0 sm:$0xff] }
0x1075   :  { %v4037_v37 = vmul.f32 %v4032_v34, %v8024_v16  ;;  %v4378_v16 = vld [vmem:[#allocation23 + $0x80] sm:$0xff]  ;;  %v4376_v34 = vld [vmem:[#allocation23 + $0x70] sm:$0xff] }
0x1076   :  { %v4038_v39 = vmul.f32 %v4036_v36, %v8026_v17  ;;  %v4379_v17 = vld [vmem:[#allocation23 + $0x88] sm:$0xff]  ;;  %v6546_v36 = vpack.c.bf16 %v4377_v35, %v4376_v34 }
0x1077   :  { %v6516_v52 = vpack.c.bf16 %v4379_v17, %v4378_v16  ;;  %v4444_v16 = vld [vmem:[#allocation23 + $0x290] sm:$0xff]  ;;  %v4445_v17 = vld [vmem:[#allocation23 + $0x298] sm:$0xff] }
0x1078   :  { %v6584_v56 = vpack.c.bf16 %v4445_v17, %v4444_v16  ;;  %v4454_v16 = vld [vmem:[#allocation23 + $0x2e0] sm:$0xff]  ;;  %v4455_v17 = vld [vmem:[#allocation23 + $0x2e8] sm:$0xff] }
0x1082   :  { %v4024_v38 = vpop.f32.mrb[58].mxu1 }
0x1083   :  { %v4042_v41 = vrot.slane %v4024_v38, %v7934_v46  ;;  %v4026_v42 = vpop.f32.mrb[59].mxu1  ;;  %v4442_v38 = vld [vmem:[#allocation23 + $0x280] sm:$0xff] }
0x1084   :  { %v4046_v43 = vrot.slane %v4026_v42, %v7934_v46  ;;  %v4135_v46 = vld [vmem:[#allocation22 + $0x4] sm:$0xf]  ;;  %v4443_v42 = vld [vmem:[#allocation23 + $0x288] sm:$0xff] }
0x1085   :  { %v4047_v44 = vadd.f32 %v4042_v41, %v4037_v37  ;;  %v4424_v37 = vld [vmem:[#allocation23 + $0x1f0] sm:$0xff] }
0x1086   :  { %v4048_v19 = vadd.f32 %v4046_v43, %v4038_v39  ;;  %v4425_v39 = vld [vmem:[#allocation23 + $0x1f8] sm:$0xff]  ;;  %v4408_v43 = vld [vmem:[#allocation23 + $0x170] sm:$0xff] }
0x1087   :  { %v4049_v45 = vmul.f32 0.2, %v4047_v44  ;;  %v6576_v41 = vpack.c.bf16 %v4425_v39, %v4424_v37  ;;  %v4465_v37 = vld [vmem:[#allocation23 + $0x338] sm:$0xff]  ;;  %v4452_v39 = vld [vmem:[#allocation23 + $0x2d0] sm:$0xff] }
0x1088   :  { %v4050_v47 = vmul.f32 0.2, %v4048_v19 }
0x1089   :  { %v4051_v49 = vmax.f32 %v4047_v44, %v4049_v45  ;;  %v4409_v44 = vld [vmem:[#allocation23 + $0x178] sm:$0xff]  ;;  %6577 = vmatprep.subr.bf16.mxu0 %v6576_v41 }
0x108a   :  { %v4052_v48 = vmax.f32 %v4048_v19, %v4050_v47  ;;  %v6580_v19 = vpack.c.bf16 %v4443_v42, %v4442_v38  ;;  %v6578_v45 = vpack.c.bf16 %v4409_v44, %v4408_v43  ;;  %v4474_v47 = vld [vmem:[#allocation23 + $0x380] sm:$0xff]  ;;  %v4453_v41 = vld [vmem:[#allocation23 + $0x2d8] sm:$0xff]  ;;  %v4483_v43 = vld [vmem:[#allocation23 + $0x3c8] sm:$0xff] }
0x108b   :  { %v4482_v42 = vld [vmem:[#allocation23 + $0x3c0] sm:$0xff] }
0x108c   :  { %4849 = vmatprep.subr.msk.mxu1 %vm3524_vm5, %v4052_v48  ;;  %6579 = vmatpush3.bf16.msra.mxu0 %v6578_v45  ;;  %v4436_v45 = vld [vmem:[#allocation23 + $0x250] sm:$0xff] }
0x108d   :  { %4850 = vmatpush1.msk.msra.mxu1 %vm3524_vm5, %v4051_v49 }
0x108e   :  { %4851 = vmatmul.mubr.msk.f32.vlgmr.msra.gmra.mrb[60].mxu1 %vm3521_vm6, %v4053_v50  ;;  %4852 = vmatprep.subr.msk.mxu1 %vm3524_vm5, %v4052_v48  ;;  %v4426_v50 = vld [vmem:[#allocation23 + $0x200] sm:$0xff] }
0x108f   :  { %4853 = vmatpush1.msk.msra.mxu1 %vm3524_vm5, %v4051_v49  ;;  %4203 = vmatprep.mubr.f32.mxu1 %v7071_v40 }
0x1090   :  { %4855 = vmatprep.subr.msk.mxu1 %vm3524_vm5, %v4052_v48 }
0x1092   :  { %4854 = vmatmul.mubr.msk.f32.vlgmr.msra.gmra.mrb[62].mxu1 %vm3521_vm6, %v4135_v46  ;;  %v4427_v46 = vld [vmem:[#allocation23 + $0x208] sm:$0xff] }
0x1093   :  { %4856 = vmatpush1.msk.msra.mxu1 %vm3524_vm5, %v4051_v49  ;;  %4279 = vmatprep.mubr.f32.mxu1 %v7071_v40 }
0x1094   :  { %4858 = vmatprep.subr.msk.mxu1 %vm3524_vm5, %v4052_v48  ;;  %v4475_v48 = vld [vmem:[#allocation23 + $0x388] sm:$0xff] }
0x1096   :  { %4857 = vmatmul.mubr.msk.f32.vlgmr.msra.gmra.mrb[64].mxu1 %vm3521_vm6, %v4211_v51 }
0x1097   :  { %4859 = vmatpush1.msk.msra.mxu1 %vm3524_vm5, %v4051_v49  ;;  %4355 = vmatprep.mubr.f32.mxu1 %v7071_v40  ;;  %v6526_v40 = vpack.c.bf16 %v4367_v4, %v4366_v3  ;;  %v6612_v49 = vpack.c.bf16 %v4475_v48, %v4474_v47  ;;  %v4430_v3 = vld [vmem:[#allocation23 + $0x220] sm:$0xff]  ;;  %v4431_v4 = vld [vmem:[#allocation23 + $0x228] sm:$0xff]  ;;  %v4437_v47 = vld [vmem:[#allocation23 + $0x258] sm:$0xff]  ;;  %v6600_v48 = vpack.c.bf16 %v4453_v41, %v4452_v39 }
0x1098   :  { %6517 = vmatprep.subr.bf16.mxu1 %v6516_v52  ;;  %v6582_v52 = vpack.c.bf16 %v4427_v46, %v4426_v50  ;;  %v4466_v50 = vld [vmem:[#allocation23 + $0x340] sm:$0xff]  ;;  %v4467_v46 = vld [vmem:[#allocation23 + $0x348] sm:$0xff] }
0x1099   :  { %6613 = vmatprep.subr.bf16.mxu0 %v6612_v49  ;;  %v6628_v49 = vpack.c.bf16 %v4483_v43, %v4482_v42 }
0x109a   :  { %4860 = vmatmul.mubr.msk.f32.vlgmr.msra.gmra.mrb[66].mxu1 %vm3521_vm6, %v4287_v57  ;;  %v4458_v57 = vld [vmem:[#allocation23 + $0x300] sm:$0xff] }
0x109b   :  { %6519 = vmatpush3.bf16.msra.mxu1 %v6518_v60  ;;  %v4459_v60 = vld [vmem:[#allocation23 + $0x308] sm:$0xff] }
0x109c   :  { %6521 = vmatprep.subr.bf16.mxu1 %v6520_v61  ;;  %v4446_v61 = vld [vmem:[#allocation23 + $0x2a0] sm:$0xff] }
0x109d   :  { %v6588_v6 = vpack.c.bf16 %v4447_v62, %v4446_v61  ;;  %v4468_v61 = vld [vmem:[#allocation23 + $0x350] sm:$0xff]  ;;  %v4469_v62 = vld [vmem:[#allocation23 + $0x358] sm:$0xff] }
0x109f   :  { %6523 = vmatpush3.bf16.msra.mxu1 %v6522_v1  ;;  %v6586_v1 = vpack.c.bf16 %v4429_v54, %v4428_v53  ;;  %v6602_v53 = vpack.c.bf16 %v4437_v47, %v4436_v45  ;;  %v6630_v54 = vpack.c.bf16 %v4467_v46, %v4466_v50 }
0x10a0   :  { %6525 = vmatprep.subr.bf16.mxu1 %v6524_v2  ;;  %v6614_v2 = vpack.c.bf16 %v4459_v60, %v4458_v57  ;;  %v6604_v57 = vpack.c.bf16 %v4455_v17, %v4454_v16 }
0x10a3   :  { %6527 = vmatpush3.bf16.msra.mxu1 %v6526_v40  ;;  %v6616_v40 = vpack.c.bf16 %v4477_v58, %v4476_v63  ;;  %v4456_v63 = vld [vmem:[#allocation23 + $0x2f0] sm:$0xff]  ;;  %v4457_v58 = vld [vmem:[#allocation23 + $0x2f8] sm:$0xff] }
0x10a4   :  { %6529 = vmatprep.subr.bf16.mxu1 %v6528_v7  ;;  %v4460_v7 = vld [vmem:[#allocation23 + $0x310] sm:$0xff] }
0x10a5   :  { %v6618_v14 = vpack.c.bf16 %v4461_v8, %v4460_v7  ;;  %v4470_v7 = vld [vmem:[#allocation23 + $0x360] sm:$0xff]  ;;  %v4471_v8 = vld [vmem:[#allocation23 + $0x368] sm:$0xff] }
0x10a7   :  { %6531 = vmatpush3.bf16.msra.mxu1 %v6530_v12  ;;  %v4479_v12 = vld [vmem:[#allocation23 + $0x3a8] sm:$0xff] }
0x10a8   :  { %6533 = vmatprep.subr.bf16.mxu1 %v6532_v13  ;;  %v6590_v13 = vpack.c.bf16 %v4431_v4, %v4430_v3  ;;  %v6634_v3 = vpack.c.bf16 %v4469_v62, %v4468_v61  ;;  %v4440_v4 = vld [vmem:[#allocation23 + $0x270] sm:$0xff] }
0x10ab   :  { %6535 = vmatpush3.bf16.msra.mxu1 %v6534_v21  ;;  %v6592_v21 = vpack.c.bf16 %v4449_v10, %v4448_v9  ;;  %v4488_v9 = vld [vmem:[#allocation23 + $0x3f0] sm:$0xff]  ;;  %v4489_v10 = vld [vmem:[#allocation23 + $0x3f8] sm:$0xff] }
0x10ac   :  { %6537 = vmatprep.subr.bf16.mxu1 %v6536_v22  ;;  %v6620_v22 = vpack.c.bf16 %v4479_v12, %v4478_v11  ;;  %v6638_v12 = vpack.c.bf16 %v4471_v8, %v4470_v7 }
0x10af   :  { %6539 = vmatpush3.bf16.msra.mxu1 %v6538_v26  ;;  %v4451_v26 = vld [vmem:[#allocation23 + $0x2c8] sm:$0xff] }
0x10b0   :  { %6541 = vmatprep.subr.bf16.mxu1 %v6540_v27  ;;  %v4480_v27 = vld [vmem:[#allocation23 + $0x3b0] sm:$0xff]  ;;  %v6596_v34 = vpack.c.bf16 %v4451_v26, %v4450_v24 }
0x10b1   :  { %v6624_v35 = vpack.c.bf16 %v4481_v28, %v4480_v27 }
0x10b3   :  { %6543 = vmatpush3.bf16.msra.mxu1 %v6542_v32  ;;  %v4435_v32 = vld [vmem:[#allocation23 + $0x248] sm:$0xff] }
0x10b4   :  { %6545 = vmatprep.subr.bf16.mxu1 %v6544_v33  ;;  %v6598_v44 = vpack.c.bf16 %v4435_v32, %v4434_v31 }
0x10b7   :  { %6547 = vmatpush3.bf16.msra.mxu1 %v6546_v36  ;;  %v4464_v36 = vld [vmem:[#allocation23 + $0x330] sm:$0xff] }
0x10b8   :  { %6581 = vmatprep.subr.bf16.mxu1 %v6580_v19  ;;  %v6626_v19 = vpack.c.bf16 %v4465_v37, %v4464_v36 }
0x1161   :  { %v4129_v51 = vpop.f32.mrb[60].mxu1 }
0x1162   :  { %v4131_v55 = vpop.f32.mrb[61].mxu1 }
0x1163   :  { %4561 = vmatprep.mubr.f32.mxu1 %v4131_v55  ;;  %v4438_v55 = vld [vmem:[#allocation23 + $0x260] sm:$0xff] }
0x1164   :  { %4562 = vmatmul.mubr.f32.vlgmr.msra.gmra.mrb[68].mxu1 %v4129_v51  ;;  %v4484_v51 = vld [vmem:[#allocation23 + $0x3d0] sm:$0xff] }
0x1165   :  { %6583 = vmatpush3.bf16.msra.mxu1 %v6582_v52  ;;  %v4205_v0 = vpop.f32.mrb[62].mxu1  ;;  %v4485_v52 = vld [vmem:[#allocation23 + $0x3d8] sm:$0xff] }
0x1166   :  { %v4207_v5 = vpop.f32.mrb[63].mxu1  ;;  %6585 = vmatprep.subr.bf16.mxu1 %v6584_v56  ;;  %v4439_v56 = vld [vmem:[#allocation23 + $0x268] sm:$0xff]  ;;  %v6632_v60 = vpack.c.bf16 %v4485_v52, %v4484_v51 }
0x1167   :  { %4631 = vmatprep.mubr.f32.mxu0 %v4207_v5  ;;  %v6608_v5 = vpack.c.bf16 %v4457_v58, %v4456_v63 }
0x1168   :  { %4632 = vmatmul.mubr.f32.vlgmr.msra.gmra.mrb[46].mxu0 %v4205_v0  ;;  %v4486_v0 = vld [vmem:[#allocation23 + $0x3e0] sm:$0xff] }
0x1169   :  { %6587 = vmatpush3.bf16.msra.mxu1 %v6586_v1  ;;  %6615 = vmatpush3.bf16.msra.mxu0 %v6614_v2  ;;  %v8079_v20 = vpop.f32.mrb[64].mxu1  ;;  %v4487_v1 = vld [vmem:[#allocation23 + $0x3e8] sm:$0xff]  ;;  %v6606_v2 = vpack.c.bf16 %v4439_v56, %v4438_v55 }
0x116a   :  { %6589 = vmatprep.subr.bf16.mxu1 %v6588_v6  ;;  %6617 = vmatprep.subr.bf16.mxu0 %v6616_v40  ;;  %v4283_v25 = vpop.f32.mrb[65].mxu1  ;;  %v6636_v6 = vpack.c.bf16 %v4487_v1, %v4486_v0  ;;  %v4441_v40 = vld [vmem:[#allocation23 + $0x278] sm:$0xff] }
0x116b   :  { %4701 = vmatprep.mubr.f32.mxu1 %v4283_v25  ;;  %v6610_v11 = vpack.c.bf16 %v4441_v40, %v4440_v4 }
0x116d   :  { %6591 = vmatpush3.bf16.msra.mxu1 %v6590_v13  ;;  %6619 = vmatpush3.bf16.msra.mxu0 %v6618_v14  ;;  %v8081_v33 = vpop.f32.mrb[66].mxu1  ;;  %v6640_v13 = vpack.c.bf16 %v4489_v10, %v4488_v9  ;;  %v4472_v14 = vld [vmem:[#allocation23 + $0x370] sm:$0xff] }
0x116e   :  { %6593 = vmatprep.subr.bf16.mxu1 %v6592_v21  ;;  %6621 = vmatprep.subr.bf16.mxu0 %v6620_v22  ;;  %v4359_v38 = vpop.f32.mrb[67].mxu1  ;;  %v6642_v18 = vpack.c.bf16 %v4473_v15, %v4472_v14 }
0x116f   :  { %4771 = vmatprep.mubr.f32.mxu0 %v4359_v38 }
0x1171   :  { %6595 = vmatpush3.bf16.msra.mxu1 %v6594_v29  ;;  %6623 = vmatpush3.bf16.msra.mxu0 %v6622_v30 }
0x1172   :  { %6597 = vmatprep.subr.bf16.mxu1 %v6596_v34  ;;  %6625 = vmatprep.subr.bf16.mxu0 %v6624_v35 }
0x1175   :  { %6599 = vmatpush3.bf16.msra.mxu1 %v6598_v44  ;;  %6627 = vmatpush3.bf16.msra.mxu0 %v6626_v19 }
0x1176   :  { %6601 = vmatprep.subr.bf16.mxu1 %v6600_v48  ;;  %6629 = vmatprep.subr.bf16.mxu0 %v6628_v49 }
0x1179   :  { %6603 = vmatpush3.bf16.msra.mxu1 %v6602_v53  ;;  %6631 = vmatpush3.bf16.msra.mxu0 %v6630_v54 }
0x117a   :  { %6605 = vmatprep.subr.bf16.mxu1 %v6604_v57  ;;  %6633 = vmatprep.subr.bf16.mxu0 %v6632_v60 }
0x117d   :  { %6607 = vmatpush3.bf16.msra.mxu1 %v6606_v2  ;;  %6635 = vmatpush3.bf16.msra.mxu0 %v6634_v3 }
0x117e   :  { %6609 = vmatprep.subr.bf16.mxu1 %v6608_v5  ;;  %6637 = vmatprep.subr.bf16.mxu0 %v6636_v6 }
0x1181   :  { %6611 = vmatpush3.bf16.msra.mxu1 %v6610_v11  ;;  %6639 = vmatpush3.bf16.msra.mxu0 %v6638_v12 }
0x1182   :  { %6641 = vmatprep.subr.bf16.mxu0 %v6640_v13 }
0x1184   :  { %4702 = vmatmul.mubr.f32.vlgmr.msra.gmra.mrb[70].mxu1 %v8079_v20 }
0x1185   :  { %6643 = vmatpush3.bf16.msra.mxu0 %v6642_v18 }
0x1188   :  { %4772 = vmatmul.mubr.f32.vlgmr.msra.gmra.mrb[48].mxu0 %v8081_v33 }
0x1237   :  { %v5384_v21 = vpop.f32.mrb[68].mxu1 }
0x1238   :  { %v5385_v22 = vpop.f32.mrb[69].mxu1 }
0x1239   :  { %v5386_v59 = vadd.f32 %v5385_v22, %v5384_v21 }
0x123b   :  { %v5419_v24 = vpop.f32.mrb[46].mxu0  ;;  %v4564_v26 = vadd.f32 %v5386_v59, %v4861_v23 }
0x123c   :  { %v5420_v25 = vpop.f32.mrb[47].mxu0 }
0x123d   :  { %v5421_v27 = vadd.f32 %v5420_v25, %v5419_v24 }
0x123f   :  { %v4634_v28 = vadd.f32 %v5421_v27, %v4564_v26 }
0x1257   :  { %v5454_v29 = vpop.f32.mrb[70].mxu1 }
0x1258   :  { %v5455_v30 = vpop.f32.mrb[71].mxu1 }
0x1259   :  { %v5456_v31 = vadd.f32 %v5455_v30, %v5454_v29 }
0x125b   :  { %v4704_v32 = vadd.f32 %v5456_v31, %v4634_v28  ;;  %v5489_v34 = vpop.f32.mrb[48].mxu0 }
0x125c   :  { %v5490_v35 = vpop.f32.mrb[49].mxu0 }
0x125d   :  { %v5491_v20 = vadd.f32 %v5490_v35, %v5489_v34 }
0x125f   :  { %v4774_v36 = vadd.f32 %v5491_v20, %v4704_v32 }
0x1261   :  { %4777 = vst [vmem:[#allocation26] sm:$0xf] %v4774_v36 }
0x1262   :  { %7019 = shalt.err (!%p7016_p12)
}
0x1263   :  { %s8154_s10 = sld [smem:[#allocation47_spill]] }
0x1269   :  { %s7020_s25 = scalar_lea.hbm %s8154_s10, 64 }
0x126a   :  { %p7021_p13 = scmp.ne.s32.totalorder %s8154_s10, %s7020_s25  ;;  %p7024_p0 = scmp.lt.u32.totalorder %s7020_s25, %s8154_s10 }
0x126c   :  { %p7026_p1 = pnand %p7024_p0, %p7021_p13 }
0x126e   :  { %7029 = shalt.err (!%p7026_p1)
}
0x126f   :  { %4787 = dma.vmem_to_hbm [thread:$0]  %s4785_s17, 64, %s8154_s10, [#allocation4]  }
0x1270   :  { %7046 = dma.done.wait [#allocation4], 64  }
0x1271   :  { %7047 = vsyncadd [#allocation4], 4294967232 }
0x1272   :  { %4791 = vsyncpa [#allocation3], 1 }
0x1273   :  { %4792 = vsyncpa [#allocation6], 1 }
0x1274   :  { %4793 = vsyncpa [#allocation9], 1 }
0x1275   :  { %4794 = vsyncpa [#allocation12], 1 }
0x1276   :  { %4795 = vsyncpa [#allocation15], 1 }
0x1277   :  { %4796 = vsyncpa [#allocation18], 1 }
0x1278   :  { %4797 = vsyncpa [#allocation21], 1 }
0x1279   :  { %4798 = vsyncpa [#allocation24], 1 }
0x127a   :  { %4799 = vsyncpa [#allocation4], 1 }

</bundles_post_ra>
